<compile_context>
chip_gen: v5e
topology: v5e:2x2
jax: 0.10.0
libtpu: 0.0.40
codegen_flags: <defaults>
</compile_context>

<pallas_src>
import jax
import jax.numpy as jnp
import numpy as np
from jax.experimental import pallas as pl
from jax.experimental.pallas import tpu as pltpu


# ------------------------------- Pallas kernel -------------------------------
def st_block1_kernel(xcol_ref, wfr_ref, agcn_ref, bg_ref, wa1_ref, wa2_ref,
                     watt_ref, batt_ref, vatt_ref, bnsc_ref, bnsh_ref,
                     bglob_ref, lnw_ref, lnb_ref, out_ref, tco_ref):
    f32 = jnp.float32
    N, c_out, T = lnw_ref.shape

    def lrelu(v):
        return jnp.where(v >= 0, v, 0.01 * v)

    # conv1 (1x1) + time_conv (1,Kt): taps and biases folded -> ONE MXU matmul
    front = jnp.dot(wfr_ref[...], xcol_ref[...],
                    preferred_element_type=f32)                      # [2*c_out, N*T]

    # relayout lane-dense [2*c_out, (n,t)] -> node-major [(n, ch), t]
    front_r = jnp.concatenate(
        [front[:, n * T:(n + 1) * T] for n in range(N)], axis=0)     # [N*2*c_out, T]
    fr3 = front_r.reshape(N, 2 * c_out, T)
    x_input = fr3[:, :c_out, :]                                      # conv1 branch
    h = lrelu(fr3[:, c_out:, :]).reshape(N * c_out, T)               # leaky(time_conv)
    # TODO(synk): F.dropout(0.5) is training-time randomness; inference -> identity.

    # Chebyshev GCN + its (1,Kt) conv, folded into one dense operator.
    # +/-1 time shifts (im2col taps) via tiny [T,T] shift matrices on the MXU.
    r = jax.lax.broadcasted_iota(jnp.int32, (T, T), 0)
    c = jax.lax.broadcasted_iota(jnp.int32, (T, T), 1)
    sh_m = jnp.where(r == c - 1, 1.0, 0.0).astype(f32)   # x @ sh_m -> value at t is x[t-1]
    sh_p = jnp.where(r == c + 1, 1.0, 0.0).astype(f32)   # x @ sh_p -> value at t is x[t+1]
    h_m1 = jnp.dot(h, sh_m, preferred_element_type=f32)
    h_p1 = jnp.dot(h, sh_p, preferred_element_type=f32)
    hcol = jnp.concatenate([h_m1, h, h_p1], axis=0)                  # [Kt*N*c_out, T]
    gcn = jnp.dot(agcn_ref[...], hcol, preferred_element_type=f32)   # [2*c_out*N, T]
    gcn = gcn.reshape(N, 2 * c_out, T) + bg_ref[...]

    # gate: sigmoid(gate) * leaky_relu(filter)
    xg = jax.nn.sigmoid(gcn[:, c_out:, :]) * lrelu(gcn[:, :c_out, :])   # [N, c_out, T]

    # temporal attention (TATT_1), eval-mode BatchNorm folded into an affine
    f1 = jnp.sum(xg * wa1_ref[...], axis=1)                          # [N, T]
    f2 = jnp.sum(xg * wa2_ref[...], axis=0)                          # [c_out, T]
    att = jnp.dot(jnp.dot(f1.T, watt_ref[...], preferred_element_type=f32),
                  f2, preferred_element_type=f32)                    # [T, T]
    att = jax.nn.sigmoid(att + batt_ref[...])
    lg = jnp.dot(vatt_ref[...], att, preferred_element_type=f32)
    lg = lg * bnsc_ref[...] + bnsh_ref[...]                          # BN1d (eval) affine
    lg = lg + bglob_ref[...]                                         # module-level global B
    m = jnp.max(lg, axis=-1, keepdims=True)
    e = jnp.exp(lg - m)
    coefs = e * pl.reciprocal(jnp.sum(e, axis=-1, keepdims=True), approx=True)
    tcoef = coefs.T                                                  # returned T_coef
    tco_ref[...] = tcoef

    # apply attention along time, residual, LayerNorm over (c_out, N, T)
    mixed = jnp.dot(xg.reshape(N * c_out, T), tcoef,
                    preferred_element_type=f32).reshape(N, c_out, T)
    pre = lrelu(mixed) + x_input
    mu = jnp.mean(pre, keepdims=True)
    var = jnp.mean((pre - mu) * (pre - mu), keepdims=True)
    y = (pre - mu) * jax.lax.rsqrt(var + 1e-5)
    out3 = y * lnw_ref[...] + lnb_ref[...]                           # [N, c_out, T]

    # lane-dense output block [c_out, N*T]; per-node sliced stores into it
    for n in range(N):
        out_ref[:, n * T:(n + 1) * T] = out3[n]


# ------------------------------ wrapper (glue) --------------------------------
def st_block_1(x, supports, params):
    B, c_in, N, T = x.shape
    c_out, K, Kt = params["c_out"], params["K"], params["Kt"]
    f32 = jnp.float32
    NT = N * T
    ctr = Kt // 2   # center tap == unshifted input (used by the 1x1 conv)

    # (1) fold conv1 + time_conv (+ biases) into one [2*c_out, Kt*c_in+1] matrix
    w_c1 = params["w_conv1"][:, :, 0, 0].astype(f32)
    w_tc = params["w_time"][:, :, 0, :].astype(f32)
    zblk = jnp.zeros((c_out, c_in), f32)
    rows_c1 = jnp.concatenate(
        [w_c1 if dt == ctr else zblk for dt in range(Kt)]
        + [params["b_conv1"].astype(f32)[:, None]], axis=1)
    rows_tc = jnp.concatenate(
        [w_tc[:, :, dt] for dt in range(Kt)]
        + [params["b_time"].astype(f32)[:, None]], axis=1)
    w_front = jnp.concatenate([rows_c1, rows_tc], axis=0)            # [2*c_out, Kt*c_in+1]

    # (2) im2col input, lane-dense: slab dt holds x[..., t+dt-1] (zero padded), + ones row
    xf = x.astype(f32)
    xpad = jnp.pad(xf, ((0, 0), (0, 0), (0, 0), (1, 1)))
    slabs = [xpad[:, :, :, dt:dt + T].reshape(B, c_in, NT) for dt in range(Kt)]
    xcol = jnp.concatenate(slabs + [jnp.ones((B, 1, NT), f32)], axis=1)   # [B, Kt*c_in+1, NT]

    # (3) Chebyshev polynomials + folded (Cheby x conv) operator
    sup = supports.astype(f32)
    I_N = jnp.eye(N, dtype=f32)
    Ls = [I_N, sup]
    for _ in range(2, K):
        Ls.append(2.0 * sup @ Ls[-1] - Ls[-2])
    Lstack = jnp.stack(Ls, 0)                                        # [K, q, n]
    wg = params["w_gcn"][:, :, 0, :].astype(f32).reshape(2 * c_out, c_out, K, Kt)
    # A[(q,o), (dt,n,c)] = sum_k w_gcn[o, c*K+k, dt] * Ls[k][q, n]
    a_gcn = jnp.einsum("ockd,kqn->qodnc", wg, Lstack).reshape(
        2 * c_out * N, Kt * N * c_out)

    # (4) small parameters
    bg = params["b_gcn"].astype(f32).reshape(1, 2 * c_out, 1)
    wa1 = params["att_w1"].astype(f32).reshape(1, c_out, 1)
    wa2 = params["att_w2"].astype(f32).reshape(N, 1, 1)
    w_att = params["att_w"].astype(f32)
    b_att = params["att_b"].astype(f32)
    v_att = params["att_v"].astype(f32)
    bn_sc1 = params["bn_gamma"].astype(f32) / jnp.sqrt(params["bn_rvar"].astype(f32) + 1e-5)
    bn_sh1 = params["bn_beta"].astype(f32) - params["bn_rmean"].astype(f32) * bn_sc1
    bn_sc = bn_sc1.reshape(1, T)
    bn_sh = bn_sh1.reshape(1, T)
    b_glob = params["b_glob"].astype(f32)
    ln_w = jnp.transpose(params["ln_w"].astype(f32), (1, 0, 2))      # [N, c_out, T]
    ln_b = jnp.transpose(params["ln_b"].astype(f32), (1, 0, 2))

    out_flat, tco = pl.pallas_call(
        st_block1_kernel,
        out_shape=(jax.ShapeDtypeStruct((B, c_out, NT), f32),
                   jax.ShapeDtypeStruct((B, T, T), f32)),
        grid=(B,),
        in_specs=[
            pl.BlockSpec((None, Kt * c_in + 1, NT), lambda b: (b, 0, 0)),
            pl.BlockSpec((2 * c_out, Kt * c_in + 1), lambda b: (0, 0)),
            pl.BlockSpec((2 * c_out * N, Kt * N * c_out), lambda b: (0, 0)),
            pl.BlockSpec((1, 2 * c_out, 1), lambda b: (0, 0, 0)),
            pl.BlockSpec((1, c_out, 1), lambda b: (0, 0, 0)),
            pl.BlockSpec((N, 1, 1), lambda b: (0, 0, 0)),
            pl.BlockSpec((N, c_out), lambda b: (0, 0)),
            pl.BlockSpec((T, T), lambda b: (0, 0)),
            pl.BlockSpec((T, T), lambda b: (0, 0)),
            pl.BlockSpec((1, T), lambda b: (0, 0)),
            pl.BlockSpec((1, T), lambda b: (0, 0)),
            pl.BlockSpec((T, T), lambda b: (0, 0)),
            pl.BlockSpec((N, c_out, T), lambda b: (0, 0, 0)),
            pl.BlockSpec((N, c_out, T), lambda b: (0, 0, 0)),
        ],
        out_specs=(pl.BlockSpec((None, c_out, NT), lambda b: (b, 0, 0)),
                   pl.BlockSpec((None, T, T), lambda b: (b, 0, 0))),
        compiler_params=pltpu.CompilerParams(dimension_semantics=("parallel",)),
    )(xcol, w_front, a_gcn, bg, wa1, wa2, w_att, b_att, v_att,
      bn_sc, bn_sh, b_glob, ln_w, ln_b)

    return out_flat.reshape(B, c_out, N, T), supports, tco


# -------------------------- pure JAX reference (check) ------------------------
def _leaky(v):
    return jnp.where(v >= 0, v, 0.01 * v)


def _conv_1xk(x, w, b, pad):
    # x: [B, C, N, T], w: [O, C, 1, k] -- PyTorch Conv2d (cross-correlation)
    k = w.shape[-1]
    T = x.shape[-1]
    xp = jnp.pad(x, ((0, 0), (0, 0), (0, 0), (pad, pad)))
    Tout = T + 2 * pad - k + 1
    out = jnp.zeros((x.shape[0], w.shape[0], x.shape[2], Tout), jnp.float32)
    for dt in range(k):
        out = out + jnp.einsum("oc,bcnt->bont", w[:, :, 0, dt], xp[:, :, :, dt:dt + Tout])
    return out + b[None, :, None, None]


def ref_forward(x, supports, p):
    Bb, c_in, N, T = x.shape
    c_out, K, Kt = p["c_out"], p["K"], p["Kt"]
    x_input = _conv_1xk(x, p["w_conv1"], p["b_conv1"], 0)
    x1 = _leaky(_conv_1xk(x, p["w_time"], p["b_time"], 1))
    # Chebyshev graph conv
    I_N = jnp.eye(N, dtype=jnp.float32)
    Ls = [I_N, supports]
    for _ in range(2, K):
        Ls.append(2.0 * supports @ Ls[-1] - Ls[-2])
    Lap = jnp.swapaxes(jnp.stack(Ls, 0), -1, -2)
    xg = jnp.einsum("bcnl,knq->bckql", x1, Lap).reshape(Bb, c_out * K, N, T)
    g = _conv_1xk(xg, p["w_gcn"], p["b_gcn"], 1)
    xg2 = jax.nn.sigmoid(g[:, c_out:]) * _leaky(g[:, :c_out])
    # TATT_1 (inference: BatchNorm1d with running stats)
    f1 = jnp.einsum("c,bcnt->btn", p["att_w1"], xg2)
    f2 = jnp.einsum("n,bcnt->bct", p["att_w2"], xg2)
    logits = jax.nn.sigmoid(jnp.matmul(jnp.matmul(f1, p["att_w"]), f2) + p["att_b"][None])
    logits = jnp.matmul(p["att_v"], logits)
    sc = p["bn_gamma"] / jnp.sqrt(p["bn_rvar"] + 1e-5)
    sh = p["bn_beta"] - p["bn_rmean"] * sc
    logits = logits * sc[None, None, :] + sh[None, None, :]
    coefs = jax.nn.softmax(logits + p["b_glob"][None], axis=-1)
    T_coef = jnp.swapaxes(coefs, -1, -2)
    xm = jnp.einsum("bcnl,blq->bcnq", xg2, T_coef)
    pre = _leaky(xm) + x_input
    mu = jnp.mean(pre, axis=(1, 2, 3), keepdims=True)
    var = jnp.mean((pre - mu) ** 2, axis=(1, 2, 3), keepdims=True)
    out = (pre - mu) / jnp.sqrt(var + 1e-5) * p["ln_w"][None] + p["ln_b"][None]
    return out, T_coef


# ----------------------------------- main --------------------------------------
if __name__ == "__main__":
    Bb, c_in, c_out, N, T, K, Kt = 2, 4, 8, 16, 16, 3, 3
    key = jax.random.PRNGKey(0)
    ks = jax.random.split(key, 20)

    def nrm(k, shape, s=0.1):
        return s * jax.random.normal(k, shape, dtype=jnp.float32)

    params = {
        "c_out": c_out, "K": K, "Kt": Kt,
        "w_conv1": nrm(ks[0], (c_out, c_in, 1, 1)),
        "b_conv1": nrm(ks[1], (c_out,)),
        "w_time": nrm(ks[2], (c_out, c_in, 1, Kt)),
        "b_time": nrm(ks[3], (c_out,)),
        "w_gcn": nrm(ks[4], (2 * c_out, K * c_out, 1, Kt)),
        "b_gcn": nrm(ks[5], (2 * c_out,)),
        "att_w1": nrm(ks[6], (c_out,), 0.3),
        "att_w2": nrm(ks[7], (N,), 0.3),
        "att_w": nrm(ks[8], (N, c_out), 0.3),
        "att_b": nrm(ks[9], (T, T), 0.3),
        "att_v": nrm(ks[10], (T, T), 0.3),
        "bn_gamma": 1.0 + nrm(ks[11], (T,)),
        "bn_beta": nrm(ks[12], (T,)),
        "bn_rmean": nrm(ks[13], (T,)),
        "bn_rvar": 1.0 + jnp.abs(nrm(ks[14], (T,))),
        "b_glob": nrm(ks[15], (T, T), 0.3),   # module-level global tensor B
        "ln_w": 1.0 + nrm(ks[16], (c_out, N, T)),
        "ln_b": nrm(ks[17], (c_out, N, T)),
    }
    x = jax.random.normal(ks[18], (Bb, c_in, N, T), dtype=jnp.float32)
    a = jax.random.normal(ks[19], (N, N), dtype=jnp.float32)
    supports = 0.5 * (a + a.T) / float(N)   # small symmetric "Laplacian"

    out, sup_out, tco = st_block_1(x, supports, params)
    out = jax.block_until_ready(out)

    ref_out, ref_tco = ref_forward(x, supports, params)
    np.testing.assert_allclose(np.asarray(tco), np.asarray(ref_tco), rtol=2e-2, atol=2e-2)
    np.testing.assert_allclose(np.asarray(out), np.asarray(ref_out), rtol=2e-2, atol=2e-2)
    print("KERNEL_OK")
</pallas_src>

<mosaic_0001>
module attributes {stable_mosaic.version = 11 : i64} {
  func.func @st_block1_kernel(%arg0: i32, %arg1: memref<1x13x256xf32, #tpu.memory_space<vmem>>, %arg2: memref<16x13xf32, #tpu.memory_space<vmem>>, %arg3: memref<256x384xf32, #tpu.memory_space<vmem>>, %arg4: memref<1x16x1xf32, #tpu.memory_space<vmem>>, %arg5: memref<1x8x1xf32, #tpu.memory_space<vmem>>, %arg6: memref<16x1x1xf32, #tpu.memory_space<vmem>>, %arg7: memref<16x8xf32, #tpu.memory_space<vmem>>, %arg8: memref<16x16xf32, #tpu.memory_space<vmem>>, %arg9: memref<16x16xf32, #tpu.memory_space<vmem>>, %arg10: memref<1x16xf32, #tpu.memory_space<vmem>>, %arg11: memref<1x16xf32, #tpu.memory_space<vmem>>, %arg12: memref<16x16xf32, #tpu.memory_space<vmem>>, %arg13: memref<16x8x16xf32, #tpu.memory_space<vmem>>, %arg14: memref<16x8x16xf32, #tpu.memory_space<vmem>>, %arg15: memref<1x8x256xf32, #tpu.memory_space<vmem>>, %arg16: memref<1x16x16xf32, #tpu.memory_space<vmem>>) attributes {dimension_semantics = [#tpu.dimension_semantics<parallel>], iteration_bounds = array<i64: 2>, scalar_prefetch = 0 : i64, scratch_operands = 0 : i64, tpu.core_type = #tpu.core_type<tc>, window_params = [{transform_indices = @transform_0, window_bounds = array<i64: 1, 13, 256>}, {pipeline_mode = #tpu.pipeline_mode<synchronous>, transform_indices = @transform_1, window_bounds = array<i64: 16, 13>}, {pipeline_mode = #tpu.pipeline_mode<synchronous>, transform_indices = @transform_2, window_bounds = array<i64: 256, 384>}, {pipeline_mode = #tpu.pipeline_mode<synchronous>, transform_indices = @transform_3, window_bounds = array<i64: 1, 16, 1>}, {pipeline_mode = #tpu.pipeline_mode<synchronous>, transform_indices = @transform_4, window_bounds = array<i64: 1, 8, 1>}, {pipeline_mode = #tpu.pipeline_mode<synchronous>, transform_indices = @transform_5, window_bounds = array<i64: 16, 1, 1>}, {pipeline_mode = #tpu.pipeline_mode<synchronous>, transform_indices = @transform_6, window_bounds = array<i64: 16, 8>}, {pipeline_mode = #tpu.pipeline_mode<synchronous>, transform_indices = @transform_7, window_bounds = array<i64: 16, 16>}, {pipeline_mode = #tpu.pipeline_mode<synchronous>, transform_indices = @transform_8, window_bounds = array<i64: 16, 16>}, {pipeline_mode = #tpu.pipeline_mode<synchronous>, transform_indices = @transform_9, window_bounds = array<i64: 1, 16>}, {pipeline_mode = #tpu.pipeline_mode<synchronous>, transform_indices = @transform_10, window_bounds = array<i64: 1, 16>}, {pipeline_mode = #tpu.pipeline_mode<synchronous>, transform_indices = @transform_11, window_bounds = array<i64: 16, 16>}, {pipeline_mode = #tpu.pipeline_mode<synchronous>, transform_indices = @transform_12, window_bounds = array<i64: 16, 8, 16>}, {pipeline_mode = #tpu.pipeline_mode<synchronous>, transform_indices = @transform_13, window_bounds = array<i64: 16, 8, 16>}, {transform_indices = @transform_14, window_bounds = array<i64: 1, 8, 256>}, {transform_indices = @transform_15, window_bounds = array<i64: 1, 16, 16>}]} {
    %c0 = arith.constant 0 : index
    %c0_0 = arith.constant 0 : index
    %0 = vector.load %arg2[%c0, %c0_0] : memref<16x13xf32, #tpu.memory_space<vmem>>, vector<16x13xf32>
    %c0_1 = arith.constant 0 : index
    %c0_2 = arith.constant 0 : index
    %c0_3 = arith.constant 0 : index
    %1 = vector.load %arg1[%c0_1, %c0_2, %c0_3] : memref<1x13x256xf32, #tpu.memory_space<vmem>>, vector<1x13x256xf32>
    %2 = vector.shape_cast %1 : vector<1x13x256xf32> to vector<13x256xf32>
    %cst = arith.constant dense<0.000000e+00> : vector<16x256xf32>
    %3 = tpu.matmul %0, %2, %cst {dimension_numbers = #tpu.dot_dimension_numbers<[1], [0], [0], [1], [0, 0, 1, 1], [], []>} : vector<16x13xf32>, vector<13x256xf32>, vector<16x256xf32> -> vector<16x256xf32>
    %4 = vector.extract_strided_slice %3 {offsets = [0, 0], sizes = [16, 16], strides = [1, 1]} : vector<16x256xf32> to vector<16x16xf32>
    %5 = vector.extract_strided_slice %3 {offsets = [0, 16], sizes = [16, 16], strides = [1, 1]} : vector<16x256xf32> to vector<16x16xf32>
    %6 = vector.extract_strided_slice %3 {offsets = [0, 32], sizes = [16, 16], strides = [1, 1]} : vector<16x256xf32> to vector<16x16xf32>
    %7 = vector.extract_strided_slice %3 {offsets = [0, 48], sizes = [16, 16], strides = [1, 1]} : vector<16x256xf32> to vector<16x16xf32>
    %8 = vector.extract_strided_slice %3 {offsets = [0, 64], sizes = [16, 16], strides = [1, 1]} : vector<16x256xf32> to vector<16x16xf32>
    %9 = vector.extract_strided_slice %3 {offsets = [0, 80], sizes = [16, 16], strides = [1, 1]} : vector<16x256xf32> to vector<16x16xf32>
    %10 = vector.extract_strided_slice %3 {offsets = [0, 96], sizes = [16, 16], strides = [1, 1]} : vector<16x256xf32> to vector<16x16xf32>
    %11 = vector.extract_strided_slice %3 {offsets = [0, 112], sizes = [16, 16], strides = [1, 1]} : vector<16x256xf32> to vector<16x16xf32>
    %12 = vector.extract_strided_slice %3 {offsets = [0, 128], sizes = [16, 16], strides = [1, 1]} : vector<16x256xf32> to vector<16x16xf32>
    %13 = vector.extract_strided_slice %3 {offsets = [0, 144], sizes = [16, 16], strides = [1, 1]} : vector<16x256xf32> to vector<16x16xf32>
    %14 = vector.extract_strided_slice %3 {offsets = [0, 160], sizes = [16, 16], strides = [1, 1]} : vector<16x256xf32> to vector<16x16xf32>
    %15 = vector.extract_strided_slice %3 {offsets = [0, 176], sizes = [16, 16], strides = [1, 1]} : vector<16x256xf32> to vector<16x16xf32>
    %16 = vector.extract_strided_slice %3 {offsets = [0, 192], sizes = [16, 16], strides = [1, 1]} : vector<16x256xf32> to vector<16x16xf32>
    %17 = vector.extract_strided_slice %3 {offsets = [0, 208], sizes = [16, 16], strides = [1, 1]} : vector<16x256xf32> to vector<16x16xf32>
    %18 = vector.extract_strided_slice %3 {offsets = [0, 224], sizes = [16, 16], strides = [1, 1]} : vector<16x256xf32> to vector<16x16xf32>
    %19 = vector.extract_strided_slice %3 {offsets = [0, 240], sizes = [16, 16], strides = [1, 1]} : vector<16x256xf32> to vector<16x16xf32>
    %20 = tpu.concatenate %4, %5, %6, %7, %8, %9, %10, %11, %12, %13, %14, %15, %16, %17, %18, %19 in 0 : vector<16x16xf32>, vector<16x16xf32>, vector<16x16xf32>, vector<16x16xf32>, vector<16x16xf32>, vector<16x16xf32>, vector<16x16xf32>, vector<16x16xf32>, vector<16x16xf32>, vector<16x16xf32>, vector<16x16xf32>, vector<16x16xf32>, vector<16x16xf32>, vector<16x16xf32>, vector<16x16xf32>, vector<16x16xf32> -> vector<256x16xf32>
    %21 = vector.shape_cast %20 : vector<256x16xf32> to vector<16x16x16xf32>
    %22 = vector.extract_strided_slice %21 {offsets = [0, 0, 0], sizes = [16, 8, 16], strides = [1, 1, 1]} : vector<16x16x16xf32> to vector<16x8x16xf32>
    %23 = vector.extract_strided_slice %21 {offsets = [0, 8, 0], sizes = [16, 8, 16], strides = [1, 1, 1]} : vector<16x16x16xf32> to vector<16x8x16xf32>
    %cst_4 = arith.constant 0.000000e+00 : f32
    %24 = vector.broadcast %cst_4 : f32 to vector<16x8x16xf32>
    %25 = arith.cmpf oge, %23, %24 : vector<16x8x16xf32>
    %cst_5 = arith.constant 0.00999999977 : f32
    %26 = vector.broadcast %cst_5 : f32 to vector<16x8x16xf32>
    %27 = arith.mulf %26, %23 : vector<16x8x16xf32>
    %28 = arith.select %25, %23, %27 : vector<16x8x16xi1>, vector<16x8x16xf32>
    %29 = vector.shape_cast %28 : vector<16x8x16xf32> to vector<128x16xf32>
    %30 = tpu.iota {dimensions = array<i32: 0>} : vector<16x16xi32>
    %31 = tpu.iota {dimensions = array<i32: 1>} : vector<16x16xi32>
    %c1_i32 = arith.constant 1 : i32
    %32 = vector.broadcast %c1_i32 : i32 to vector<16x16xi32>
    %33 = arith.subi %31, %32 : vector<16x16xi32>
    %34 = arith.cmpi eq, %30, %33 : vector<16x16xi32>
    %cst_6 = arith.constant 1.000000e+00 : f32
    %cst_7 = arith.constant 0.000000e+00 : f32
    %35 = vector.broadcast %cst_6 : f32 to vector<16x16xf32>
    %36 = vector.broadcast %cst_7 : f32 to vector<16x16xf32>
    %37 = arith.select %34, %35, %36 : vector<16x16xi1>, vector<16x16xf32>
    %c1_i32_8 = arith.constant 1 : i32
    %38 = vector.broadcast %c1_i32_8 : i32 to vector<16x16xi32>
    %39 = arith.addi %31, %38 : vector<16x16xi32>
    %40 = arith.cmpi eq, %30, %39 : vector<16x16xi32>
    %cst_9 = arith.constant 1.000000e+00 : f32
    %cst_10 = arith.constant 0.000000e+00 : f32
    %41 = vector.broadcast %cst_9 : f32 to vector<16x16xf32>
    %42 = vector.broadcast %cst_10 : f32 to vector<16x16xf32>
    %43 = arith.select %40, %41, %42 : vector<16x16xi1>, vector<16x16xf32>
    %cst_11 = arith.constant dense<0.000000e+00> : vector<128x16xf32>
    %44 = tpu.matmul %29, %37, %cst_11 {dimension_numbers = #tpu.dot_dimension_numbers<[1], [0], [0], [1], [0, 0, 1, 1], [], []>} : vector<128x16xf32>, vector<16x16xf32>, vector<128x16xf32> -> vector<128x16xf32>
    %cst_12 = arith.constant dense<0.000000e+00> : vector<128x16xf32>
    %45 = tpu.matmul %29, %43, %cst_12 {dimension_numbers = #tpu.dot_dimension_numbers<[1], [0], [0], [1], [0, 0, 1, 1], [], []>} : vector<128x16xf32>, vector<16x16xf32>, vector<128x16xf32> -> vector<128x16xf32>
    %46 = tpu.concatenate %44, %29, %45 in 0 : vector<128x16xf32>, vector<128x16xf32>, vector<128x16xf32> -> vector<384x16xf32>
    %c0_13 = arith.constant 0 : index
    %c0_14 = arith.constant 0 : index
    %47 = vector.load %arg3[%c0_13, %c0_14] : memref<256x384xf32, #tpu.memory_space<vmem>>, vector<256x384xf32>
    %cst_15 = arith.constant dense<0.000000e+00> : vector<256x16xf32>
    %48 = tpu.matmul %47, %46, %cst_15 {dimension_numbers = #tpu.dot_dimension_numbers<[1], [0], [0], [1], [0, 0, 1, 1], [], []>} : vector<256x384xf32>, vector<384x16xf32>, vector<256x16xf32> -> vector<256x16xf32>
    %49 = vector.shape_cast %48 : vector<256x16xf32> to vector<16x16x16xf32>
    %c0_16 = arith.constant 0 : index
    %c0_17 = arith.constant 0 : index
    %c0_18 = arith.constant 0 : index
    %50 = vector.load %arg4[%c0_16, %c0_17, %c0_18] : memref<1x16x1xf32, #tpu.memory_space<vmem>>, vector<1x16x1xf32>
    %51 = vector.broadcast %50 : vector<1x16x1xf32> to vector<16x16x16xf32>
    %52 = arith.addf %49, %51 : vector<16x16x16xf32>
    %53 = vector.extract_strided_slice %52 {offsets = [0, 8, 0], sizes = [16, 8, 16], strides = [1, 1, 1]} : vector<16x16x16xf32> to vector<16x8x16xf32>
    %54 = arith.negf %53 : vector<16x8x16xf32>
    %55 = math.exp %54 : vector<16x8x16xf32>
    %cst_19 = arith.constant 1.000000e+00 : f32
    %56 = vector.broadcast %cst_19 : f32 to vector<16x8x16xf32>
    %57 = arith.addf %56, %55 : vector<16x8x16xf32>
    %58 = arith.divf %56, %57 : vector<16x8x16xf32>
    %59 = vector.extract_strided_slice %52 {offsets = [0, 0, 0], sizes = [16, 8, 16], strides = [1, 1, 1]} : vector<16x16x16xf32> to vector<16x8x16xf32>
    %cst_20 = arith.constant 0.000000e+00 : f32
    %60 = vector.broadcast %cst_20 : f32 to vector<16x8x16xf32>
    %61 = arith.cmpf oge, %59, %60 : vector<16x8x16xf32>
    %cst_21 = arith.constant 0.00999999977 : f32
    %62 = vector.broadcast %cst_21 : f32 to vector<16x8x16xf32>
    %63 = arith.mulf %62, %59 : vector<16x8x16xf32>
    %64 = arith.select %61, %59, %63 : vector<16x8x16xi1>, vector<16x8x16xf32>
    %65 = arith.mulf %58, %64 : vector<16x8x16xf32>
    %c0_22 = arith.constant 0 : index
    %c0_23 = arith.constant 0 : index
    %c0_24 = arith.constant 0 : index
    %66 = vector.load %arg5[%c0_22, %c0_23, %c0_24] : memref<1x8x1xf32, #tpu.memory_space<vmem>>, vector<1x8x1xf32>
    %67 = vector.broadcast %66 : vector<1x8x1xf32> to vector<16x8x16xf32>
    %68 = arith.mulf %65, %67 : vector<16x8x16xf32>
    %cst_25 = arith.constant dense<0.000000e+00> : vector<16x16xf32>
    %69 = vector.multi_reduction <add>, %68, %cst_25 [1] : vector<16x8x16xf32> to vector<16x16xf32>
    %c0_26 = arith.constant 0 : index
    %c0_27 = arith.constant 0 : index
    %c0_28 = arith.constant 0 : index
    %70 = vector.load %arg6[%c0_26, %c0_27, %c0_28] : memref<16x1x1xf32, #tpu.memory_space<vmem>>, vector<16x1x1xf32>
    %71 = vector.broadcast %70 : vector<16x1x1xf32> to vector<16x8x16xf32>
    %72 = arith.mulf %65, %71 : vector<16x8x16xf32>
    %cst_29 = arith.constant dense<0.000000e+00> : vector<8x16xf32>
    %73 = vector.multi_reduction <add>, %72, %cst_29 [0] : vector<16x8x16xf32> to vector<8x16xf32>
    %74 = tpu.transpose %69, [1, 0] : vector<16x16xf32> -> vector<16x16xf32>
    %c0_30 = arith.constant 0 : index
    %c0_31 = arith.constant 0 : index
    %75 = vector.load %arg7[%c0_30, %c0_31] : memref<16x8xf32, #tpu.memory_space<vmem>>, vector<16x8xf32>
    %cst_32 = arith.constant dense<0.000000e+00> : vector<16x8xf32>
    %76 = tpu.matmul %74, %75, %cst_32 {dimension_numbers = #tpu.dot_dimension_numbers<[1], [0], [0], [1], [0, 0, 1, 1], [], []>} : vector<16x16xf32>, vector<16x8xf32>, vector<16x8xf32> -> vector<16x8xf32>
    %cst_33 = arith.constant dense<0.000000e+00> : vector<16x16xf32>
    %77 = tpu.matmul %76, %73, %cst_33 {dimension_numbers = #tpu.dot_dimension_numbers<[1], [0], [0], [1], [0, 0, 1, 1], [], []>} : vector<16x8xf32>, vector<8x16xf32>, vector<16x16xf32> -> vector<16x16xf32>
    %c0_34 = arith.constant 0 : index
    %c0_35 = arith.constant 0 : index
    %78 = vector.load %arg8[%c0_34, %c0_35] : memref<16x16xf32, #tpu.memory_space<vmem>>, vector<16x16xf32>
    %79 = arith.addf %77, %78 : vector<16x16xf32>
    %80 = arith.negf %79 : vector<16x16xf32>
    %81 = math.exp %80 : vector<16x16xf32>
    %cst_36 = arith.constant 1.000000e+00 : f32
    %82 = vector.broadcast %cst_36 : f32 to vector<16x16xf32>
    %83 = arith.addf %82, %81 : vector<16x16xf32>
    %84 = arith.divf %82, %83 : vector<16x16xf32>
    %c0_37 = arith.constant 0 : index
    %c0_38 = arith.constant 0 : index
    %85 = vector.load %arg9[%c0_37, %c0_38] : memref<16x16xf32, #tpu.memory_space<vmem>>, vector<16x16xf32>
    %cst_39 = arith.constant dense<0.000000e+00> : vector<16x16xf32>
    %86 = tpu.matmul %85, %84, %cst_39 {dimension_numbers = #tpu.dot_dimension_numbers<[1], [0], [0], [1], [0, 0, 1, 1], [], []>} : vector<16x16xf32>, vector<16x16xf32>, vector<16x16xf32> -> vector<16x16xf32>
    %c0_40 = arith.constant 0 : index
    %c0_41 = arith.constant 0 : index
    %87 = vector.load %arg10[%c0_40, %c0_41] : memref<1x16xf32, #tpu.memory_space<vmem>>, vector<1x16xf32>
    %88 = vector.broadcast %87 : vector<1x16xf32> to vector<16x16xf32>
    %89 = arith.mulf %86, %88 : vector<16x16xf32>
    %c0_42 = arith.constant 0 : index
    %c0_43 = arith.constant 0 : index
    %90 = vector.load %arg11[%c0_42, %c0_43] : memref<1x16xf32, #tpu.memory_space<vmem>>, vector<1x16xf32>
    %91 = vector.broadcast %90 : vector<1x16xf32> to vector<16x16xf32>
    %92 = arith.addf %89, %91 : vector<16x16xf32>
    %c0_44 = arith.constant 0 : index
    %c0_45 = arith.constant 0 : index
    %93 = vector.load %arg12[%c0_44, %c0_45] : memref<16x16xf32, #tpu.memory_space<vmem>>, vector<16x16xf32>
    %94 = arith.addf %92, %93 : vector<16x16xf32>
    %cst_46 = arith.constant dense<0xFF800000> : vector<16xf32>
    %95 = vector.multi_reduction <maximumf>, %94, %cst_46 [1] : vector<16x16xf32> to vector<16xf32>
    %96 = vector.shape_cast %95 : vector<16xf32> to vector<16x1xf32>
    %97 = vector.broadcast %96 : vector<16x1xf32> to vector<16x16xf32>
    %98 = arith.subf %94, %97 : vector<16x16xf32>
    %99 = math.exp %98 : vector<16x16xf32>
    %cst_47 = arith.constant dense<0.000000e+00> : vector<16xf32>
    %100 = vector.multi_reduction <add>, %99, %cst_47 [1] : vector<16x16xf32> to vector<16xf32>
    %101 = vector.shape_cast %100 : vector<16xf32> to vector<16x1xf32>
    %102 = tpu.reciprocal %101 {approx = true} : vector<16x1xf32> -> vector<16x1xf32>
    %103 = vector.broadcast %102 : vector<16x1xf32> to vector<16x16xf32>
    %104 = arith.mulf %99, %103 : vector<16x16xf32>
    %105 = tpu.transpose %104, [1, 0] : vector<16x16xf32> -> vector<16x16xf32>
    %c0_48 = arith.constant 0 : index
    %c0_49 = arith.constant 0 : index
    %c0_50 = arith.constant 0 : index
    %106 = vector.load %arg16[%c0_48, %c0_49, %c0_50] : memref<1x16x16xf32, #tpu.memory_space<vmem>>, vector<1x16x16xf32>
    %107 = vector.shape_cast %106 : vector<1x16x16xf32> to vector<16x16xf32>
    %108 = vector.shape_cast %105 : vector<16x16xf32> to vector<1x16x16xf32>
    tpu.vector_store %arg16[%c0_48, %c0_49, %c0_50], %108 {strides = array<i32>} : memref<1x16x16xf32, #tpu.memory_space<vmem>>, vector<1x16x16xf32>,
    %109 = vector.shape_cast %65 : vector<16x8x16xf32> to vector<128x16xf32>
    %cst_51 = arith.constant dense<0.000000e+00> : vector<128x16xf32>
    %110 = tpu.matmul %109, %105, %cst_51 {dimension_numbers = #tpu.dot_dimension_numbers<[1], [0], [0], [1], [0, 0, 1, 1], [], []>} : vector<128x16xf32>, vector<16x16xf32>, vector<128x16xf32> -> vector<128x16xf32>
    %111 = vector.shape_cast %110 : vector<128x16xf32> to vector<16x8x16xf32>
    %cst_52 = arith.constant 0.000000e+00 : f32
    %112 = vector.broadcast %cst_52 : f32 to vector<16x8x16xf32>
    %113 = arith.cmpf oge, %111, %112 : vector<16x8x16xf32>
    %cst_53 = arith.constant 0.00999999977 : f32
    %114 = vector.broadcast %cst_53 : f32 to vector<16x8x16xf32>
    %115 = arith.mulf %114, %111 : vector<16x8x16xf32>
    %116 = arith.select %113, %111, %115 : vector<16x8x16xi1>, vector<16x8x16xf32>
    %117 = arith.addf %116, %22 : vector<16x8x16xf32>
    %118 = vector.shape_cast %117 : vector<16x8x16xf32> to vector<1x16x8x16xf32>
    %cst_54 = arith.constant dense<0.000000e+00> : vector<1xf32>
    %119 = vector.multi_reduction <add>, %118, %cst_54 [1, 2, 3] : vector<1x16x8x16xf32> to vector<1xf32>
    %120 = vector.shape_cast %119 : vector<1xf32> to vector<1x1x1x1xf32>
    %121 = vector.extract %120[0, 0, 0, 0] : f32 from vector<1x1x1x1xf32>
    %122 = vector.broadcast %121 : f32 to vector<1x1x1xf32>
    %cst_55 = arith.constant 2.048000e+03 : f32
    %123 = vector.broadcast %cst_55 : f32 to vector<1x1x1xf32>
    %124 = arith.divf %122, %123 : vector<1x1x1xf32>
    %125 = vector.broadcast %124 : vector<1x1x1xf32> to vector<16x8x16xf32>
    %126 = arith.subf %117, %125 : vector<16x8x16xf32>
    %127 = vector.broadcast %124 : vector<1x1x1xf32> to vector<16x8x16xf32>
    %128 = arith.subf %117, %127 : vector<16x8x16xf32>
    %129 = arith.mulf %126, %128 : vector<16x8x16xf32>
    %130 = vector.shape_cast %129 : vector<16x8x16xf32> to vector<1x16x8x16xf32>
    %cst_56 = arith.constant dense<0.000000e+00> : vector<1xf32>
    %131 = vector.multi_reduction <add>, %130, %cst_56 [1, 2, 3] : vector<1x16x8x16xf32> to vector<1xf32>
    %132 = vector.shape_cast %131 : vector<1xf32> to vector<1x1x1x1xf32>
    %133 = vector.extract %132[0, 0, 0, 0] : f32 from vector<1x1x1x1xf32>
    %134 = vector.broadcast %133 : f32 to vector<1x1x1xf32>
    %cst_57 = arith.constant 2.048000e+03 : f32
    %135 = vector.broadcast %cst_57 : f32 to vector<1x1x1xf32>
    %136 = arith.divf %134, %135 : vector<1x1x1xf32>
    %137 = vector.broadcast %124 : vector<1x1x1xf32> to vector<16x8x16xf32>
    %138 = arith.subf %117, %137 : vector<16x8x16xf32>
    %cst_58 = arith.constant 9.99999974E-6 : f32
    %139 = vector.broadcast %cst_58 : f32 to vector<1x1x1xf32>
    %140 = arith.addf %136, %139 : vector<1x1x1xf32>
    %141 = math.rsqrt %140 : vector<1x1x1xf32>
    %142 = vector.broadcast %141 : vector<1x1x1xf32> to vector<16x8x16xf32>
    %143 = arith.mulf %138, %142 : vector<16x8x16xf32>
    %c0_59 = arith.constant 0 : index
    %c0_60 = arith.constant 0 : index
    %c0_61 = arith.constant 0 : index
    %144 = vector.load %arg13[%c0_59, %c0_60, %c0_61] : memref<16x8x16xf32, #tpu.memory_space<vmem>>, vector<16x8x16xf32>
    %145 = arith.mulf %143, %144 : vector<16x8x16xf32>
    %c0_62 = arith.constant 0 : index
    %c0_63 = arith.constant 0 : index
    %c0_64 = arith.constant 0 : index
    %146 = vector.load %arg14[%c0_62, %c0_63, %c0_64] : memref<16x8x16xf32, #tpu.memory_space<vmem>>, vector<16x8x16xf32>
    %147 = arith.addf %145, %146 : vector<16x8x16xf32>
    %148 = vector.extract_strided_slice %147 {offsets = [0, 0, 0], sizes = [1, 8, 16], strides = [1, 1, 1]} : vector<16x8x16xf32> to vector<1x8x16xf32>
    %149 = vector.shape_cast %148 : vector<1x8x16xf32> to vector<8x16xf32>
    %c0_65 = arith.constant 0 : index
    %c0_66 = arith.constant 0 : index
    %c0_67 = arith.constant 0 : index
    %150 = vector.load %arg15[%c0_65, %c0_66, %c0_67] : memref<1x8x256xf32, #tpu.memory_space<vmem>>, vector<1x8x16xf32>
    %151 = vector.shape_cast %150 : vector<1x8x16xf32> to vector<8x16xf32>
    %152 = vector.shape_cast %149 : vector<8x16xf32> to vector<1x8x16xf32>
    tpu.vector_store %arg15[%c0_65, %c0_66, %c0_67], %152 {strides = array<i32>} : memref<1x8x256xf32, #tpu.memory_space<vmem>>, vector<1x8x16xf32>,
    %153 = vector.extract_strided_slice %147 {offsets = [1, 0, 0], sizes = [1, 8, 16], strides = [1, 1, 1]} : vector<16x8x16xf32> to vector<1x8x16xf32>
    %154 = vector.shape_cast %153 : vector<1x8x16xf32> to vector<8x16xf32>
    %c0_68 = arith.constant 0 : index
    %c0_69 = arith.constant 0 : index
    %c16 = arith.constant 16 : index
    %155 = vector.load %arg15[%c0_68, %c0_69, %c16] : memref<1x8x256xf32, #tpu.memory_space<vmem>>, vector<1x8x16xf32>
    %156 = vector.shape_cast %155 : vector<1x8x16xf32> to vector<8x16xf32>
    %157 = vector.shape_cast %154 : vector<8x16xf32> to vector<1x8x16xf32>
    tpu.vector_store %arg15[%c0_68, %c0_69, %c16], %157 {strides = array<i32>} : memref<1x8x256xf32, #tpu.memory_space<vmem>>, vector<1x8x16xf32>,
    %158 = vector.extract_strided_slice %147 {offsets = [2, 0, 0], sizes = [1, 8, 16], strides = [1, 1, 1]} : vector<16x8x16xf32> to vector<1x8x16xf32>
    %159 = vector.shape_cast %158 : vector<1x8x16xf32> to vector<8x16xf32>
    %c0_70 = arith.constant 0 : index
    %c0_71 = arith.constant 0 : index
    %c32 = arith.constant 32 : index
    %160 = vector.load %arg15[%c0_70, %c0_71, %c32] : memref<1x8x256xf32, #tpu.memory_space<vmem>>, vector<1x8x16xf32>
    %161 = vector.shape_cast %160 : vector<1x8x16xf32> to vector<8x16xf32>
    %162 = vector.shape_cast %159 : vector<8x16xf32> to vector<1x8x16xf32>
    tpu.vector_store %arg15[%c0_70, %c0_71, %c32], %162 {strides = array<i32>} : memref<1x8x256xf32, #tpu.memory_space<vmem>>, vector<1x8x16xf32>,
    %163 = vector.extract_strided_slice %147 {offsets = [3, 0, 0], sizes = [1, 8, 16], strides = [1, 1, 1]} : vector<16x8x16xf32> to vector<1x8x16xf32>
    %164 = vector.shape_cast %163 : vector<1x8x16xf32> to vector<8x16xf32>
    %c0_72 = arith.constant 0 : index
    %c0_73 = arith.constant 0 : index
    %c48 = arith.constant 48 : index
    %165 = vector.load %arg15[%c0_72, %c0_73, %c48] : memref<1x8x256xf32, #tpu.memory_space<vmem>>, vector<1x8x16xf32>
    %166 = vector.shape_cast %165 : vector<1x8x16xf32> to vector<8x16xf32>
    %167 = vector.shape_cast %164 : vector<8x16xf32> to vector<1x8x16xf32>
    tpu.vector_store %arg15[%c0_72, %c0_73, %c48], %167 {strides = array<i32>} : memref<1x8x256xf32, #tpu.memory_space<vmem>>, vector<1x8x16xf32>,
    %168 = vector.extract_strided_slice %147 {offsets = [4, 0, 0], sizes = [1, 8, 16], strides = [1, 1, 1]} : vector<16x8x16xf32> to vector<1x8x16xf32>
    %169 = vector.shape_cast %168 : vector<1x8x16xf32> to vector<8x16xf32>
    %c0_74 = arith.constant 0 : index
    %c0_75 = arith.constant 0 : index
    %c64 = arith.constant 64 : index
    %170 = vector.load %arg15[%c0_74, %c0_75, %c64] : memref<1x8x256xf32, #tpu.memory_space<vmem>>, vector<1x8x16xf32>
    %171 = vector.shape_cast %170 : vector<1x8x16xf32> to vector<8x16xf32>
    %172 = vector.shape_cast %169 : vector<8x16xf32> to vector<1x8x16xf32>
    tpu.vector_store %arg15[%c0_74, %c0_75, %c64], %172 {strides = array<i32>} : memref<1x8x256xf32, #tpu.memory_space<vmem>>, vector<1x8x16xf32>,
    %173 = vector.extract_strided_slice %147 {offsets = [5, 0, 0], sizes = [1, 8, 16], strides = [1, 1, 1]} : vector<16x8x16xf32> to vector<1x8x16xf32>
    %174 = vector.shape_cast %173 : vector<1x8x16xf32> to vector<8x16xf32>
    %c0_76 = arith.constant 0 : index
    %c0_77 = arith.constant 0 : index
    %c80 = arith.constant 80 : index
    %175 = vector.load %arg15[%c0_76, %c0_77, %c80] : memref<1x8x256xf32, #tpu.memory_space<vmem>>, vector<1x8x16xf32>
    %176 = vector.shape_cast %175 : vector<1x8x16xf32> to vector<8x16xf32>
    %177 = vector.shape_cast %174 : vector<8x16xf32> to vector<1x8x16xf32>
    tpu.vector_store %arg15[%c0_76, %c0_77, %c80], %177 {strides = array<i32>} : memref<1x8x256xf32, #tpu.memory_space<vmem>>, vector<1x8x16xf32>,
    %178 = vector.extract_strided_slice %147 {offsets = [6, 0, 0], sizes = [1, 8, 16], strides = [1, 1, 1]} : vector<16x8x16xf32> to vector<1x8x16xf32>
    %179 = vector.shape_cast %178 : vector<1x8x16xf32> to vector<8x16xf32>
    %c0_78 = arith.constant 0 : index
    %c0_79 = arith.constant 0 : index
    %c96 = arith.constant 96 : index
    %180 = vector.load %arg15[%c0_78, %c0_79, %c96] : memref<1x8x256xf32, #tpu.memory_space<vmem>>, vector<1x8x16xf32>
    %181 = vector.shape_cast %180 : vector<1x8x16xf32> to vector<8x16xf32>
    %182 = vector.shape_cast %179 : vector<8x16xf32> to vector<1x8x16xf32>
    tpu.vector_store %arg15[%c0_78, %c0_79, %c96], %182 {strides = array<i32>} : memref<1x8x256xf32, #tpu.memory_space<vmem>>, vector<1x8x16xf32>,
    %183 = vector.extract_strided_slice %147 {offsets = [7, 0, 0], sizes = [1, 8, 16], strides = [1, 1, 1]} : vector<16x8x16xf32> to vector<1x8x16xf32>
    %184 = vector.shape_cast %183 : vector<1x8x16xf32> to vector<8x16xf32>
    %c0_80 = arith.constant 0 : index
    %c0_81 = arith.constant 0 : index
    %c112 = arith.constant 112 : index
    %185 = vector.load %arg15[%c0_80, %c0_81, %c112] : memref<1x8x256xf32, #tpu.memory_space<vmem>>, vector<1x8x16xf32>
    %186 = vector.shape_cast %185 : vector<1x8x16xf32> to vector<8x16xf32>
    %187 = vector.shape_cast %184 : vector<8x16xf32> to vector<1x8x16xf32>
    tpu.vector_store %arg15[%c0_80, %c0_81, %c112], %187 {strides = array<i32>} : memref<1x8x256xf32, #tpu.memory_space<vmem>>, vector<1x8x16xf32>,
    %188 = vector.extract_strided_slice %147 {offsets = [8, 0, 0], sizes = [1, 8, 16], strides = [1, 1, 1]} : vector<16x8x16xf32> to vector<1x8x16xf32>
    %189 = vector.shape_cast %188 : vector<1x8x16xf32> to vector<8x16xf32>
    %c0_82 = arith.constant 0 : index
    %c0_83 = arith.constant 0 : index
    %c128 = arith.constant 128 : index
    %190 = vector.load %arg15[%c0_82, %c0_83, %c128] : memref<1x8x256xf32, #tpu.memory_space<vmem>>, vector<1x8x16xf32>
    %191 = vector.shape_cast %190 : vector<1x8x16xf32> to vector<8x16xf32>
    %192 = vector.shape_cast %189 : vector<8x16xf32> to vector<1x8x16xf32>
    tpu.vector_store %arg15[%c0_82, %c0_83, %c128], %192 {strides = array<i32>} : memref<1x8x256xf32, #tpu.memory_space<vmem>>, vector<1x8x16xf32>,
    %193 = vector.extract_strided_slice %147 {offsets = [9, 0, 0], sizes = [1, 8, 16], strides = [1, 1, 1]} : vector<16x8x16xf32> to vector<1x8x16xf32>
    %194 = vector.shape_cast %193 : vector<1x8x16xf32> to vector<8x16xf32>
    %c0_84 = arith.constant 0 : index
    %c0_85 = arith.constant 0 : index
    %c144 = arith.constant 144 : index
    %195 = vector.load %arg15[%c0_84, %c0_85, %c144] : memref<1x8x256xf32, #tpu.memory_space<vmem>>, vector<1x8x16xf32>
    %196 = vector.shape_cast %195 : vector<1x8x16xf32> to vector<8x16xf32>
    %197 = vector.shape_cast %194 : vector<8x16xf32> to vector<1x8x16xf32>
    tpu.vector_store %arg15[%c0_84, %c0_85, %c144], %197 {strides = array<i32>} : memref<1x8x256xf32, #tpu.memory_space<vmem>>, vector<1x8x16xf32>,
    %198 = vector.extract_strided_slice %147 {offsets = [10, 0, 0], sizes = [1, 8, 16], strides = [1, 1, 1]} : vector<16x8x16xf32> to vector<1x8x16xf32>
    %199 = vector.shape_cast %198 : vector<1x8x16xf32> to vector<8x16xf32>
    %c0_86 = arith.constant 0 : index
    %c0_87 = arith.constant 0 : index
    %c160 = arith.constant 160 : index
    %200 = vector.load %arg15[%c0_86, %c0_87, %c160] : memref<1x8x256xf32, #tpu.memory_space<vmem>>, vector<1x8x16xf32>
    %201 = vector.shape_cast %200 : vector<1x8x16xf32> to vector<8x16xf32>
    %202 = vector.shape_cast %199 : vector<8x16xf32> to vector<1x8x16xf32>
    tpu.vector_store %arg15[%c0_86, %c0_87, %c160], %202 {strides = array<i32>} : memref<1x8x256xf32, #tpu.memory_space<vmem>>, vector<1x8x16xf32>,
    %203 = vector.extract_strided_slice %147 {offsets = [11, 0, 0], sizes = [1, 8, 16], strides = [1, 1, 1]} : vector<16x8x16xf32> to vector<1x8x16xf32>
    %204 = vector.shape_cast %203 : vector<1x8x16xf32> to vector<8x16xf32>
    %c0_88 = arith.constant 0 : index
    %c0_89 = arith.constant 0 : index
    %c176 = arith.constant 176 : index
    %205 = vector.load %arg15[%c0_88, %c0_89, %c176] : memref<1x8x256xf32, #tpu.memory_space<vmem>>, vector<1x8x16xf32>
    %206 = vector.shape_cast %205 : vector<1x8x16xf32> to vector<8x16xf32>
    %207 = vector.shape_cast %204 : vector<8x16xf32> to vector<1x8x16xf32>
    tpu.vector_store %arg15[%c0_88, %c0_89, %c176], %207 {strides = array<i32>} : memref<1x8x256xf32, #tpu.memory_space<vmem>>, vector<1x8x16xf32>,
    %208 = vector.extract_strided_slice %147 {offsets = [12, 0, 0], sizes = [1, 8, 16], strides = [1, 1, 1]} : vector<16x8x16xf32> to vector<1x8x16xf32>
    %209 = vector.shape_cast %208 : vector<1x8x16xf32> to vector<8x16xf32>
    %c0_90 = arith.constant 0 : index
    %c0_91 = arith.constant 0 : index
    %c192 = arith.constant 192 : index
    %210 = vector.load %arg15[%c0_90, %c0_91, %c192] : memref<1x8x256xf32, #tpu.memory_space<vmem>>, vector<1x8x16xf32>
    %211 = vector.shape_cast %210 : vector<1x8x16xf32> to vector<8x16xf32>
    %212 = vector.shape_cast %209 : vector<8x16xf32> to vector<1x8x16xf32>
    tpu.vector_store %arg15[%c0_90, %c0_91, %c192], %212 {strides = array<i32>} : memref<1x8x256xf32, #tpu.memory_space<vmem>>, vector<1x8x16xf32>,
    %213 = vector.extract_strided_slice %147 {offsets = [13, 0, 0], sizes = [1, 8, 16], strides = [1, 1, 1]} : vector<16x8x16xf32> to vector<1x8x16xf32>
    %214 = vector.shape_cast %213 : vector<1x8x16xf32> to vector<8x16xf32>
    %c0_92 = arith.constant 0 : index
    %c0_93 = arith.constant 0 : index
    %c208 = arith.constant 208 : index
    %215 = vector.load %arg15[%c0_92, %c0_93, %c208] : memref<1x8x256xf32, #tpu.memory_space<vmem>>, vector<1x8x16xf32>
    %216 = vector.shape_cast %215 : vector<1x8x16xf32> to vector<8x16xf32>
    %217 = vector.shape_cast %214 : vector<8x16xf32> to vector<1x8x16xf32>
    tpu.vector_store %arg15[%c0_92, %c0_93, %c208], %217 {strides = array<i32>} : memref<1x8x256xf32, #tpu.memory_space<vmem>>, vector<1x8x16xf32>,
    %218 = vector.extract_strided_slice %147 {offsets = [14, 0, 0], sizes = [1, 8, 16], strides = [1, 1, 1]} : vector<16x8x16xf32> to vector<1x8x16xf32>
    %219 = vector.shape_cast %218 : vector<1x8x16xf32> to vector<8x16xf32>
    %c0_94 = arith.constant 0 : index
    %c0_95 = arith.constant 0 : index
    %c224 = arith.constant 224 : index
    %220 = vector.load %arg15[%c0_94, %c0_95, %c224] : memref<1x8x256xf32, #tpu.memory_space<vmem>>, vector<1x8x16xf32>
    %221 = vector.shape_cast %220 : vector<1x8x16xf32> to vector<8x16xf32>
    %222 = vector.shape_cast %219 : vector<8x16xf32> to vector<1x8x16xf32>
    tpu.vector_store %arg15[%c0_94, %c0_95, %c224], %222 {strides = array<i32>} : memref<1x8x256xf32, #tpu.memory_space<vmem>>, vector<1x8x16xf32>,
    %223 = vector.extract_strided_slice %147 {offsets = [15, 0, 0], sizes = [1, 8, 16], strides = [1, 1, 1]} : vector<16x8x16xf32> to vector<1x8x16xf32>
    %224 = vector.shape_cast %223 : vector<1x8x16xf32> to vector<8x16xf32>
    %c0_96 = arith.constant 0 : index
    %c0_97 = arith.constant 0 : index
    %c240 = arith.constant 240 : index
    %225 = vector.load %arg15[%c0_96, %c0_97, %c240] : memref<1x8x256xf32, #tpu.memory_space<vmem>>, vector<1x8x16xf32>
    %226 = vector.shape_cast %225 : vector<1x8x16xf32> to vector<8x16xf32>
    %227 = vector.shape_cast %224 : vector<8x16xf32> to vector<1x8x16xf32>
    tpu.vector_store %arg15[%c0_96, %c0_97, %c240], %227 {strides = array<i32>} : memref<1x8x256xf32, #tpu.memory_space<vmem>>, vector<1x8x16xf32>,
    return
  }
  func.func @transform_0(%arg0: i32) -> (i32, i32, i32) {
    %c0_i32 = arith.constant 0 : i32
    %c0_i32_0 = arith.constant 0 : i32
    %c0_i32_1 = arith.constant 0 : i32
    return %arg0, %c0_i32, %c0_i32_0 : i32, i32, i32
  }
  func.func @transform_1(%arg0: i32) -> (i32, i32) {
    %c0_i32 = arith.constant 0 : i32
    %c0_i32_0 = arith.constant 0 : i32
    %c0_i32_1 = arith.constant 0 : i32
    return %c0_i32, %c0_i32_0 : i32, i32
  }
  func.func @transform_2(%arg0: i32) -> (i32, i32) {
    %c0_i32 = arith.constant 0 : i32
    %c0_i32_0 = arith.constant 0 : i32
    %c0_i32_1 = arith.constant 0 : i32
    return %c0_i32, %c0_i32_0 : i32, i32
  }
  func.func @transform_3(%arg0: i32) -> (i32, i32, i32) {
    %c0_i32 = arith.constant 0 : i32
    %c0_i32_0 = arith.constant 0 : i32
    %c0_i32_1 = arith.constant 0 : i32
    %c0_i32_2 = arith.constant 0 : i32
    return %c0_i32, %c0_i32_0, %c0_i32_1 : i32, i32, i32
  }
  func.func @transform_4(%arg0: i32) -> (i32, i32, i32) {
    %c0_i32 = arith.constant 0 : i32
    %c0_i32_0 = arith.constant 0 : i32
    %c0_i32_1 = arith.constant 0 : i32
    %c0_i32_2 = arith.constant 0 : i32
    return %c0_i32, %c0_i32_0, %c0_i32_1 : i32, i32, i32
  }
  func.func @transform_5(%arg0: i32) -> (i32, i32, i32) {
    %c0_i32 = arith.constant 0 : i32
    %c0_i32_0 = arith.constant 0 : i32
    %c0_i32_1 = arith.constant 0 : i32
    %c0_i32_2 = arith.constant 0 : i32
    return %c0_i32, %c0_i32_0, %c0_i32_1 : i32, i32, i32
  }
  func.func @transform_6(%arg0: i32) -> (i32, i32) {
    %c0_i32 = arith.constant 0 : i32
    %c0_i32_0 = arith.constant 0 : i32
    %c0_i32_1 = arith.constant 0 : i32
    return %c0_i32, %c0_i32_0 : i32, i32
  }
  func.func @transform_7(%arg0: i32) -> (i32, i32) {
    %c0_i32 = arith.constant 0 : i32
    %c0_i32_0 = arith.constant 0 : i32
    %c0_i32_1 = arith.constant 0 : i32
    return %c0_i32, %c0_i32_0 : i32, i32
  }
  func.func @transform_8(%arg0: i32) -> (i32, i32) {
    %c0_i32 = arith.constant 0 : i32
    %c0_i32_0 = arith.constant 0 : i32
    %c0_i32_1 = arith.constant 0 : i32
    return %c0_i32, %c0_i32_0 : i32, i32
  }
  func.func @transform_9(%arg0: i32) -> (i32, i32) {
    %c0_i32 = arith.constant 0 : i32
    %c0_i32_0 = arith.constant 0 : i32
    %c0_i32_1 = arith.constant 0 : i32
    return %c0_i32, %c0_i32_0 : i32, i32
  }
  func.func @transform_10(%arg0: i32) -> (i32, i32) {
    %c0_i32 = arith.constant 0 : i32
    %c0_i32_0 = arith.constant 0 : i32
    %c0_i32_1 = arith.constant 0 : i32
    return %c0_i32, %c0_i32_0 : i32, i32
  }
  func.func @transform_11(%arg0: i32) -> (i32, i32) {
    %c0_i32 = arith.constant 0 : i32
    %c0_i32_0 = arith.constant 0 : i32
    %c0_i32_1 = arith.constant 0 : i32
    return %c0_i32, %c0_i32_0 : i32, i32
  }
  func.func @transform_12(%arg0: i32) -> (i32, i32, i32) {
    %c0_i32 = arith.constant 0 : i32
    %c0_i32_0 = arith.constant 0 : i32
    %c0_i32_1 = arith.constant 0 : i32
    %c0_i32_2 = arith.constant 0 : i32
    return %c0_i32, %c0_i32_0, %c0_i32_1 : i32, i32, i32
  }
  func.func @transform_13(%arg0: i32) -> (i32, i32, i32) {
    %c0_i32 = arith.constant 0 : i32
    %c0_i32_0 = arith.constant 0 : i32
    %c0_i32_1 = arith.constant 0 : i32
    %c0_i32_2 = arith.constant 0 : i32
    return %c0_i32, %c0_i32_0, %c0_i32_1 : i32, i32, i32
  }
  func.func @transform_14(%arg0: i32) -> (i32, i32, i32) {
    %c0_i32 = arith.constant 0 : i32
    %c0_i32_0 = arith.constant 0 : i32
    %c0_i32_1 = arith.constant 0 : i32
    return %arg0, %c0_i32, %c0_i32_0 : i32, i32, i32
  }
  func.func @transform_15(%arg0: i32) -> (i32, i32, i32) {
    %c0_i32 = arith.constant 0 : i32
    %c0_i32_0 = arith.constant 0 : i32
    %c0_i32_1 = arith.constant 0 : i32
    return %arg0, %c0_i32, %c0_i32_0 : i32, i32, i32
  }
}

</mosaic_0001>

<bundles_post_ra>
// kernel: tpu_custom_call.1
= control target key start
LH: loop header
LB: loop body
LE: loop exit
PB: predicated region body
PF: predicated region fallthrough
CT: control target
= control target key end

     0   :  { %s4769_s0 = inlined_call_operand.vmem [shape: f32[2,13,256], index: 0, kind: input, shape index: {}]   ;;  %s4770_s1 = inlined_call_operand.vmem [shape: f32[16,13], index: 1, kind: input, shape index: {}]   ;;  %s4771_s2 = inlined_call_operand.hbm [shape: f32[256,384], index: 2, kind: input, shape index: {}]   ;;  %s4772_s3 = inlined_call_operand.vmem [shape: f32[1,16,1], index: 3, kind: input, shape index: {}]   ;;  %s4773_s4 = inlined_call_operand.vmem [shape: f32[1,8,1], index: 4, kind: input, shape index: {}]   ;;  %s4774_s5 = inlined_call_operand.vmem [shape: f32[16,1,1], index: 5, kind: input, shape index: {}]   ;;  %s4775_s6 = inlined_call_operand.vmem [shape: f32[16,8], index: 6, kind: input, shape index: {}]   ;;  %s4776_s7 = inlined_call_operand.vmem [shape: f32[16,16], index: 7, kind: input, shape index: {}]   ;;  %s4777_s8 = inlined_call_operand.vmem [shape: f32[16,16], index: 8, kind: input, shape index: {}]   ;;  %s4778_s9 = inlined_call_operand.vmem [shape: f32[1,16], index: 9, kind: input, shape index: {}]   ;;  %s4779_s10 = inlined_call_operand.vmem [shape: f32[1,16], index: 10, kind: input, shape index: {}]   ;;  %s4780_s11 = inlined_call_operand.vmem [shape: f32[16,16], index: 11, kind: input, shape index: {}]   ;;  %s4781_s12 = inlined_call_operand.hbm [shape: f32[16,8,16], index: 12, kind: input, shape index: {}]   ;;  %s4782_s13 = inlined_call_operand.hbm [shape: f32[16,8,16], index: 13, kind: input, shape index: {}]   ;;  %s4783_s14 = inlined_call_operand.hbm [shape: f32[2,8,256], index: 14, kind: output, shape index: {0}]   ;;  %s4784_s15 = inlined_call_operand.hbm [shape: f32[2,16,16], index: 15, kind: output, shape index: {1}]  }
   0x1   :  { %4795 = sst [smem:[#allocation21_spill]] %s4771_s2 }
   0x2   :  { %4796 = sst [smem:[#allocation22_spill]] %s4781_s12 }
   0x3   :  { %4797 = sst [smem:[#allocation23_spill]] %s4783_s14 }
   0x4   :  { %4798 = sst [smem:[#allocation24_spill]] %s4784_s15 }
   0x5   :  { %21 = vsyncpa [#allocation3], 0 }
   0x6   :  { %22 = vsyncpa [#allocation6], 0 }
   0x7   :  { %23 = vsyncpa [#allocation4], 0 }
   0x8   :  { %25 = vsyncpa [#allocation4 + $0x1], 0 }
   0x9   :  { %26 = vsyncpa [#allocation10], 0 }
   0xa   :  { %28 = vsyncpa [#allocation10 + $0x1], 0  ;;  %s3603_s18 = smov 0   ;;  %s3605_s19 = smov 0  }
   0xb   :  { %s3607_s20 = smov 0   ;;  %s3609_s21 = smov 0  }
   0xc LB: > { %4799 = sst [smem:[#allocation15_spill]] %s3490_s18  ;;  %s3624_s22 = sadd.s32 4294967295, %s3502_s21   ;;  %s3502_s21 = sphi %s3609_s21, %s4832_s21   ;;  %s3498_s20 = sphi %s3607_s20, %s4834_s20   ;;  %s3494_s19 = sphi %s3605_s19, %s4836_s19   ;;  %s3490_s18 = sphi %s3603_s18, %s4835_s18  }
   0xd   : > { %4800 = sst [smem:[#allocation16_spill]] %s3498_s20  ;;  %s2997_s23 = sadd.s32 4294967294, %s3502_s21  }
   0xe   : > { %4801 = sst [smem:[#allocation17_spill]] %s3502_s21  ;;  %s3628_s24 = sadd.s32 1, %s3502_s21  }
   0xf   : > { %4802 = sst [smem:[#allocation18_spill]] %s3628_s24  ;;  %s340_s25 = sadd.s32 1, %s3498_s20 }
  0x10   : > { %s337_s26 = ssub.s32 %s3502_s21, %s3628_s24  ;;  %p350_p0 = scmp.ne.s32.totalorder %s3498_s20, %s3494_s19 }
  0x11   : > { %p338_p1 = scmp.eq.s32.totalorder %s337_s26, 0  ;;  %p351_p2 = scmp.eq.s32.totalorder %s3624_s22, 1 }
  0x12   : > { %p356_p3 = scmp.ne.s32.totalorder %s3494_s19, %s3490_s18  ;;  %p357_p4 = scmp.eq.s32.totalorder %s2997_s23, 1 }
  0x13   : > { %s3639_s27 = scalar_select %p338_p1, %s3498_s20, %s340_s25  }
  0x14   : > { %p3641_p5 = por %p351_p2, %p350_p0  ;;  %p3645_p6 = por %p357_p4, %p356_p3 }
  0x15   : > { %4803 = sst [smem:[#allocation19_spill]] %s3639_s27  ;;  %p2998_p7 = scmp.ge.s32.totalorder %s3502_s21, 1 }
  0x16   : > { %s4805_s29 = scalar_select %p3645_p6, 1, 0 }
  0x17   : > { %p390_p8 = scmp.lt.s32.totalorder %s3502_s21, 3  ;;  %p3146_p9 = scmp.eq.s32.totalorder %s3624_s22, 0 }
  0x18   : > { %4806 = sst [smem:[#allocation20_spill]] %s4805_s29  ;;  %s3504_s25 = smov [#allocation5]  }
  0x19   : > { %p3652_p10 = pnand %p2998_p7, %p390_p8  ;;  %s4808_s12 = sld [smem:[#allocation22_spill]] }
  0x1a   : > { %s447_s26 = sshll.u32 %s3504_s25, 4  ;;  %s4810_s2 = sld [smem:[#allocation21_spill]]  ;;  %s448_s26 = int_to_ptr.vmem [resolvable:$true] %s447_s26 }
  0x1b   : > { %p3129_p11 = pneg %p3652_p10  ;;  %s3505_s16 = smov 128  }
  0x1c   : > { %s3506_s17 = smov 8   ;;  %s3508_s18 = smov 384  }
  0x1d   : > { %p3663_p12 = pnand %p3146_p9, %p3129_p11  ;;  %s3509_s21 = smov 24  }
  0x1e   : > { %s459_s20 = sshll.u32 %s4782_s13, 4  ;;  %s3510_s24 = smov [#allocation7]   ;;  %s460_s20 = int_to_ptr.hbm [resolvable:$true] %s459_s20 }
  0x1f   : > { %s445_s23 = sshll.u32 %s4808_s12, 4  ;;  %s3507_s12 = smov [#allocation2]   ;;  %s446_s23 = int_to_ptr.hbm [resolvable:$true] %s445_s23 }
  0x20   : > { %s404_s29 = sshll.u32 %s4810_s2, 4  ;;  %s406_s25 = sshll.u32 %s3507_s12, 4  ;;  %s405_s29 = int_to_ptr.hbm [resolvable:$true] %s404_s29  ;;  %s407_s25 = int_to_ptr.vmem [resolvable:$true] %s406_s25 }
  0x21   : > { %3135 = dma.hbm_to_vmem [thread:$0]  (!%p3663_p12), %s446_s23, 2048, %s448_s26, [#allocation6], %s3505_s16, %s3505_s16, %s3506_s17  }
  0x22   : > { %3132 = dma.hbm_to_vmem [thread:$0]  (!%p3663_p12), %s405_s29, 12288, %s407_s25, [#allocation3], %s3508_s18, %s3508_s18, %s3509_s21  }
  0x23   : > { %s461_s2 = sshll.u32 %s3510_s24, 4  ;;  %485 = sbr.rel (%p3652_p10) target bundleno = 2872 (0xb38), region = 76  ;;  %s462_s2 = int_to_ptr.vmem [resolvable:$true] %s461_s2 }
  0x24   : > { %3138 = dma.hbm_to_vmem [thread:$0]  (!%p3663_p12), %s460_s20, 2048, %s462_s2, [#allocation6], %s3505_s16, %s3505_s16, %s3506_s17  }
  0x28   : > { %3473 = dma.done.wait (%p3146_p9), [#allocation3], 12288  }
  0x29   : > { %3475 = vsyncadd (%p3146_p9), [#allocation3], 4294955008 }
  0x2a   : > { %3477 = dma.done.wait (%p3146_p9), [#allocation6], 4096  }
  0x2b   : > { %3479 = vsyncadd (%p3146_p9), [#allocation6], 4294963200  ;;  %p549_p13 = scmp.lt.s32.totalorder %s3624_s22, 1  ;;  %vm567_vm0 = vcmask 1044480   ;;  %v554_v2 = vld [vmem:[%s4770_s1] sm:$0xff]  ;;  %vm560_vm1 = vcmask 105472   ;;  %v756_v6 = vlaneseq }
  0x2c   : > { %v555_v5 = vld [vmem:[%s4770_s1 + $0x8] sm:$0xff]  ;;  %v3511_v12 = vmov 1.0   ;;  %s3512_s23 = smov 48   ;;  %s3513_s26 = smov 80   ;;  %vm771_vm7 = vcmask 130048  }
  0x2d   : > { %s550_s12 = scalar_select %p549_p13, %s3624_s22, 1  ;;  %v757_v7 = vshrl.u32 %v756_v6, 7  ;;  %v760_v8 = vand.u32 127, %v756_v6 }
  0x2e   : > { %s4793_s16 = smov 112   ;;  %s3515_s17 = smov 32  }
  0x2f   : > { %s3102_s2 = sshll.u32 %s550_s12, 5  ;;  %v758_v9 = vadd.s32 8, %v757_v7  ;;  %v3017_v10 = vadd.s32 4294967295, %v760_v8  ;;  %v766_v11 = vadd.s32 1, %v760_v8  ;;  %s3516_s25 = smov 64  }
  0x30   : > { %s553_s18 = scalar_lea.vmem %s4769_s0, %s3102_s2  ;;  %s3517_s20 = smov 96  }
  0x31   : > { %v558_v0 = vld [vmem:[%s553_s18 + $0x10] sm:$0x1f]  ;;  %v556_v1 = vld [vmem:[%s553_s18] sm:$0xff]  ;;  %v559_v3 = vld [vmem:[%s553_s18 + $0x18] sm:$0x1f]  ;;  %vm763_vm2 = vcmp.eq.s32.totalorder %v758_v9, %v3017_v10  ;;  %vm768_vm3 = vcmp.eq.s32.totalorder %v758_v9, %v766_v11  ;;  %vm762_vm4 = vcmp.eq.s32.totalorder %v757_v7, %v3017_v10  ;;  %vm767_vm5 = vcmp.eq.s32.totalorder %v757_v7, %v766_v11  ;;  %s3518_s24 = smov 16  }
  0x32   : > { %3011 = vmatpush.msk.msra.mxu0 %vm567_vm0, %v558_v0  ;;  %v557_v4 = vld [vmem:[%s553_s18 + $0x8] sm:$0xff]  ;;  %3014 = vmatpush.msk.msra.mxu1 %vm567_vm0, %v559_v3  ;;  %s4430_s18 = sand.u32 1, %s3494_s19   ;;  %s4825_s2 = sld [smem:[#allocation24_spill]] }
  0x33   : > { %3036 = vmatpush.msk.msra.mxu3 %vm768_vm3, %v3511_v12  ;;  %3106 = vmatpush.msk.msra.mxu2 %vm763_vm2, %v3511_v12  ;;  %s3007_s21 = sshll.u32 %s4430_s18, 4 }
  0x34   : > { %589 = vmatpush.msra.mxu0 %v556_v1  ;;  %612 = vmatpush.msra.mxu1 %v557_v4  ;;  %s4435_s27 = scalar_lea.vmem [#allocation9], %s3007_s21 }
  0x35   : > { %3012 = vmatmul.msk.f32.vlgmr.msra.gmra.mxu0 %vm560_vm1, %v554_v2  ;;  %3015 = vmatmul.msk.f32.vlgmr.msra.gmra.mxu1 %vm560_vm1, %v554_v2 }
  0x36   : > { %3018 = vmatpush.msk.msrb.mxu0 %vm763_vm2, %v3511_v12  ;;  %3105 = vmatpush.msk.msrb.mxu1 %vm763_vm2, %v3511_v12 }
  0x37   : > { %3037 = vmatpush.msk.msra.mxu3 %vm767_vm5, %v3511_v12  ;;  %3108 = vmatpush.msk.msra.mxu2 %vm762_vm4, %v3511_v12 }
  0x38   : > { %3019 = vmatpush.msk.msrb.mxu0 %vm762_vm4, %v3511_v12  ;;  %3107 = vmatpush.msk.msrb.mxu1 %vm762_vm4, %v3511_v12 }
  0x3d   : > { %3013 = vmatmul.msk.f32.gmra.mxu0 %vm560_vm1, %v555_v5  ;;  %3016 = vmatmul.msk.f32.gmra.mxu1 %vm560_vm1, %v555_v5 }
  0xb2   : > { %v3700_v13 = vpop.f32.mrf.mxu0  ;;  %v3711_v17 = vpop.f32.mrf.mxu1 }
  0xba   : > { %v594_v14 = vpop.f32.mrf.mxu0  ;;  %v3716_v18 = vpop.f32.mrf.mxu1 }
  0xbb   : > { %648 = vrot.lane.b32.xlu2 %v594_v14, %s3512_s23  ;;  %636 = vrot.lane.b32.xlu1 %v594_v14, %s3513_s26  ;;  %vm708_vm6 = vcmp.ge.f32.partialorder %v594_v14, 0.0  ;;  %v724_v15 = vmul.f32 0.01, %v594_v14  ;;  %v732_v60 = vmul.f32 0.01, %v3716_v18 }
  0xbc   : > { %624 = vrot.lane.b32.xlu0 %v594_v14, %s4793_s16 }
  0xbd   : > { %v3705_v16 = vsel %vm708_vm6, %v594_v14, %v724_v15  ;;  %vm716_vm6 = vcmp.ge.f32.partialorder %v3716_v18, 0.0 }
  0xbe   : > { %3020 = vmatmul.msk.f32.vlgmr.msrb.gmra.mxu0 %vm771_vm7, %v3705_v16  ;;  %3038 = vmatmul.msk.f32.vlgmr.msra.gmra.mxu3 %vm771_vm7, %v3705_v16  ;;  %v748_v62 = vsel %vm716_vm6, %v3716_v18, %v732_v60  ;;  %v975_v60 = vld [vmem:[#allocation2 + $0xc8] sm:$0xff] }
  0xc3   : > { %654 = vrot.lane.b32.xlu2 %v594_v14, %s3515_s17  ;;  %642 = vrot.lane.b32.xlu1 %v594_v14, %s3516_s25 }
  0xc4   : > { %630 = vrot.lane.b32.xlu0 %v594_v14, %s3517_s20 }
  0xcb   : > { %668 = vrot.lane.b32.xlu1 %v3716_v18, %s4793_s16  ;;  %674 = vrot.lane.b32.xlu2 %v3716_v18, %s3517_s20 }
  0xcc   : > { %660 = vrot.lane.b32.xlu0 %v594_v14, %s3518_s24 }
  0xd3   : > { %686 = vrot.lane.b32.xlu1 %v3716_v18, %s3516_s25  ;;  %692 = vrot.lane.b32.xlu2 %v3716_v18, %s3512_s23 }
  0xd4   : > { %680 = vrot.lane.b32.xlu0 %v3716_v18, %s3513_s26 }
  0xdb   : > { %704 = vrot.lane.b32.xlu1 %v3716_v18, %s3518_s24 }
  0xdc   : > { %698 = vrot.lane.b32.xlu0 %v3716_v18, %s3515_s17 }
 0x115   : > { %v649_v19 = vpop.permute.xlu2 %648 }
 0x116   : > { %v729_v31 = vmul.f32 0.01, %v649_v19  ;;  %vm713_vm11 = vcmp.ge.f32.partialorder %v649_v19, 0.0 }
 0x118   : > { %v745_v37 = vsel %vm713_vm11, %v649_v19, %v729_v31 }
 0x11d   : > { %v655_v27 = vpop.permute.xlu2 %654 }
 0x11e   : > { %v730_v41 = vmul.f32 0.01, %v655_v27  ;;  %vm714_vm15 = vcmp.ge.f32.partialorder %v655_v27, 0.0 }
 0x120   : > { %v746_v45 = vsel %vm714_vm15, %v655_v27, %v730_v41  ;;  %v959_v41 = vld [vmem:[#allocation2 + $0x48] sm:$0xff] }
 0x125   : > { %v675_v36 = vpop.permute.xlu2 %674 }
 0x126   : > { %v734_v40 = vmul.f32 0.01, %v675_v36  ;;  %vm718_vm14 = vcmp.ge.f32.partialorder %v675_v36, 0.0 }
 0x128   : > { %v750_v44 = vsel %vm718_vm14, %v675_v36, %v734_v40  ;;  %v954_v36 = vld [vmem:[#allocation2 + $0x20] sm:$0xff] }
 0x129   : > { %v1385_v40 = vld [vmem:[%s4772_s3] sm:$0xff] }
 0x12d   : > { %v637_v20 = vpop.permute.xlu1 %636  ;;  %v693_v48 = vpop.permute.xlu2 %692 }
 0x12e   : > { %v625_v21 = vpop.permute.xlu0 %624  ;;  %v727_v32 = vmul.f32 0.01, %v637_v20  ;;  %vm711_vm12 = vcmp.ge.f32.partialorder %v637_v20, 0.0  ;;  %v737_v54 = vmul.f32 0.01, %v693_v48  ;;  %vm721_vm4 = vcmp.ge.f32.partialorder %v693_v48, 0.0 }
 0x12f   : > { %vm709_vm8 = vcmp.ge.f32.partialorder %v625_v21, 0.0  ;;  %v725_v22 = vmul.f32 0.01, %v625_v21 }
 0x130   : > { %v743_v39 = vsel %vm711_vm12, %v637_v20, %v727_v32  ;;  %v753_v59 = vsel %vm721_vm4, %v693_v48, %v737_v54  ;;  %v966_v48 = vld [vmem:[#allocation2 + $0x80] sm:$0xff]  ;;  %v961_v54 = vld [vmem:[#allocation2 + $0x58] sm:$0xff] }
 0x131   : > { %v3733_v23 = vsel %vm709_vm8, %v625_v21, %v725_v22 }
 0x132   : > { %3021 = vmatmul.msk.f32.gmra.mxu0 %vm771_vm7, %v3733_v23  ;;  %3039 = vmatmul.msk.f32.gmra.mxu3 %vm771_vm7, %v3733_v23 }
 0x135   : > { %v643_v24 = vpop.permute.xlu1 %642 }
 0x136   : > { %vm712_vm9 = vcmp.ge.f32.partialorder %v643_v24, 0.0  ;;  %v728_v25 = vmul.f32 0.01, %v643_v24  ;;  %v631_v26 = vpop.permute.xlu0 %630 }
 0x137   : > { %vm710_vm10 = vcmp.ge.f32.partialorder %v631_v26, 0.0  ;;  %v726_v28 = vmul.f32 0.01, %v631_v26 }
 0x138   : > { %v3739_v29 = vsel %vm712_vm9, %v643_v24, %v728_v25 }
 0x139   : > { %v3741_v30 = vsel %vm710_vm10, %v631_v26, %v726_v28  ;;  %3024 = vmatmul.msk.f32.vlgmr.msrb.gmra.mxu1 %vm771_vm7, %v3739_v29 }
 0x13a   : > { %3022 = vmatmul.msk.f32.gmra.mxu0 %vm771_vm7, %v3741_v30  ;;  %3040 = vmatmul.msk.f32.gmra.mxu3 %vm771_vm7, %v3741_v30 }
 0x13b   : > { %v837_v19 = vpop.f32.mrf.mxu0 }
 0x13d   : > { %v669_v33 = vpop.permute.xlu1 %668 }
 0x13e   : > { %vm717_vm13 = vcmp.ge.f32.partialorder %v669_v33, 0.0  ;;  %v733_v34 = vmul.f32 0.01, %v669_v33  ;;  %v661_v35 = vpop.permute.xlu0 %660 }
 0x13f   : > { %v731_v47 = vmul.f32 0.01, %v661_v35  ;;  %vm715_vm1 = vcmp.ge.f32.partialorder %v661_v35, 0.0 }
 0x140   : > { %v3749_v38 = vsel %vm717_vm13, %v669_v33, %v733_v34  ;;  %v950_v33 = vld [vmem:[#allocation2] sm:$0xff]  ;;  %v951_v34 = vld [vmem:[#allocation2 + $0x8] sm:$0xff] }
 0x141   : > { %3025 = vmatmul.msk.f32.gmra.mxu1 %vm771_vm7, %v745_v37  ;;  %3029 = vmatmul.msk.f32.vlgmr.msra.gmra.mxu2 %vm771_vm7, %v3749_v38  ;;  %v747_v55 = vsel %vm715_vm1, %v661_v35, %v731_v47  ;;  %v3787_v63 = vpop.f32.mrf.mxu3  ;;  %v953_v35 = vld [vmem:[#allocation2 + $0x18] sm:$0xff] }
 0x142   : > { %3023 = vmatmul.msk.f32.gmra.mxu0 %vm771_vm7, %v743_v39  ;;  %3041 = vmatmul.msk.f32.gmra.mxu3 %vm771_vm7, %v743_v39  ;;  %v965_v47 = vld [vmem:[#allocation2 + $0x78] sm:$0xff] }
 0x145   : > { %v687_v42 = vpop.permute.xlu1 %686 }
 0x146   : > { %v681_v43 = vpop.permute.xlu0 %680  ;;  %v736_v57 = vmul.f32 0.01, %v687_v42  ;;  %vm720_vm5 = vcmp.ge.f32.partialorder %v687_v42, 0.0 }
 0x147   : > { %v735_v46 = vmul.f32 0.01, %v681_v43  ;;  %vm719_vm0 = vcmp.ge.f32.partialorder %v681_v43, 0.0 }
 0x148   : > { %v752_v61 = vsel %vm720_vm5, %v687_v42, %v736_v57  ;;  %v960_v42 = vld [vmem:[#allocation2 + $0x50] sm:$0xff] }
 0x149   : > { %3026 = vmatmul.msk.f32.gmra.mxu1 %vm771_vm7, %v746_v45  ;;  %3030 = vmatmul.msk.f32.gmra.mxu2 %vm771_vm7, %v750_v44  ;;  %v751_v52 = vsel %vm719_vm0, %v681_v43, %v735_v46  ;;  %v952_v43 = vld [vmem:[#allocation2 + $0x10] sm:$0xff]  ;;  %v955_v46 = vld [vmem:[#allocation2 + $0x28] sm:$0xff] }
 0x14a   : > { %3042 = vmatmul.msk.f32.gmra.mxu3 %vm771_vm7, %v3739_v29  ;;  %v972_v57 = vld [vmem:[#allocation2 + $0xb0] sm:$0xff] }
 0x14d   : > { %v705_v49 = vpop.permute.xlu1 %704 }
 0x14e   : > { %vm723_vm2 = vcmp.ge.f32.partialorder %v705_v49, 0.0  ;;  %v739_v50 = vmul.f32 0.01, %v705_v49  ;;  %v699_v51 = vpop.permute.xlu0 %698 }
 0x14f   : > { %vm722_vm3 = vcmp.ge.f32.partialorder %v699_v51, 0.0  ;;  %v738_v53 = vmul.f32 0.01, %v699_v51 }
 0x150   : > { %v755_v56 = vsel %vm723_vm2, %v705_v49, %v739_v50  ;;  %v958_v49 = vld [vmem:[#allocation2 + $0x40] sm:$0xff]  ;;  %v1386_v50 = vld [vmem:[%s4772_s3 + $0x8] sm:$0xff] }
 0x151   : > { %3027 = vmatmul.msk.f32.gmra.mxu1 %vm771_vm7, %v747_v55  ;;  %3031 = vmatmul.msk.f32.gmra.mxu2 %vm771_vm7, %v751_v52  ;;  %v754_v58 = vsel %vm722_vm3, %v699_v51, %v738_v53  ;;  %v1797_v51 = vld [vmem:[%s4773_s4] sm:$0xff]  ;;  %v969_v53 = vld [vmem:[#allocation2 + $0x98] sm:$0xff] }
 0x152   : > { %3043 = vmatmul.msk.f32.gmra.mxu3 %vm771_vm7, %v745_v37  ;;  %1159 = vmatpush.msra.mxu1 %v755_v56 }
 0x154   : > { %1160 = vmatpush.msra.mxu1 %v754_v58 }
 0x156   : > { %1161 = vmatpush.msra.mxu1 %v753_v59 }
 0x158   : > { %1162 = vmatpush.msra.mxu1 %v752_v61 }
 0x159   : > { %3028 = vmatmul.msk.f32.gmra.mxu1 %vm771_vm7, %v748_v62  ;;  %3032 = vmatmul.msk.f32.gmra.mxu2 %vm771_vm7, %v752_v61 }
 0x15a   : > { %3044 = vmatmul.msk.f32.gmra.mxu3 %vm771_vm7, %v746_v45  ;;  %1163 = vmatpush.msra.mxu1 %v751_v52 }
 0x15c   : > { %1164 = vmatpush.msra.mxu1 %v750_v44 }
 0x15e   : > { %1165 = vmatpush.msra.mxu1 %v3749_v38 }
 0x160   : > { %1166 = vmatpush.msra.mxu1 %v748_v62 }
 0x161   : > { %3033 = vmatmul.msk.f32.gmra.mxu2 %vm771_vm7, %v753_v59 }
 0x162   : > { %3045 = vmatmul.msk.f32.gmra.mxu3 %vm771_vm7, %v747_v55  ;;  %1167 = vmatpush.msra.mxu1 %v747_v55  ;;  %v3208_v55 = vld [vmem:[%s4774_s5] ss:$0 sm:$0xff] }
 0x164   : > { %1168 = vmatpush.msra.mxu1 %v746_v45  ;;  %v963_v45 = vld [vmem:[#allocation2 + $0x68] sm:$0xff] }
 0x166   : > { %1169 = vmatpush.msra.mxu1 %v745_v37  ;;  %v956_v37 = vld [vmem:[#allocation2 + $0x30] sm:$0xff] }
 0x168   : > { %1170 = vmatpush.msra.mxu1 %v3739_v29 }
 0x169   : > { %3034 = vmatmul.msk.f32.gmra.mxu2 %vm771_vm7, %v754_v58 }
 0x16a   : > { %3046 = vmatmul.msk.f32.gmra.mxu3 %vm771_vm7, %v748_v62  ;;  %1171 = vmatpush.msra.mxu1 %v743_v39  ;;  %v3519_v39 = vmov 0   ;;  %v3209_v62 = vld [vmem:[%s4774_s5 + $0x1] ss:$0 sm:$0xff] }
 0x16b   : > { %3206 = vset.pattern.permute.xlu0 %v3519_v39  ;;  %3207 = vset.pattern.permute.xlu1 %v3519_v39 }
 0x16c   : > { %1172 = vmatpush.msra.mxu1 %v3741_v30  ;;  %1389 = vperm.xlu0 %3206, %v1385_v40   ;;  %v997_v40 = vld [vmem:[#allocation2 + $0x178] sm:$0xff] }
 0x16d   : > { %3205 = vset.pattern.permute.xlu2 %v3519_v39  ;;  %1800 = vperm.xlu1 %3207, %v1797_v51   ;;  %v1005_v39 = vld [vmem:[#allocation2 + $0x1b8] sm:$0xff]  ;;  %v1011_v51 = vld [vmem:[#allocation2 + $0x1e8] sm:$0xff] }
 0x16e   : > { %1173 = vmatpush.msra.mxu1 %v3733_v23  ;;  %1394 = vperm.xlu2 %3205, %v1386_v50   ;;  %v1010_v50 = vld [vmem:[#allocation2 + $0x1e0] sm:$0xff] }
 0x170   : > { %1174 = vmatpush.msra.mxu1 %v3705_v16 }
 0x171   : > { %3035 = vmatmul.msk.f32.gmra.mxu2 %vm771_vm7, %v755_v56  ;;  %1175 = vmatmul.f32.vlgmr.msra.gmra.mxu1 %v951_v34  ;;  %v1002_v34 = vld [vmem:[#allocation2 + $0x1a0] sm:$0xff] }
 0x172   : > { %3047 = vmatmul.msk.f32.gmra.mxu3 %vm771_vm7, %v3749_v38  ;;  %v957_v38 = vld [vmem:[#allocation2 + $0x38] sm:$0xff] }
 0x174   : > { %1984 = vperm.xlu0 %3206, %v3209_v62   ;;  %v1006_v62 = vld [vmem:[#allocation2 + $0x1c0] sm:$0xff] }
 0x175   : > { %1980 = vperm.xlu1 %3207, %v3208_v55  }
 0x179   : > { %1178 = vmatmul.f32.gmra.mxu1 %v954_v36 }
 0x17a   : > { %3048 = vmatmul.msk.f32.gmra.mxu3 %vm771_vm7, %v750_v44  ;;  %v962_v44 = vld [vmem:[#allocation2 + $0x60] sm:$0xff] }
 0x181   : > { %1181 = vmatmul.f32.gmra.mxu1 %v957_v38  ;;  %v1004_v38 = vld [vmem:[#allocation2 + $0x1b0] sm:$0xff] }
 0x182   : > { %3049 = vmatmul.msk.f32.gmra.mxu3 %vm771_vm7, %v751_v52  ;;  %v968_v52 = vld [vmem:[#allocation2 + $0x90] sm:$0xff] }
 0x189   : > { %1184 = vmatmul.f32.gmra.mxu1 %v960_v42 }
 0x18a   : > { %3050 = vmatmul.msk.f32.gmra.mxu3 %vm771_vm7, %v752_v61  ;;  %v967_v61 = vld [vmem:[#allocation2 + $0x88] sm:$0xff] }
 0x191   : > { %1187 = vmatmul.f32.gmra.mxu1 %v963_v45  ;;  %v1008_v45 = vld [vmem:[#allocation2 + $0x1d0] sm:$0xff] }
 0x192   : > { %3051 = vmatmul.msk.f32.gmra.mxu3 %vm771_vm7, %v753_v59  ;;  %v974_v59 = vld [vmem:[#allocation2 + $0xc0] sm:$0xff] }
 0x199   : > { %1190 = vmatmul.f32.gmra.mxu1 %v966_v48 }
 0x19a   : > { %3052 = vmatmul.msk.f32.gmra.mxu3 %vm771_vm7, %v754_v58  ;;  %v964_v58 = vld [vmem:[#allocation2 + $0x70] sm:$0xff] }
 0x1a1   : > { %1193 = vmatmul.f32.gmra.mxu1 %v969_v53 }
 0x1a2   : > { %3053 = vmatmul.msk.f32.gmra.mxu3 %vm771_vm7, %v755_v56  ;;  %v971_v56 = vld [vmem:[#allocation2 + $0xa8] sm:$0xff] }
 0x1a9   : > { %1196 = vmatmul.f32.gmra.mxu1 %v972_v57 }
 0x1af   : > { %v840_v22 = vpop.f32.mrf.mxu0 }
 0x1b1   : > { %1199 = vmatmul.f32.gmra.mxu1 %v975_v60  ;;  %v1014_v60 = vld [vmem:[#allocation2 + $0x200] sm:$0xff] }
 0x1b5   : > { %v3789_v0 = vpop.f32.mrf.mxu3 }
 0x1b6   : > { %v849_v8 = vpop.f32.mrf.mxu1 }
 0x1b7   : > { %v843_v25 = vpop.f32.mrf.mxu0 }
 0x1bd   : > { %v3791_v1 = vpop.f32.mrf.mxu3 }
 0x1be   : > { %v852_v11 = vpop.f32.mrf.mxu1 }
 0x1bf   : > { %v846_v28 = vpop.f32.mrf.mxu0 }
 0x1c4   : > { %v864_v2 = vpop.f32.mrf.mxu2 }
 0x1c5   : > { %v3793_v3 = vpop.f32.mrf.mxu3 }
 0x1c6   : > { %v855_v18 = vpop.f32.mrf.mxu1 }
 0x1cc   : > { %v867_v4 = vpop.f32.mrf.mxu2 }
 0x1cd   : > { %v3795_v5 = vpop.f32.mrf.mxu3 }
 0x1ce   : > { %v858_v23 = vpop.f32.mrf.mxu1 }
 0x1d4   : > { %v870_v6 = vpop.f32.mrf.mxu2 }
 0x1d5   : > { %v3797_v7 = vpop.f32.mrf.mxu3 }
 0x1d6   : > { %v861_v26 = vpop.f32.mrf.mxu1 }
 0x1dc   : > { %v873_v9 = vpop.f32.mrf.mxu2 }
 0x1dd   : > { %v920_v10 = vpop.f32.mrf.mxu3 }
 0x1e4   : > { %v876_v12 = vpop.f32.mrf.mxu2 }
 0x1e5   : > { %v923_v14 = vpop.f32.mrf.mxu3 }
 0x1ec   : > { %v879_v15 = vpop.f32.mrf.mxu2 }
 0x1ed   : > { %v926_v16 = vpop.f32.mrf.mxu3 }
 0x1f4   : > { %v882_v20 = vpop.f32.mrf.mxu2 }
 0x1f5   : > { %v929_v21 = vpop.f32.mrf.mxu3  ;;  %1046 = vmatpush.msra.mxu0 %v882_v20  ;;  %v985_v20 = vld [vmem:[#allocation2 + $0x118] sm:$0xff] }
 0x1f7   : > { %1047 = vmatpush.msra.mxu0 %v879_v15  ;;  %v990_v15 = vld [vmem:[#allocation2 + $0x140] sm:$0xff] }
 0x1f9   : > { %1048 = vmatpush.msra.mxu0 %v876_v12  ;;  %v3211_v12 = vld [vmem:[%s4774_s5 + $0x3] ss:$0 sm:$0xff] }
 0x1fa   : > { %1992 = vperm.xlu0 %3206, %v3211_v12   ;;  %v3216_v12 = vld [vmem:[%s4774_s5 + $0x8] ss:$0 sm:$0xff] }
 0x1fb   : > { %1049 = vmatpush.msra.mxu0 %v873_v9  ;;  %v986_v9 = vld [vmem:[#allocation2 + $0x120] sm:$0xff] }
 0x1fd   : > { %v932_v24 = vpop.f32.mrf.mxu3  ;;  %1050 = vmatpush.msra.mxu0 %v870_v6  ;;  %v983_v6 = vld [vmem:[#allocation2 + $0x108] sm:$0xff] }
 0x1ff   : > { %1051 = vmatpush.msra.mxu0 %v867_v4  ;;  %v973_v4 = vld [vmem:[#allocation2 + $0xb8] sm:$0xff] }
 0x201   : > { %1052 = vmatpush.msra.mxu0 %v864_v2  ;;  %v980_v2 = vld [vmem:[#allocation2 + $0xf0] sm:$0xff] }
 0x203   : > { %1053 = vmatpush.msra.mxu0 %v861_v26  ;;  %v3831_v26 = vpop.f32.mrf.mxu1 }
 0x205   : > { %v935_v27 = vpop.f32.mrf.mxu3  ;;  %1054 = vmatpush.msra.mxu0 %v858_v23  ;;  %v996_v23 = vld [vmem:[#allocation2 + $0x170] sm:$0xff] }
 0x207   : > { %1055 = vmatpush.msra.mxu0 %v855_v18  ;;  %v992_v18 = vld [vmem:[#allocation2 + $0x150] sm:$0xff] }
 0x209   : > { %1056 = vmatpush.msra.mxu0 %v852_v11  ;;  %v979_v11 = vld [vmem:[#allocation2 + $0xe8] sm:$0xff] }
 0x20b   : > { %1057 = vmatpush.msra.mxu0 %v849_v8  ;;  %v976_v8 = vld [vmem:[#allocation2 + $0xd0] sm:$0xff] }
 0x20d   : > { %v938_v29 = vpop.f32.mrf.mxu3  ;;  %1058 = vmatpush.msra.mxu0 %v846_v28  ;;  %v999_v28 = vld [vmem:[#allocation2 + $0x188] sm:$0xff] }
 0x20f   : > { %1059 = vmatpush.msra.mxu0 %v843_v25 }
 0x211   : > { %1060 = vmatpush.msra.mxu0 %v840_v22  ;;  %v995_v22 = vld [vmem:[#allocation2 + $0x168] sm:$0xff] }
 0x213   : > { %1061 = vmatpush.msra.mxu0 %v837_v19  ;;  %v993_v19 = vld [vmem:[#allocation2 + $0x158] sm:$0xff] }
 0x214   : > { %1062 = vmatmul.f32.vlgmr.msra.gmra.mxu0 %v950_v33  ;;  %v1001_v33 = vld [vmem:[#allocation2 + $0x198] sm:$0xff] }
 0x215   : > { %v941_v30 = vpop.f32.mrf.mxu3 }
 0x21c   : > { %1065 = vmatmul.f32.gmra.mxu0 %v953_v35  ;;  %v994_v35 = vld [vmem:[#allocation2 + $0x160] sm:$0xff] }
 0x21d   : > { %v944_v31 = vpop.f32.mrf.mxu3 }
 0x224   : > { %1068 = vmatmul.f32.gmra.mxu0 %v956_v37 }
 0x225   : > { %v947_v32 = vpop.f32.mrf.mxu3 }
 0x226   : > { %1272 = vmatpush.msrb.mxu2 %v947_v32  ;;  %v3213_v32 = vld [vmem:[%s4774_s5 + $0x5] ss:$0 sm:$0xff] }
 0x227   : > { %2000 = vperm.xlu0 %3206, %v3213_v32  }
 0x228   : > { %1273 = vmatpush.msrb.mxu2 %v944_v31  ;;  %v1179_v31 = vpop.f32.mrf.mxu1 }
 0x22a   : > { %1274 = vmatpush.msrb.mxu2 %v941_v30 }
 0x22c   : > { %1275 = vmatpush.msrb.mxu2 %v938_v29  ;;  %1071 = vmatmul.f32.gmra.mxu0 %v959_v41  ;;  %v991_v29 = vld [vmem:[#allocation2 + $0x148] sm:$0xff] }
 0x22e   : > { %1276 = vmatpush.msrb.mxu2 %v935_v27  ;;  %v998_v27 = vld [vmem:[#allocation2 + $0x180] sm:$0xff] }
 0x230   : > { %1277 = vmatpush.msrb.mxu2 %v932_v24  ;;  %v988_v24 = vld [vmem:[#allocation2 + $0x130] sm:$0xff]  ;;  %v3838_v37 = vpop.f32.mrf.mxu1 }
 0x232   : > { %1278 = vmatpush.msrb.mxu2 %v929_v21  ;;  %v3212_v21 = vld [vmem:[%s4774_s5 + $0x4] ss:$0 sm:$0xff] }
 0x234   : > { %1279 = vmatpush.msrb.mxu2 %v926_v16  ;;  %1074 = vmatmul.f32.gmra.mxu0 %v962_v44  ;;  %v982_v16 = vld [vmem:[#allocation2 + $0x100] sm:$0xff]  ;;  %v1007_v44 = vld [vmem:[#allocation2 + $0x1c8] sm:$0xff] }
 0x236   : > { %1280 = vmatpush.msrb.mxu2 %v923_v14  ;;  %v989_v14 = vld [vmem:[#allocation2 + $0x138] sm:$0xff] }
 0x238   : > { %1281 = vmatpush.msrb.mxu2 %v920_v10  ;;  %v987_v10 = vld [vmem:[#allocation2 + $0x128] sm:$0xff]  ;;  %v1185_v42 = vpop.f32.mrf.mxu1 }
 0x23a   : > { %1282 = vmatpush.msrb.mxu2 %v3797_v7  ;;  %v984_v7 = vld [vmem:[#allocation2 + $0x110] sm:$0xff] }
 0x23c   : > { %1283 = vmatpush.msrb.mxu2 %v3795_v5  ;;  %1077 = vmatmul.f32.gmra.mxu0 %v965_v47  ;;  %v3210_v5 = vld [vmem:[%s4774_s5 + $0x2] ss:$0 sm:$0xff] }
 0x23d   : > { %1988 = vperm.xlu1 %3207, %v3210_v5   ;;  %v1017_v5 = vld [vmem:[#allocation2 + $0x218] sm:$0xff] }
 0x23e   : > { %1284 = vmatpush.msrb.mxu2 %v3793_v3  ;;  %v981_v3 = vld [vmem:[#allocation2 + $0xf8] sm:$0xff] }
 0x240   : > { %1285 = vmatpush.msrb.mxu2 %v3791_v1  ;;  %v970_v1 = vld [vmem:[#allocation2 + $0xa0] sm:$0xff]  ;;  %v3845_v48 = vpop.f32.mrf.mxu1 }
 0x242   : > { %1286 = vmatpush.msrb.mxu2 %v3789_v0  ;;  %v978_v0 = vld [vmem:[#allocation2 + $0xe0] sm:$0xff] }
 0x243   : > { %1202 = vmatmul.f32.gmra.mxu1 %v978_v0 }
 0x244   : > { %1287 = vmatpush.msrb.mxu2 %v3787_v63  ;;  %1080 = vmatmul.f32.gmra.mxu0 %v968_v52  ;;  %v977_v63 = vld [vmem:[#allocation2 + $0xd8] sm:$0xff]  ;;  %v1003_v52 = vld [vmem:[#allocation2 + $0x1a8] sm:$0xff] }
 0x245   : > { %1288 = vmatmul.f32.vlgmr.msrb.gmra.mxu2 %v952_v43  ;;  %1996 = vperm.xlu1 %3207, %v3212_v21   ;;  %v3214_v43 = vld [vmem:[%s4774_s5 + $0x6] ss:$0 sm:$0xff] }
 0x248   : > { %v3849_v55 = vpop.f32.mrf.mxu1 }
 0x24b   : > { %1205 = vmatmul.f32.gmra.mxu1 %v981_v3 }
 0x24c   : > { %1083 = vmatmul.f32.gmra.mxu0 %v971_v56  ;;  %v3215_v56 = vld [vmem:[%s4774_s5 + $0x7] ss:$0 sm:$0xff] }
 0x24d   : > { %1291 = vmatmul.f32.gmra.mxu2 %v955_v46  ;;  %2004 = vperm.xlu1 %3207, %v3214_v43   ;;  %v1000_v46 = vld [vmem:[#allocation2 + $0x190] sm:$0xff] }
 0x24e   : > { %2008 = vperm.xlu0 %3206, %v3215_v56  }
 0x253   : > { %1208 = vmatmul.f32.gmra.mxu1 %v984_v7 }
 0x254   : > { %1086 = vmatmul.f32.gmra.mxu0 %v974_v59  ;;  %v1013_v59 = vld [vmem:[#allocation2 + $0x1f8] sm:$0xff] }
 0x255   : > { %1294 = vmatmul.f32.gmra.mxu2 %v958_v49  ;;  %2012 = vperm.xlu1 %3207, %v3216_v12  }
 0x25b   : > { %1211 = vmatmul.f32.gmra.mxu1 %v987_v10 }
 0x25c   : > { %1089 = vmatmul.f32.gmra.mxu0 %v977_v63 }
 0x25d   : > { %1297 = vmatmul.f32.gmra.mxu2 %v961_v54 }
 0x263   : > { %1214 = vmatmul.f32.gmra.mxu1 %v990_v15 }
 0x264   : > { %1092 = vmatmul.f32.gmra.mxu0 %v980_v2  ;;  %v3859_v2 = vpop.f32.mrf.mxu1 }
 0x265   : > { %1300 = vmatmul.f32.gmra.mxu2 %v964_v58  ;;  %v3854_v58 = vpop.permute.xlu2 %1394 }
 0x26b   : > { %1217 = vmatmul.f32.gmra.mxu1 %v993_v19 }
 0x26c   : > { %1095 = vmatmul.f32.gmra.mxu0 %v983_v6  ;;  %v1009_v6 = vld [vmem:[#allocation2 + $0x1d8] sm:$0xff] }
 0x26d   : > { %1303 = vmatmul.f32.gmra.mxu2 %v967_v61 }
 0x273   : > { %1220 = vmatmul.f32.gmra.mxu1 %v996_v23  ;;  %v3873_v23 = vpop.permute.xlu0 %1389 }
 0x274   : > { %1098 = vmatmul.f32.gmra.mxu0 %v986_v9 }
 0x275   : > { %1306 = vmatmul.f32.gmra.mxu2 %v970_v1 }
 0x27b   : > { %1223 = vmatmul.f32.gmra.mxu1 %v999_v28 }
 0x27c   : > { %1101 = vmatmul.f32.gmra.mxu0 %v989_v14 }
 0x27d   : > { %1309 = vmatmul.f32.gmra.mxu2 %v973_v4  ;;  %v1016_v4 = vld [vmem:[#allocation2 + $0x210] sm:$0xff] }
 0x283   : > { %1226 = vmatmul.f32.gmra.mxu1 %v1002_v34  ;;  %v1023_v34 = vld [vmem:[#allocation2 + $0x248] sm:$0xff] }
 0x284   : > { %1104 = vmatmul.f32.gmra.mxu0 %v992_v18  ;;  %v1020_v18 = vld [vmem:[#allocation2 + $0x230] sm:$0xff] }
 0x285   : > { %1312 = vmatmul.f32.gmra.mxu2 %v976_v8 }
 0x28b   : > { %1229 = vmatmul.f32.gmra.mxu1 %v1005_v39 }
 0x28c   : > { %1107 = vmatmul.f32.gmra.mxu0 %v995_v22 }
 0x28d   : > { %1315 = vmatmul.f32.gmra.mxu2 %v979_v11  ;;  %v3865_v11 = vpop.f32.mrf.mxu1 }
 0x291   : > { %v3829_v25 = vpop.f32.mrf.mxu0 }
 0x292   : > { %v1177_v14 = vadd.f32 %v3831_v26, %v3829_v25 }
 0x293   : > { %1232 = vmatmul.f32.gmra.mxu1 %v1008_v45 }
 0x294   : > { %1110 = vmatmul.f32.gmra.mxu0 %v998_v27 }
 0x295   : > { %1318 = vmatmul.f32.gmra.mxu2 %v982_v16  ;;  %v1019_v16 = vld [vmem:[#allocation2 + $0x228] sm:$0xff]  ;;  %v1200_v26 = vpop.f32.mrf.mxu1 }
 0x299   : > { %v1066_v30 = vpop.f32.mrf.mxu0 }
 0x29a   : > { %v1180_v53 = vadd.f32 %v1179_v31, %v1066_v30 }
 0x29b   : > { %1235 = vmatmul.f32.gmra.mxu1 %v1011_v51 }
 0x29c   : > { %1113 = vmatmul.f32.gmra.mxu0 %v1001_v33  ;;  %v1022_v33 = vld [vmem:[#allocation2 + $0x240] sm:$0xff] }
 0x29d   : > { %1321 = vmatmul.f32.gmra.mxu2 %v985_v20  ;;  %v1012_v20 = vld [vmem:[#allocation2 + $0x1f0] sm:$0xff] }
 0x2a1   : > { %v3836_v36 = vpop.f32.mrf.mxu0 }
 0x2a3   : > { %1238 = vmatmul.f32.gmra.mxu1 %v1014_v60  ;;  %v1026_v60 = vld [vmem:[#allocation2 + $0x260] sm:$0xff] }
 0x2a4   : > { %1116 = vmatmul.f32.gmra.mxu0 %v1004_v38 }
 0x2a5   : > { %1324 = vmatmul.f32.gmra.mxu2 %v988_v24 }
 0x2a9   : > { %v1072_v41 = vpop.f32.mrf.mxu0 }
 0x2aa   : > { %v1186_v8 = vadd.f32 %v1185_v42, %v1072_v41 }
 0x2ab   : > { %1241 = vmatmul.f32.gmra.mxu1 %v1017_v5 }
 0x2ac   : > { %1119 = vmatmul.f32.gmra.mxu0 %v1007_v44 }
 0x2ad   : > { %1327 = vmatmul.f32.gmra.mxu2 %v991_v29 }
 0x2b1   : > { %v3843_v47 = vpop.f32.mrf.mxu0 }
 0x2b3   : > { %1244 = vmatmul.f32.gmra.mxu1 %v1020_v18 }
 0x2b4   : > { %1122 = vmatmul.f32.gmra.mxu0 %v1010_v50 }
 0x2b5   : > { %1330 = vmatmul.f32.gmra.mxu2 %v994_v35  ;;  %v1015_v35 = vld [vmem:[#allocation2 + $0x208] sm:$0xff] }
 0x2b9   : > { %v3847_v54 = vpop.f32.mrf.mxu0 }
 0x2ba   : > { %v1192_v43 = vadd.f32 %v3849_v55, %v3847_v54 }
 0x2bb   : > { %1247 = vmatmul.f32.gmra.mxu1 %v1023_v34 }
 0x2bc   : > { %1125 = vmatmul.f32.gmra.mxu0 %v1013_v59  ;;  %v1025_v59 = vld [vmem:[#allocation2 + $0x258] sm:$0xff] }
 0x2bd   : > { %1333 = vmatmul.f32.gmra.mxu2 %v997_v40 }
 0x2c0   : > { %v3884_v51 = vpop.f32.mrf.mxu1 }
 0x2c1   : > { %v3857_v1 = vpop.f32.mrf.mxu0 }
 0x2c3   : > { %1250 = vmatmul.f32.gmra.mxu1 %v1026_v60 }
 0x2c4   : > { %1128 = vmatmul.f32.gmra.mxu0 %v1016_v4 }
 0x2c5   : > { %1336 = vmatmul.f32.gmra.mxu2 %v1000_v46 }
 0x2c8   : > { %v1289_v49 = vpop.f32.mrf.mxu2 }
 0x2c9   : > { %v3863_v10 = vpop.f32.mrf.mxu0  ;;  %v1290_v22 = vadd.f32 %v1289_v49, %v1177_v14 }
 0x2ca   : > { %v1198_v60 = vadd.f32 %v3865_v11, %v3863_v10  ;;  %v3218_v10 = vld [vmem:[%s4774_s5 + $0xb] ss:$0 sm:$0xff] }
 0x2cb   : > { %v1397_v30 = vadd.f32 %v3873_v23, %v1290_v22  ;;  %2024 = vperm.xlu1 %3207, %v3218_v10   ;;  %v3973_v10 = vpop.permute.xlu1 %1800 }
 0x2cc   : > { %1131 = vmatmul.f32.gmra.mxu0 %v1019_v16  ;;  %v1029_v16 = vld [vmem:[#allocation2 + $0x278] sm:$0xff] }
 0x2cd   : > { %1339 = vmatmul.f32.gmra.mxu2 %v1003_v52  ;;  %v1749_v41 = vmul.f32 0.01, %v1397_v30  ;;  %vm1733_vm10 = vcmp.ge.f32.partialorder %v1397_v30, 0.0  ;;  %v1183_v52 = vadd.f32 %v3838_v37, %v3836_v36  ;;  %1253 = vmatmul.f32.gmra.mxu1 %v1029_v16 }
 0x2d0   : > { %v1292_v57 = vpop.f32.mrf.mxu2 }
 0x2d1   : > { %v1293_v61 = vadd.f32 %v1292_v57, %v1180_v53  ;;  %v1087_v25 = vpop.f32.mrf.mxu0  ;;  %v1765_v57 = vsel %vm1733_vm10, %v1397_v30, %v1749_v41 }
 0x2d2   : > { %v3878_v31 = vadd.f32 %v1200_v26, %v1087_v25 }
 0x2d3   : > { %v1398_v63 = vadd.f32 %v3854_v58, %v1293_v61  ;;  %v1018_v61 = vld [vmem:[#allocation2 + $0x220] sm:$0xff] }
 0x2d4   : > { %1134 = vmatmul.f32.gmra.mxu0 %v1022_v33  ;;  %v3217_v33 = vld [vmem:[%s4774_s5 + $0xa] ss:$0 sm:$0xff] }
 0x2d5   : > { %1342 = vmatmul.f32.gmra.mxu2 %v1006_v62  ;;  %v3054_v0 = vmul.f32 -1.442695, %v1398_v63  ;;  %2020 = vperm.xlu0 %3206, %v3217_v33  }
 0x2d7   : > { %3226 = vpow2.f32 %v3054_v0 }
 0x2d8   : > { %v3861_v3 = vpop.f32.mrf.mxu2 }
 0x2d9   : > { %v3882_v50 = vpop.f32.mrf.mxu0  ;;  %v1296_v63 = vadd.f32 %v3861_v3, %v1183_v52  ;;  %v1027_v52 = vld [vmem:[#allocation2 + $0x268] sm:$0xff] }
 0x2db   : > { %v1399_v37 = vadd.f32 %v3873_v23, %v1296_v63 }
 0x2dc   : > { %1137 = vmatmul.f32.gmra.mxu0 %v1025_v59 }
 0x2dd   : > { %v3227_v7 = vpop.eup %3226  ;;  %1345 = vmatmul.f32.gmra.mxu2 %v1009_v6  ;;  %vm1734_vm15 = vcmp.ge.f32.partialorder %v1399_v37, 0.0 }
 0x2de   : > { %v1477_v9 = vadd.f32 1.0, %v3227_v7 }
 0x2e0   : > { %v1298_v15 = vpop.f32.mrf.mxu2  ;;  %3228 = vrcp.f32 %v1477_v9  ;;  %v1504_v38 = vand.u32 2147483648, %v1477_v9  ;;  %v1502_v40 = vand.u32 2147483647, %v1477_v9  ;;  %vm1498_vm9 = vweird.f32 %v1477_v9 }
 0x2e1   : > { %v1299_v19 = vadd.f32 %v1298_v15, %v1186_v8  ;;  %v1093_v6 = vpop.f32.mrf.mxu0  ;;  %v1206_v8 = vpop.f32.mrf.mxu1  ;;  %v1028_v15 = vld [vmem:[#allocation2 + $0x270] sm:$0xff] }
 0x2e2   : > { %v1505_v46 = vor.u32 1.1754944e-38, %v1504_v38  ;;  %vm1503_vm12 = vcmp.eq.f32.partialorder %v1502_v40, 8.507059e+37  ;;  %v3895_v14 = vadd.f32 %v1206_v8, %v1093_v6  ;;  %v1024_v38 = vld [vmem:[#allocation2 + $0x250] sm:$0xff]  ;;  %v1030_v8 = vld [vmem:[#allocation2 + $0x280] sm:$0xff] }
 0x2e3   : > { %v1400_v21 = vadd.f32 %v3854_v58, %v1299_v19  ;;  %v1750_v19 = vmul.f32 0.01, %v1399_v37  ;;  %v1032_v40 = vld [vmem:[#allocation2 + $0x290] sm:$0xff] }
 0x2e4   : > { %1140 = vmatmul.f32.gmra.mxu0 %v1028_v15  ;;  %1256 = vmatmul.f32.gmra.mxu1 %v1032_v40  ;;  %v1043_v40 = vld [vmem:[#allocation2 + $0x2e8] sm:$0xff] }
 0x2e5   : > { %v3055_v24 = vmul.f32 -1.442695, %v1400_v21  ;;  %1348 = vmatmul.f32.gmra.mxu2 %v1012_v20  ;;  %v1766_v30 = vsel %vm1734_vm15, %v1399_v37, %v1750_v19 }
 0x2e6   : > { %v3229_v27 = vpop.eup %3228 }
 0x2e7   : > { %3230 = vpow2.f32 %v3055_v24  ;;  %v1494_v28 = vmul.f32 %v3229_v27, %v1477_v9  ;;  %vm1499_vm8 = vweird.f32 %v3229_v27  ;;  %v1021_v9 = vld [vmem:[#allocation2 + $0x238] sm:$0xff] }
 0x2e8   : > { %v3875_v29 = vpop.f32.mrf.mxu2  ;;  %vm1500_vm11 = vmor %vm1498_vm9, %vm1499_vm8 }
 0x2e9   : > { %v1495_v32 = vsub.f32 1.0, %v1494_v28  ;;  %v1189_v28 = vadd.f32 %v3845_v48, %v3843_v47 }
 0x2eb   : > { %v1496_v39 = vmul.f32 %v3229_v27, %v1495_v32  ;;  %v3899_v32 = vpop.f32.mrf.mxu0  ;;  %v1302_v47 = vadd.f32 %v3875_v29, %v1189_v28 }
 0x2ed   : > { %v3231_v42 = vpop.eup %3230  ;;  %1351 = vmatmul.f32.gmra.mxu2 %v1015_v35  ;;  %v1497_v44 = vadd.f32 %v3229_v27, %v1496_v39  ;;  %v3906_v35 = vpop.f32.mrf.mxu1  ;;  %v1031_v39 = vld [vmem:[#allocation2 + $0x288] sm:$0xff] }
 0x2ee   : > { %v1478_v45 = vadd.f32 1.0, %v3231_v42  ;;  %1143 = vmatmul.f32.gmra.mxu0 %v1031_v39  ;;  %v1401_v42 = vadd.f32 %v3873_v23, %v1302_v47  ;;  %v1210_v28 = vadd.f32 %v3906_v35, %v3899_v32  ;;  %v1036_v39 = vld [vmem:[#allocation2 + $0x2b0] sm:$0xff] }
 0x2ef   : > { %v1501_v49 = vsel %vm1500_vm11, %v3229_v27, %v1497_v44  ;;  %v1044_v47 = vld [vmem:[#allocation2 + $0x2f0] sm:$0xff] }
 0x2f0   : > { %3232 = vrcp.f32 %v1478_v45  ;;  %v1304_v53 = vpop.f32.mrf.mxu2  ;;  %v1506_v56 = vsel %vm1503_vm12, %v1505_v46, %v1501_v49  ;;  %v1519_v12 = vand.u32 2147483648, %v1478_v45  ;;  %v1517_v3 = vand.u32 2147483647, %v1478_v45 }
 0x2f1   : > { %v1305_v54 = vadd.f32 %v1304_v53, %v1192_v43  ;;  %v3888_v55 = vmul.f32 %v1765_v57, %v1506_v56  ;;  %vm1513_vm14 = vweird.f32 %v1478_v45  ;;  %v1034_v56 = vld [vmem:[#allocation2 + $0x2a0] sm:$0xff]  ;;  %v1035_v57 = vld [vmem:[#allocation2 + $0x2a8] sm:$0xff]  ;;  %v1751_v59 = vmul.f32 0.01, %v1401_v42 }
 0x2f2   : > { %v1520_v24 = vor.u32 1.1754944e-38, %v1519_v12  ;;  %vm1518_vm1 = vcmp.eq.f32.partialorder %v1517_v3, 8.507059e+37  ;;  %1259 = vmatmul.f32.gmra.mxu1 %v1035_v57  ;;  %vm1735_vm4 = vcmp.ge.f32.partialorder %v1401_v42, 0.0  ;;  %v1038_v12 = vld [vmem:[#allocation2 + $0x2c0] sm:$0xff] }
 0x2f3   : > { %v1402_v62 = vadd.f32 %v3854_v58, %v1305_v54  ;;  %v3910_v44 = vpop.f32.mrf.mxu0  ;;  %v1767_v37 = vsel %vm1735_vm4, %v1401_v42, %v1751_v59 }
 0x2f5   : > { %v3056_v0 = vmul.f32 -1.442695, %v1402_v62  ;;  %1354 = vmatmul.f32.gmra.mxu2 %v1018_v61  ;;  %v3915_v49 = vpop.f32.mrf.mxu1 }
 0x2f6   : > { %v3233_v4 = vpop.eup %3232  ;;  %1146 = vmatmul.f32.gmra.mxu0 %v1034_v56 }
 0x2f7   : > { %3234 = vpow2.f32 %v3056_v0  ;;  %v1509_v36 = vmul.f32 %v3233_v4, %v1478_v45  ;;  %vm1514_vm13 = vweird.f32 %v3233_v4  ;;  %v1204_v0 = vadd.f32 %v3884_v51, %v3882_v50 }
 0x2f8   : > { %v3893_v5 = vpop.f32.mrf.mxu2  ;;  %vm1515_vm0 = vmor %vm1513_vm14, %vm1514_vm13 }
 0x2f9   : > { %v1510_v7 = vsub.f32 1.0, %v1509_v36 }
 0x2fa   : > { %1262 = vmatmul.f32.gmra.mxu1 %v1038_v12 }
 0x2fb   : > { %v1511_v18 = vmul.f32 %v3233_v4, %v1510_v7  ;;  %v1102_v6 = vpop.f32.mrf.mxu0 }
 0x2fd   : > { %v3235_v20 = vpop.eup %3234  ;;  %1357 = vmatmul.f32.gmra.mxu2 %v1021_v9  ;;  %v1512_v21 = vadd.f32 %v3233_v4, %v1511_v18  ;;  %v1215_v7 = vpop.f32.mrf.mxu1  ;;  %v1037_v9 = vld [vmem:[#allocation2 + $0x2b8] sm:$0xff] }
 0x2fe   : > { %v1479_v22 = vadd.f32 1.0, %v3235_v20  ;;  %1149 = vmatmul.f32.gmra.mxu0 %v1037_v9  ;;  %v1803_v9 = vmul.f32 %v3973_v10, %v3888_v55 }
 0x2ff   : > { %v1516_v27 = vsel %vm1515_vm0, %v3233_v4, %v1512_v21  ;;  %v1033_v21 = vld [vmem:[#allocation2 + $0x298] sm:$0xff] }
 0x300   : > { %3236 = vrcp.f32 %v1479_v22  ;;  %v1310_v25 = vpop.f32.mrf.mxu2  ;;  %v1521_v26 = vsel %vm1518_vm1, %v1520_v24, %v1516_v27  ;;  %v1534_v53 = vand.u32 2147483648, %v1479_v22  ;;  %v1532_v29 = vand.u32 2147483647, %v1479_v22  ;;  %v1041_v24 = vld [vmem:[#allocation2 + $0x2d8] sm:$0xff] }
 0x301   : > { %v3904_v34 = vmul.f32 %v1766_v30, %v1521_v26  ;;  %vm1528_vm3 = vweird.f32 %v1479_v22  ;;  %v1311_v63 = vadd.f32 %v1310_v25, %v1198_v60  ;;  %v1195_v60 = vadd.f32 %v3859_v2, %v3857_v1 }
 0x302   : > { %vm1533_vm6 = vcmp.eq.f32.partialorder %v1532_v29, 8.507059e+37  ;;  %1265 = vmatmul.f32.gmra.mxu1 %v1041_v24 }
 0x303   : > { %v1404_v15 = vadd.f32 %v3854_v58, %v1311_v63  ;;  %v3928_v3 = vpop.f32.mrf.mxu0  ;;  %v1308_v1 = vadd.f32 %v3893_v5, %v1195_v60 }
 0x305   : > { %1360 = vmatmul.f32.gmra.mxu2 %v1024_v38  ;;  %v3057_v51 = vmul.f32 -1.442695, %v1404_v15  ;;  %v3933_v20 = vpop.f32.mrf.mxu1 }
 0x306   : > { %v3237_v48 = vpop.eup %3236 }
 0x307   : > { %v1524_v41 = vmul.f32 %v3237_v48, %v1479_v22  ;;  %vm1529_vm2 = vweird.f32 %v3237_v48  ;;  %v1040_v22 = vld [vmem:[#allocation2 + $0x2d0] sm:$0xff]  ;;  %3238 = vpow2.f32 %v3057_v51 }
 0x308   : > { %v1313_v43 = vpop.f32.mrf.mxu2  ;;  %vm1530_vm5 = vmor %vm1528_vm3, %vm1529_vm2  ;;  %1152 = vmatmul.f32.gmra.mxu0 %v1040_v22 }
 0x309   : > { %v3913_v45 = vadd.f32 %v1313_v43, %v3878_v31  ;;  %v1525_v46 = vsub.f32 1.0, %v1524_v41  ;;  %v1535_v31 = vor.u32 1.1754944e-38, %v1534_v53  ;;  %v1039_v53 = vld [vmem:[#allocation2 + $0x2c8] sm:$0xff] }
 0x30a   : > { %1268 = vmatmul.f32.gmra.mxu1 %v1044_v47 }
 0x30b   : > { %v1526_v54 = vmul.f32 %v3237_v48, %v1525_v46  ;;  %v3937_v26 = vpop.f32.mrf.mxu0 }
 0x30d   : > { %1363 = vmatmul.f32.gmra.mxu2 %v1027_v52  ;;  %v1527_v61 = vadd.f32 %v3237_v48, %v1526_v54  ;;  %v3942_v33 = vpop.f32.mrf.mxu1  ;;  %v3239_v38 = vpop.eup %3238  ;;  %v1216_v54 = vadd.f32 %v1215_v7, %v1102_v6 }
 0x30e   : > { %v3945_v32 = vadd.f32 1.0, %v3239_v38  ;;  %v3999_v38 = vadd.f32 %v3873_v23, %v3913_v45 }
 0x30f   : > { %v1531_v62 = vsel %vm1530_vm5, %v3237_v48, %v1527_v61 }
 0x310   : > { %v1316_v4 = vpop.f32.mrf.mxu2  ;;  %v1536_v36 = vsel %vm1533_vm6, %v1535_v31, %v1531_v62  ;;  %1155 = vmatmul.f32.gmra.mxu0 %v1043_v40  ;;  %v3220_v62 = vld [vmem:[%s4774_s5 + $0xd] ss:$0 sm:$0xff]  ;;  %vm1737_vm10 = vcmp.ge.f32.partialorder %v3999_v38, 0.0  ;;  %vm1543_vm11 = vweird.f32 %v3945_v32 }
 0x311   : > { %v3924_v11 = vmul.f32 %v1767_v37, %v1536_v36  ;;  %v1317_v50 = vadd.f32 %v1316_v4, %v1204_v0  ;;  %v1042_v36 = vld [vmem:[#allocation2 + $0x2e0] sm:$0xff]  ;;  %2032 = vperm.xlu1 %3207, %v3220_v62  }
 0x313   : > { %v1406_v16 = vadd.f32 %v3854_v58, %v1317_v50  ;;  %v1111_v43 = vpop.f32.mrf.mxu0  ;;  %v1403_v50 = vadd.f32 %v3873_v23, %v1308_v1 }
 0x315   : > { %1366 = vmatmul.f32.gmra.mxu2 %v1030_v8  ;;  %v3058_v27 = vmul.f32 -1.442695, %v1406_v16  ;;  %v1224_v52 = vpop.f32.mrf.mxu1  ;;  %vm1736_vm8 = vcmp.ge.f32.partialorder %v1403_v50, 0.0 }
 0x316   : > { %v3952_v56 = vadd.f32 %v1224_v52, %v1111_v43 }
 0x317   : > { %3240 = vpow2.f32 %v3058_v27  ;;  %v1045_v27 = vld [vmem:[#allocation2 + $0x2f8] sm:$0xff] }
 0x318   : > { %v1319_v18 = vpop.f32.mrf.mxu2 }
 0x319   : > { %v3931_v19 = vadd.f32 %v1319_v18, %v3895_v14  ;;  %v3219_v14 = vld [vmem:[%s4774_s5 + $0xc] ss:$0 sm:$0xff] }
 0x31a   : > { %2028 = vperm.xlu0 %3206, %v3219_v14   ;;  %v1804_v14 = vmul.f32 %v3973_v10, %v3904_v34 }
 0x31b   : > { %v1114_v31 = vpop.f32.mrf.mxu0 }
 0x31c   : > { %v4011_v52 = vsel %vm771_vm7, %v1804_v14, 0.0 }
 0x31d   : > { %1369 = vmatmul.f32.gmra.mxu2 %v1033_v21  ;;  %v3241_v41 = vpop.eup %3240  ;;  %v1227_v0 = vpop.f32.mrf.mxu1  ;;  %v3987_v21 = vsel %vm771_vm7, %v1803_v9, 0.0 }
 0x31e   : > { %v3950_v46 = vadd.f32 1.0, %v3241_v41  ;;  %v3967_v37 = vadd.f32 %v1227_v0, %v1114_v31  ;;  %v1820_v47 = vrot.slane %v3987_v21, 4  ;;  %v1407_v31 = vadd.f32 %v3873_v23, %v3931_v19 }
 0x320   : > { %v1322_v25 = vpop.f32.mrf.mxu2  ;;  %vm1558_vm15 = vweird.f32 %v3950_v46  ;;  %v1564_v1 = vand.u32 2147483648, %v3950_v46  ;;  %vm1738_vm2 = vcmp.ge.f32.partialorder %v1407_v31, 0.0 }
 0x321   : > { %v1323_v30 = vadd.f32 %v1322_v25, %v1210_v28  ;;  %v1752_v25 = vmul.f32 0.01, %v1403_v50 }
 0x323   : > { %v1408_v48 = vadd.f32 %v3854_v58, %v1323_v30  ;;  %v1117_v16 = vpop.f32.mrf.mxu0  ;;  %v3221_v30 = vld [vmem:[%s4774_s5 + $0xe] ss:$0 sm:$0xff] }
 0x324   : > { %2036 = vperm.xlu0 %3206, %v3221_v30  }
 0x325   : > { %v3059_v35 = vmul.f32 -1.442695, %v1408_v48  ;;  %1372 = vmatmul.f32.gmra.mxu2 %v1036_v39  ;;  %v1230_v18 = vpop.f32.mrf.mxu1  ;;  %v1547_v48 = vand.u32 2147483647, %v3945_v32 }
 0x326   : > { %v3990_v28 = vadd.f32 %v1230_v18, %v1117_v16 }
 0x327   : > { %3242 = vpow2.f32 %v3059_v35  ;;  %v1222_v35 = vadd.f32 %v3942_v33, %v3937_v26  ;;  %vm4029_vm13 = vcmp.eq.f32.partialorder %v1547_v48, 8.507059e+37 }
 0x328   : > { %v3947_v42 = vpop.f32.mrf.mxu2  ;;  %3244 = vrcp.f32 %v3945_v32 }
 0x329   : > { %3246 = vrcp.f32 %v3950_v46 }
 0x32b   : > { %v1120_v60 = vpop.f32.mrf.mxu0 }
 0x32d   : > { %v3243_v57 = vpop.eup %3242  ;;  %1375 = vmatmul.f32.gmra.mxu2 %v1039_v53  ;;  %v1549_v53 = vand.u32 2147483648, %v3945_v32 }
 0x32e   : > { %v3955_v29 = vadd.f32 1.0, %v3243_v57  ;;  %v3957_v59 = vpop.eup %3244  ;;  %v1768_v57 = vsel %vm1736_vm8, %v1403_v50, %v1752_v25 }
 0x32f   : > { %v1539_v4 = vmul.f32 %v3957_v59, %v3945_v32  ;;  %v3969_v6 = vpop.eup %3246  ;;  %vm1544_vm9 = vweird.f32 %v3957_v59  ;;  %v1233_v32 = vpop.f32.mrf.mxu1 }
 0x330   : > { %3248 = vrcp.f32 %v3955_v29  ;;  %v1328_v61 = vpop.f32.mrf.mxu2  ;;  %v1554_v15 = vmul.f32 %v3969_v6, %v3950_v46  ;;  %vm4025_vm12 = vmor %vm1543_vm11, %vm1544_vm9  ;;  %vm1559_vm14 = vweird.f32 %v3969_v6  ;;  %v4038_v19 = vadd.f32 %v1233_v32, %v1120_v60 }
 0x331   : > { %v1329_v63 = vadd.f32 %v1328_v61, %v1216_v54  ;;  %v1540_v12 = vsub.f32 1.0, %v1539_v4  ;;  %v1213_v54 = vadd.f32 %v3915_v49, %v3910_v44  ;;  %v1753_v61 = vmul.f32 0.01, %v3999_v38  ;;  %v3222_v4 = vld [vmem:[%s4774_s5 + $0xf] ss:$0 sm:$0xff]  ;;  %vm4054_vm1 = vmor %vm1558_vm15, %vm1559_vm14 }
 0x332   : > { %v1555_v24 = vsub.f32 1.0, %v1554_v15  ;;  %2040 = vperm.xlu1 %3207, %v3222_v4   ;;  %vm1573_vm3 = vweird.f32 %v3955_v29  ;;  %v1577_v18 = vand.u32 2147483647, %v3955_v29  ;;  %v1827_v32 = vrot.slane %v4011_v52, 4 }
 0x333   : > { %v1410_v2 = vadd.f32 %v3854_v58, %v1329_v63  ;;  %v1541_v22 = vmul.f32 %v3957_v59, %v1540_v12  ;;  %v1805_v12 = vmul.f32 %v3973_v10, %v3924_v11 }
 0x334   : > { %v1556_v45 = vmul.f32 %v3969_v6, %v1555_v24  ;;  %v1565_v24 = vor.u32 1.1754944e-38, %v1564_v1  ;;  %vm1578_vm6 = vcmp.eq.f32.partialorder %v1577_v18, 8.507059e+37 }
 0x335   : > { %v3060_v7 = vmul.f32 -1.442695, %v1410_v2  ;;  %1378 = vmatmul.f32.gmra.mxu2 %v1042_v36  ;;  %v1542_v41 = vadd.f32 %v3957_v59, %v1541_v22  ;;  %v1550_v36 = vor.u32 1.1754944e-38, %v1549_v53  ;;  %v1754_v22 = vmul.f32 0.01, %v1407_v31 }
 0x336   : > { %v3975_v8 = vpop.eup %3248  ;;  %v1557_v0 = vadd.f32 %v3969_v6, %v1556_v45  ;;  %v1769_v53 = vsel %vm1737_vm10, %v3999_v38, %v1753_v61  ;;  %v1833_v60 = vsel %vm771_vm7, %v1805_v12, 0.0  ;;  %v1821_v12 = vadd.f32 %v1820_v47, %v3987_v21 }
 0x337   : > { %3250 = vpow2.f32 %v3060_v7  ;;  %v1569_v5 = vmul.f32 %v3975_v8, %v3955_v29  ;;  %v1546_v63 = vsel %vm4025_vm12, %v3957_v59, %v1542_v41  ;;  %v1326_v7 = vadd.f32 %v3947_v42, %v1213_v54  ;;  %v1236_v45 = vpop.f32.mrf.mxu1 }
 0x338   : > { %v3982_v51 = vpop.f32.mrf.mxu2  ;;  %v1562_v59 = vand.u32 2147483647, %v3950_v46  ;;  %vm1574_vm0 = vweird.f32 %v3975_v8  ;;  %v1551_v15 = vsel %vm4029_vm13, %v1550_v36, %v1546_v63  ;;  %v1579_v42 = vand.u32 2147483648, %v3955_v29 }
 0x339   : > { %v1570_v39 = vsub.f32 1.0, %v1569_v5  ;;  %v1561_v46 = vsel %vm4054_vm1, %v3969_v6, %v1557_v0  ;;  %vm4066_vm4 = vmor %vm1573_vm3, %vm1574_vm0  ;;  %v4071_v14 = vmul.f32 %v1768_v57, %v1551_v15  ;;  %v1409_v30 = vadd.f32 %v3873_v23, %v1326_v7 }
 0x33a   : > { %vm1563_vm5 = vcmp.eq.f32.partialorder %v1562_v59, 8.507059e+37  ;;  %v1580_v48 = vor.u32 1.1754944e-38, %v1579_v42  ;;  %v1770_v44 = vsel %vm1738_vm2, %v1407_v31, %v1754_v22  ;;  %v1834_v36 = vrot.slane %v1833_v60, 4 }
 0x33b   : > { %v1571_v33 = vmul.f32 %v3975_v8, %v1570_v39  ;;  %v1123_v39 = vpop.f32.mrf.mxu0  ;;  %v1806_v38 = vmul.f32 %v3973_v10, %v4071_v14  ;;  %vm1739_vm9 = vcmp.ge.f32.partialorder %v1409_v30, 0.0  ;;  %v1219_v31 = vadd.f32 %v3933_v20, %v3928_v3 }
 0x33c   : > { %v4084_v54 = vadd.f32 %v1236_v45, %v1123_v39  ;;  %v1835_v21 = vadd.f32 %v1834_v36, %v1833_v60  ;;  %vm2106_vm2 = vcmask 1041409   ;;  %vm2108_vm3 = vcmask 1042434  }
 0x33d   : > { %v3251_v40 = vpop.eup %3250  ;;  %1381 = vmatmul.f32.gmra.mxu2 %v1045_v27  ;;  %v1572_v9 = vadd.f32 %v3975_v8, %v1571_v33  ;;  %v1840_v15 = vsel %vm771_vm7, %v1806_v38, 0.0 }
 0x33e   : > { %v4007_v43 = vadd.f32 1.0, %v3251_v40  ;;  %v1566_v40 = vsel %vm1563_vm5, %v1565_v24, %v1561_v46  ;;  %v1841_v47 = vrot.slane %v1840_v15, 4  ;;  %v1822_v24 = vrot.slane %v1821_v12, 2 }
 0x33f   : > { %v1576_v29 = vsel %vm4066_vm4, %v3975_v8, %v1572_v9  ;;  %v4088_v62 = vmul.f32 %v1769_v53, %v1566_v40  ;;  %v1239_v50 = vpop.f32.mrf.mxu1  ;;  %v1836_v40 = vrot.slane %v1835_v21, 2  ;;  %vm2110_vm4 = vcmask 1043459  }
 0x340   : > { %3252 = vrcp.f32 %v4007_v43  ;;  %v1334_v26 = vpop.f32.mrf.mxu2  ;;  %v1594_v57 = vand.u32 2147483648, %v4007_v43  ;;  %v1592_v33 = vand.u32 2147483647, %v4007_v43  ;;  %vm1588_vm10 = vweird.f32 %v4007_v43 }
 0x341   : > { %v1335_v49 = vadd.f32 %v1334_v26, %v1222_v35  ;;  %v1581_v26 = vsel %vm1578_vm6, %v1580_v48, %v1576_v29  ;;  %v1842_v48 = vadd.f32 %v1841_v47, %v1840_v15  ;;  %vm2112_vm5 = vcmask 1044484  }
 0x342   : > { %v4097_v0 = vmul.f32 %v1770_v44, %v1581_v26  ;;  %v1595_v4 = vor.u32 1.1754944e-38, %v1594_v57  ;;  %vm1593_vm12 = vcmp.eq.f32.partialorder %v1592_v33, 8.507059e+37  ;;  %v1823_v57 = vadd.f32 %v1822_v24, %v1821_v12 }
 0x343   : > { %v1412_v2 = vadd.f32 %v3854_v58, %v1335_v49  ;;  %v1126_v9 = vpop.f32.mrf.mxu0  ;;  %v1843_v36 = vrot.slane %v1842_v48, 2 }
 0x344   : > { %v1808_v42 = vmul.f32 %v3973_v10, %v4097_v0 }
 0x345   : > { %v3061_v5 = vmul.f32 -1.442695, %v1412_v2  ;;  %v1807_v2 = vmul.f32 %v3973_v10, %v4088_v62 }
 0x346   : > { %v3253_v16 = vpop.eup %3252 }
 0x347   : > { %3254 = vpow2.f32 %v3061_v5  ;;  %v1584_v25 = vmul.f32 %v3253_v16, %v4007_v43  ;;  %vm1589_vm8 = vweird.f32 %v3253_v16  ;;  %v1828_v5 = vadd.f32 %v1827_v32, %v4011_v52  ;;  %v1242_v33 = vpop.f32.mrf.mxu1 }
 0x348   : > { %v1337_v6 = vpop.f32.mrf.mxu2  ;;  %vm1590_vm11 = vmor %vm1588_vm10, %vm1589_vm8  ;;  %v1847_v22 = vsel %vm771_vm7, %v1807_v2, 0.0 }
 0x349   : > { %v4078_v35 = vadd.f32 %v1337_v6, %v3952_v56  ;;  %v1585_v41 = vsub.f32 1.0, %v1584_v25  ;;  %v1755_v56 = vmul.f32 0.01, %v1409_v30  ;;  %v1829_v52 = vrot.slane %v1828_v5, 2 }
 0x34a   : > { %v1848_v29 = vrot.slane %v1847_v22, 4 }
 0x34b   : > { %v1586_v8 = vmul.f32 %v3253_v16, %v1585_v41  ;;  %v1771_v59 = vsel %vm1739_vm9, %v1409_v30, %v1755_v56  ;;  %v1854_v30 = vsel %vm771_vm7, %v1808_v42, 0.0  ;;  %v1129_v53 = vpop.f32.mrf.mxu0  ;;  %v1830_v60 = vadd.f32 %v1829_v52, %v1828_v5 }
 0x34c   : > { %v1849_v38 = vadd.f32 %v1848_v29, %v1847_v22 }
 0x34d   : > { %v3255_v49 = vpop.eup %3254  ;;  %v1587_v61 = vadd.f32 %v3253_v16, %v1586_v8  ;;  %v1831_v12 = vrot.slane %v1830_v60, 1 }
 0x34e   : > { %v4095_v63 = vadd.f32 1.0, %v3255_v49  ;;  %v4130_v49 = vadd.f32 %v1242_v33, %v1129_v53  ;;  %v1850_v15 = vrot.slane %v1849_v38, 2 }
 0x34f   : > { %v1591_v1 = vsel %vm1590_vm11, %v3253_v16, %v1587_v61  ;;  %v4115_v16 = vadd.f32 %v1239_v50, %v1126_v9  ;;  %v1844_v50 = vadd.f32 %v1843_v36, %v1842_v48  ;;  %vm2114_vm11 = vcmask 1045509  }
 0x350   : > { %3256 = vrcp.f32 %v4095_v63  ;;  %v1340_v43 = vpop.f32.mrf.mxu2  ;;  %v1596_v7 = vsel %vm1593_vm12, %v1595_v4, %v1591_v1  ;;  %v1609_v44 = vand.u32 2147483648, %v4095_v63  ;;  %v1607_v32 = vand.u32 2147483647, %v4095_v63 }
 0x351   : > { %v1341_v3 = vadd.f32 %v1340_v43, %v3967_v37  ;;  %v4110_v20 = vmul.f32 %v1771_v59, %v1596_v7  ;;  %v1332_v37 = vadd.f32 %v3982_v51, %v1219_v31  ;;  %v1855_v51 = vrot.slane %v1854_v30, 4 }
 0x352   : > { %v1837_v4 = vadd.f32 %v1836_v40, %v1835_v21  ;;  %vm1603_vm15 = vweird.f32 %v4095_v63  ;;  %v1824_v43 = vrot.slane %v1823_v57, 1  ;;  %v1610_v59 = vor.u32 1.1754944e-38, %v1609_v44 }
 0x353   : > { %v1414_v46 = vadd.f32 %v3854_v58, %v1341_v3  ;;  %v1809_v18 = vmul.f32 %v3973_v10, %v4110_v20  ;;  %v1411_v41 = vadd.f32 %v3873_v23, %v1332_v37  ;;  %vm1608_vm1 = vcmp.eq.f32.partialorder %v1607_v32, 8.507059e+37  ;;  %v4143_v37 = vpop.f32.mrf.mxu1 }
 0x354   : > { %v1825_v29 = vadd.f32 %v1824_v43, %v1823_v57  ;;  %v1413_v57 = vadd.f32 %v3873_v23, %v4078_v35  ;;  %vm2116_vm12 = vcmask 1046534  }
 0x355   : > { %v3062_v27 = vmul.f32 -1.442695, %v1414_v46  ;;  %v1861_v6 = vsel %vm771_vm7, %v1809_v18, 0.0  ;;  %v1756_v31 = vmul.f32 0.01, %v1411_v41  ;;  %vm1740_vm14 = vcmp.ge.f32.partialorder %v1411_v41, 0.0  ;;  %v4138_v18 = vpop.f32.mrf.mxu0 }
 0x356   : > { %v3257_v25 = vpop.eup %3256  ;;  %v1862_v56 = vrot.slane %v1861_v6, 4  ;;  %vm1741_vm8 = vcmp.ge.f32.partialorder %v1413_v57, 0.0 }
 0x357   : > { %3258 = vpow2.f32 %v3062_v27  ;;  %v1599_v39 = vmul.f32 %v3257_v25, %v4095_v63  ;;  %vm1604_vm13 = vweird.f32 %v3257_v25  ;;  %v1772_v46 = vsel %vm1740_vm14, %v1411_v41, %v1756_v31 }
 0x358   : > { %v1343_v45 = vpop.f32.mrf.mxu2  ;;  %vm1605_vm0 = vmor %vm1603_vm15, %vm1604_vm13  ;;  %v1863_v9 = vadd.f32 %v1862_v56, %v1861_v6  ;;  %v1838_v63 = vrot.slane %v1837_v4, 1  ;;  %v1832_v27 = vadd.f32 %v1831_v12, %v1830_v60  ;;  %v1845_v6 = vrot.slane %v1844_v50, 1 }
 0x359   : > { %v4127_v26 = vadd.f32 %v1343_v45, %v3990_v28  ;;  %v1600_v8 = vsub.f32 1.0, %v1599_v39  ;;  %v1856_v28 = vadd.f32 %v1855_v51, %v1854_v30  ;;  %vm2118_vm14 = vcmask 1047559  }
 0x35a   : > { %v1864_v24 = vrot.slane %v1863_v9, 2  ;;  %v1839_v39 = vadd.f32 %v1838_v63, %v1837_v4  ;;  %v2107_v33 = vsel %vm2106_vm2, %v1832_v27, %v1825_v29  ;;  %v1846_v56 = vadd.f32 %v1845_v6, %v1844_v50 }
 0x35b   : > { %v1601_v61 = vmul.f32 %v3257_v25, %v1600_v8  ;;  %v1857_v21 = vrot.slane %v1856_v28, 2  ;;  %v1248_v31 = vpop.f32.mrf.mxu1 }
 0x35c   : > { %v1865_v45 = vadd.f32 %v1864_v24, %v1863_v9  ;;  %v2109_v36 = vsel %vm2108_vm3, %v1839_v39, %v2107_v33  ;;  %v1757_v9 = vmul.f32 0.01, %v1413_v57 }
 0x35d   : > { %v3259_v1 = vpop.eup %3258  ;;  %v1602_v2 = vadd.f32 %v3257_v25, %v1601_v61  ;;  %v1858_v48 = vadd.f32 %v1857_v21, %v1856_v28 }
 0x35e   : > { %v4134_v7 = vadd.f32 1.0, %v3259_v1  ;;  %v1866_v1 = vrot.slane %v1865_v45, 1 }
 0x35f   : > { %v1606_v3 = vsel %vm1605_vm0, %v3257_v25, %v1602_v2  ;;  %v1851_v25 = vadd.f32 %v1850_v15, %v1849_v38  ;;  %v1135_v38 = vpop.f32.mrf.mxu0  ;;  %v1859_v4 = vrot.slane %v1858_v48, 1  ;;  %v2111_v15 = vsel %vm2110_vm4, %v1846_v56, %v2109_v36 }
 0x360   : > { %3260 = vrcp.f32 %v4134_v7  ;;  %v1346_v5 = vpop.f32.mrf.mxu2  ;;  %v1611_v42 = vsel %vm1608_vm1, %v1610_v59, %v1606_v3  ;;  %v4157_v2 = vadd.f32 %v1248_v31, %v1135_v38  ;;  %v1624_v35 = vand.u32 2147483648, %v4134_v7 }
 0x361   : > { %v1347_v47 = vadd.f32 %v1346_v5, %v4038_v19  ;;  %v4141_v22 = vmul.f32 %v1772_v46, %v1611_v42  ;;  %v1852_v8 = vrot.slane %v1851_v25, 1  ;;  %v1622_v12 = vand.u32 2147483647, %v4134_v7 }
 0x362   : > { %vm1618_vm9 = vweird.f32 %v4134_v7  ;;  %v1860_v5 = vadd.f32 %v1859_v4, %v1858_v48  ;;  %v1867_v46 = vadd.f32 %v1866_v1, %v1865_v45 }
 0x363   : > { %v1416_v52 = vadd.f32 %v3854_v58, %v1347_v47  ;;  %v1810_v30 = vmul.f32 %v3973_v10, %v4141_v22  ;;  %v1853_v59 = vadd.f32 %v1852_v8, %v1851_v25  ;;  %v1625_v47 = vor.u32 1.1754944e-38, %v1624_v35  ;;  %v1251_v31 = vpop.f32.mrf.mxu1 }
 0x364   : > { %vm1623_vm13 = vcmp.eq.f32.partialorder %v1622_v12, 8.507059e+37  ;;  %v1773_v25 = vsel %vm1741_vm8, %v1413_v57, %v1757_v9 }
 0x365   : > { %v3063_v40 = vmul.f32 -1.442695, %v1416_v52  ;;  %v1868_v19 = vsel %vm771_vm7, %v1810_v30, 0.0  ;;  %v2113_v24 = vsel %vm2112_vm5, %v1853_v59, %v2111_v15 }
 0x366   : > { %v3261_v41 = vpop.eup %3260  ;;  %v1869_v53 = vrot.slane %v1868_v19, 4  ;;  %v2115_v29 = vsel %vm2114_vm11, %v1860_v5, %v2113_v24 }
 0x367   : > { %3262 = vpow2.f32 %v3063_v40  ;;  %v1614_v51 = vmul.f32 %v3261_v41, %v4134_v7  ;;  %vm1619_vm6 = vweird.f32 %v3261_v41  ;;  %v2117_v39 = vsel %vm2116_vm12, %v1867_v46, %v2115_v29 }
 0x368   : > { %v1349_v60 = vpop.f32.mrf.mxu2  ;;  %v1870_v44 = vadd.f32 %v1869_v53, %v1868_v19  ;;  %vm1620_vm10 = vmor %vm1618_vm9, %vm1619_vm6 }
 0x369   : > { %v4154_v61 = vadd.f32 %v1349_v60, %v4084_v54  ;;  %v1615_v32 = vsub.f32 1.0, %v1614_v51 }
 0x36a   : > { %v1871_v28 = vrot.slane %v1870_v44, 2 }
 0x36b   : > { %v1616_v43 = vmul.f32 %v3261_v41, %v1615_v32  ;;  %v1138_v32 = vpop.f32.mrf.mxu0  ;;  %v1417_v12 = vadd.f32 %v3873_v23, %v4154_v61  ;;  %v4183_v15 = vpop.f32.mrf.mxu1  ;;  %v1246_v61 = vadd.f32 %v4143_v37, %v4138_v18 }
 0x36c   : > { %v1872_v54 = vadd.f32 %v1871_v28, %v1870_v44 }
 0x36d   : > { %v3263_v3 = vpop.eup %3262  ;;  %v1617_v50 = vadd.f32 %v3261_v41, %v1616_v43 }
 0x36e   : > { %v1486_v42 = vadd.f32 1.0, %v3263_v3  ;;  %v1873_v63 = vrot.slane %v1872_v54, 1 }
 0x36f   : > { %v1621_v21 = vsel %vm1620_vm10, %v3261_v41, %v1617_v50  ;;  %vm1743_vm10 = vcmp.ge.f32.partialorder %v1417_v12, 0.0 }
 0x370   : > { %3264 = vrcp.f32 %v1486_v42  ;;  %v1352_v27 = vpop.f32.mrf.mxu2  ;;  %v1626_v7 = vsel %vm1623_vm13, %v1625_v47, %v1621_v21  ;;  %v1874_v30 = vadd.f32 %v1873_v63, %v1872_v54  ;;  %v1639_v33 = vand.u32 2147483648, %v1486_v42 }
 0x371   : > { %v1353_v52 = vadd.f32 %v1352_v27, %v4115_v16  ;;  %v4167_v6 = vmul.f32 %v1773_v25, %v1626_v7  ;;  %v1415_v16 = vadd.f32 %v3873_v23, %v4127_v26  ;;  %v1637_v60 = vand.u32 2147483647, %v1486_v42 }
 0x372   : > { %v2119_v48 = vsel %vm2118_vm14, %v1874_v30, %v2117_v39  ;;  %vm1633_vm1 = vweird.f32 %v1486_v42  ;;  %v1640_v4 = vor.u32 1.1754944e-38, %v1639_v33  ;;  %v1759_v63 = vmul.f32 0.01, %v1417_v12 }
 0x373   : > { %v1418_v40 = vadd.f32 %v3854_v58, %v1353_v52  ;;  %2129 = vxpose.xlu2.b32.start [1/2] (short) (narrow) %v2119_v48, 16  ;;  %v1758_v56 = vmul.f32 0.01, %v1415_v16  ;;  %vm1742_vm0 = vcmp.ge.f32.partialorder %v1415_v16, 0.0  ;;  %vm1638_vm8 = vcmp.eq.f32.partialorder %v1637_v60, 8.507059e+37  ;;  %v4179_v9 = vpop.f32.mrf.mxu0  ;;  %v1257_v29 = vpop.f32.mrf.mxu1 }
 0x374   : > { %v1252_v27 = vadd.f32 %v1251_v31, %v1138_v32  ;;  %v1775_v52 = vsel %vm1743_vm10, %v1417_v12, %v1759_v63 }
 0x375   : > { %v3064_v19 = vmul.f32 -1.442695, %v1418_v40  ;;  %v1774_v1 = vsel %vm1742_vm0, %v1415_v16, %v1758_v56 }
 0x376   : > { %v3265_v41 = vpop.eup %3264 }
 0x377   : > { %v1629_v45 = vmul.f32 %v3265_v41, %v1486_v42  ;;  %3266 = vpow2.f32 %v3064_v19  ;;  %vm1634_vm15 = vweird.f32 %v3265_v41 }
 0x378   : > { %v1355_v53 = vpop.f32.mrf.mxu2  ;;  %vm1635_vm6 = vmor %vm1633_vm1, %vm1634_vm15 }
 0x379   : > { %v1630_v51 = vsub.f32 1.0, %v1629_v45  ;;  %v4175_v8 = vadd.f32 %v1355_v53, %v4130_v49 }
 0x37b   : > { %v1631_v57 = vmul.f32 %v3265_v41, %v1630_v51  ;;  %v1144_v30 = vpop.f32.mrf.mxu0  ;;  %v1260_v37 = vpop.f32.mrf.mxu1 }
 0x37c   : > { %v1258_v53 = vadd.f32 %v1257_v29, %v1144_v30 }
 0x37d   : > { %v3267_v44 = vpop.eup %3266  ;;  %v1632_v38 = vadd.f32 %v3265_v41, %v1631_v57 }
 0x37e   : > { %v1487_v36 = vadd.f32 1.0, %v3267_v44 }
 0x37f   : > { %v1636_v26 = vsel %vm1635_vm6, %v3265_v41, %v1632_v38 }
 0x380   : > { %v1641_v28 = vsel %vm1638_vm8, %v1640_v4, %v1636_v26  ;;  %3268 = vrcp.f32 %v1487_v36  ;;  %v1358_v49 = vpop.f32.mrf.mxu2  ;;  %v1654_v5 = vand.u32 2147483648, %v1487_v36  ;;  %v1652_v46 = vand.u32 2147483647, %v1487_v36 }
 0x381   : > { %v4177_v43 = vmul.f32 %v1774_v1, %v1641_v28  ;;  %vm1648_vm13 = vweird.f32 %v1487_v36  ;;  %v1359_v39 = vadd.f32 %v1358_v49, %v1246_v61 }
 0x382   : > { %v1655_v47 = vor.u32 1.1754944e-38, %v1654_v5  ;;  %vm1653_vm0 = vcmp.eq.f32.partialorder %v1652_v46, 8.507059e+37 }
 0x383   : > { %v1420_v48 = vadd.f32 %v3854_v58, %v1359_v39  ;;  %v1147_v16 = vpop.f32.mrf.mxu0  ;;  %v1263_v32 = vpop.f32.mrf.mxu1 }
 0x385   : > { %v3065_v45 = vmul.f32 -1.442695, %v1420_v48 }
 0x386   : > { %v3269_v35 = vpop.eup %3268 }
 0x387   : > { %v1644_v59 = vmul.f32 %v3269_v35, %v1487_v36  ;;  %vm1649_vm9 = vweird.f32 %v3269_v35  ;;  %3270 = vpow2.f32 %v3065_v45 }
 0x388   : > { %v1361_v54 = vpop.f32.mrf.mxu2  ;;  %vm1650_vm15 = vmor %vm1648_vm13, %vm1649_vm9 }
 0x389   : > { %v4186_v3 = vadd.f32 %v1361_v54, %v4157_v2  ;;  %v1645_v50 = vsub.f32 1.0, %v1644_v59 }
 0x38b   : > { %v1646_v42 = vmul.f32 %v3269_v35, %v1645_v50  ;;  %v1150_v44 = vpop.f32.mrf.mxu0  ;;  %v4206_v59 = vpop.f32.mrf.mxu1 }
 0x38c   : > { %v1264_v1 = vadd.f32 %v1263_v32, %v1150_v44 }
 0x38d   : > { %v1647_v21 = vadd.f32 %v3269_v35, %v1646_v42  ;;  %v3271_v60 = vpop.eup %3270 }
 0x38e   : > { %v4195_v4 = vadd.f32 1.0, %v3271_v60 }
 0x38f   : > { %v1651_v24 = vsel %vm1650_vm15, %v3269_v35, %v1647_v21 }
 0x390   : > { %v1364_v25 = vpop.f32.mrf.mxu2  ;;  %v1656_v2 = vsel %vm1653_vm0, %v1655_v47, %v1651_v24  ;;  %v1419_v47 = vadd.f32 %v3873_v23, %v4175_v8  ;;  %vm1663_vm8 = vweird.f32 %v4195_v4 }
 0x391   : > { %v4190_v7 = vmul.f32 %v1775_v52, %v1656_v2  ;;  %v1365_v40 = vadd.f32 %v1364_v25, %v1252_v27  ;;  %v1255_v25 = vadd.f32 %v4183_v15, %v4179_v9  ;;  %v1261_v9 = vadd.f32 %v1260_v37, %v1147_v16 }
 0x392   : > { %v1760_v29 = vmul.f32 0.01, %v1419_v47  ;;  %vm1744_vm1 = vcmp.ge.f32.partialorder %v1419_v47, 0.0  ;;  %v1669_v16 = vand.u32 2147483648, %v4195_v4 }
 0x393   : > { %v1422_v19 = vadd.f32 %v3854_v58, %v1365_v40  ;;  %v4203_v49 = vpop.f32.mrf.mxu0  ;;  %v1269_v30 = vpop.f32.mrf.mxu1  ;;  %v1421_v40 = vadd.f32 %v3873_v23, %v4186_v3 }
 0x395   : > { %v3066_v18 = vmul.f32 -1.442695, %v1422_v19  ;;  %vm1745_vm6 = vcmp.ge.f32.partialorder %v1421_v40, 0.0 }
 0x397   : > { %3272 = vpow2.f32 %v3066_v18 }
 0x398   : > { %v1367_v41 = vpop.f32.mrf.mxu2 }
 0x399   : > { %v1368_v45 = vadd.f32 %v1367_v41, %v1255_v25  ;;  %v1667_v41 = vand.u32 2147483647, %v4195_v4 }
 0x39b   : > { %v1156_v52 = vpop.f32.mrf.mxu0 }
 0x39c   : > { %v1270_v19 = vadd.f32 %v1269_v30, %v1156_v52  ;;  %v1812_v30 = vmul.f32 %v3973_v10, %v4177_v43 }
 0x39d   : > { %v3273_v38 = vpop.eup %3272 }
 0x39e   : > { %v4197_v31 = vadd.f32 1.0, %v3273_v38 }
 0x3a0   : > { %v1370_v51 = vpop.f32.mrf.mxu2  ;;  %v1684_v44 = vand.u32 2147483648, %v4197_v31  ;;  %vm1678_vm0 = vweird.f32 %v4197_v31 }
 0x3a1   : > { %v1371_v33 = vadd.f32 %v1370_v51, %v1258_v53  ;;  %v1776_v51 = vsel %vm1744_vm1, %v1419_v47, %v1760_v29 }
 0x3a2   : > { %v1685_v47 = vor.u32 1.1754944e-38, %v1684_v44 }
 0x3a3   : > { %v1424_v57 = vadd.f32 %v3854_v58, %v1371_v33  ;;  %v1761_v33 = vmul.f32 0.01, %v1421_v40 }
 0x3a5   : > { %v3067_v56 = vmul.f32 -1.442695, %v1424_v57  ;;  %v1777_v29 = vsel %vm1745_vm6, %v1421_v40, %v1761_v33 }
 0x3a7   : > { %3274 = vpow2.f32 %v3067_v56  ;;  %v1423_v56 = vadd.f32 %v3873_v23, %v1368_v45  ;;  %v1813_v45 = vmul.f32 %v3973_v10, %v4190_v7 }
 0x3a8   : > { %v1373_v36 = vpop.f32.mrf.mxu2  ;;  %3276 = vrcp.f32 %v4195_v4 }
 0x3a9   : > { %3278 = vrcp.f32 %v4197_v31 }
 0x3ad   : > { %v3275_v26 = vpop.eup %3274 }
 0x3ae   : > { %v4201_v28 = vadd.f32 1.0, %v3275_v26  ;;  %v4208_v54 = vpop.eup %3276 }
 0x3af   : > { %v4210_v50 = vpop.eup %3278  ;;  %v1659_v42 = vmul.f32 %v4208_v54, %v4195_v4  ;;  %vm1664_vm9 = vweird.f32 %v4208_v54 }
 0x3b0   : > { %3280 = vrcp.f32 %v4201_v28  ;;  %v1376_v35 = vpop.f32.mrf.mxu2  ;;  %v1674_v21 = vmul.f32 %v4210_v50, %v4197_v31  ;;  %vm1679_vm10 = vweird.f32 %v4210_v50  ;;  %vm4249_vm15 = vmor %vm1663_vm8, %vm1664_vm9  ;;  %vm1693_vm8 = vweird.f32 %v4201_v28 }
 0x3b1   : > { %v1377_v12 = vadd.f32 %v1376_v35, %v1264_v1  ;;  %v1660_v27 = vsub.f32 1.0, %v1659_v42  ;;  %v1374_v1 = vadd.f32 %v1373_v36, %v1261_v9  ;;  %v1682_v35 = vand.u32 2147483647, %v4197_v31  ;;  %vm4259_vm1 = vmor %vm1678_vm0, %vm1679_vm10 }
 0x3b2   : > { %v1675_v2 = vsub.f32 1.0, %v1674_v21  ;;  %v1697_v42 = vand.u32 2147483647, %v4201_v28  ;;  %vm1668_vm9 = vcmp.eq.f32.partialorder %v1667_v41, 8.507059e+37  ;;  %v1670_v21 = vor.u32 1.1754944e-38, %v1669_v16 }
 0x3b3   : > { %v1426_v5 = vadd.f32 %v3854_v58, %v1377_v12  ;;  %v1661_v48 = vmul.f32 %v4208_v54, %v1660_v27  ;;  %v1699_v12 = vand.u32 2147483648, %v4201_v28  ;;  %v1425_v25 = vadd.f32 %v3873_v23, %v1374_v1 }
 0x3b4   : > { %v1676_v53 = vmul.f32 %v4210_v50, %v1675_v2  ;;  %vm1683_vm10 = vcmp.eq.f32.partialorder %v1682_v35, 8.507059e+37  ;;  %vm1746_vm0 = vcmp.ge.f32.partialorder %v1423_v56, 0.0  ;;  %v1267_v16 = vadd.f32 %v4206_v59, %v4203_v49 }
 0x3b5   : > { %v3068_v46 = vmul.f32 -1.442695, %v1426_v5  ;;  %v1662_v57 = vadd.f32 %v4208_v54, %v1661_v48  ;;  %v1700_v2 = vor.u32 1.1754944e-38, %v1699_v12  ;;  %v1882_v1 = vsel %vm771_vm7, %v1812_v30, 0.0  ;;  %v2162_v12 = vld [vmem:[%s4775_s6 + $0x8] sm:$0xff] }
 0x3b6   : > { %v4215_v63 = vpop.eup %3280  ;;  %v1677_v37 = vadd.f32 %v4210_v50, %v1676_v53  ;;  %v1763_v53 = vmul.f32 0.01, %v1425_v25  ;;  %2183 = vmatpush.msrb.mxu3 %v2162_v12 }
 0x3b7   : > { %3282 = vpow2.f32 %v3068_v46  ;;  %v1689_v61 = vmul.f32 %v4215_v63, %v4201_v28  ;;  %vm1694_vm13 = vweird.f32 %v4215_v63  ;;  %v1762_v46 = vmul.f32 0.01, %v1423_v56 }
 0x3b8   : > { %v4223_v24 = vpop.f32.mrf.mxu2  ;;  %v1681_v31 = vsel %vm4259_vm1, %v4210_v50, %v1677_v37  ;;  %vm1698_vm1 = vcmp.eq.f32.partialorder %v1697_v42, 8.507059e+37  ;;  %v1883_v42 = vrot.slane %v1882_v1, 4 }
 0x3b9   : > { %v1690_v39 = vsub.f32 1.0, %v1689_v61  ;;  %v1686_v50 = vsel %vm1683_vm10, %v1685_v47, %v1681_v31 }
 0x3ba   : > { %v4288_v9 = vmul.f32 %v1777_v29, %v1686_v50 }
 0x3bb   : > { %v1691_v15 = vmul.f32 %v4215_v63, %v1690_v39 }
 0x3bc   : > { %v1815_v37 = vmul.f32 %v3973_v10, %v4288_v9 }
 0x3bd   : > { %v3283_v8 = vpop.eup %3282  ;;  %v1692_v32 = vadd.f32 %v4215_v63, %v1691_v15  ;;  %v1778_v15 = vsel %vm1746_vm0, %v1423_v56, %v1762_v46 }
 0x3be   : > { %v4230_v18 = vadd.f32 1.0, %v3283_v8  ;;  %v1903_v5 = vsel %vm771_vm7, %v1815_v37, 0.0 }
 0x3bf   : > { %v1904_v47 = vrot.slane %v1903_v5, 4 }
 0x3c0   : > { %3284 = vrcp.f32 %v4230_v18  ;;  %v1382_v3 = vpop.f32.mrf.mxu2  ;;  %v1714_v8 = vand.u32 2147483648, %v4230_v18  ;;  %vm1708_vm6 = vweird.f32 %v4230_v18 }
 0x3c1   : > { %v1383_v60 = vadd.f32 %v1382_v3, %v1270_v19  ;;  %v1712_v19 = vand.u32 2147483647, %v4230_v18 }
 0x3c2   : > { %v1715_v41 = vor.u32 1.1754944e-38, %v1714_v8 }
 0x3c3   : > { %v1428_v38 = vadd.f32 %v3854_v58, %v1383_v60  ;;  %v1666_v58 = vsel %vm4249_vm15, %v4208_v54, %v1662_v57  ;;  %vm4270_vm15 = vmor %vm1693_vm8, %vm1694_vm13  ;;  %vm1747_vm8 = vcmp.ge.f32.partialorder %v1425_v25, 0.0 }
 0x3c4   : > { %v1696_v28 = vsel %vm4270_vm15, %v4215_v63, %v1692_v32  ;;  %v1671_v27 = vsel %vm1668_vm9, %v1670_v21, %v1666_v58  ;;  %vm1713_vm15 = vcmp.eq.f32.partialorder %v1712_v19, 8.507059e+37 }
 0x3c5   : > { %v3069_v4 = vmul.f32 -1.442695, %v1428_v38  ;;  %v1701_v39 = vsel %vm1698_vm1, %v1700_v2, %v1696_v28  ;;  %v4283_v63 = vmul.f32 %v1776_v51, %v1671_v27  ;;  %v1811_v51 = vmul.f32 %v3973_v10, %v4167_v6 }
 0x3c6   : > { %v3285_v36 = vpop.eup %3284  ;;  %v4290_v57 = vmul.f32 %v1778_v15, %v1701_v39  ;;  %v1889_v38 = vsel %vm771_vm7, %v1813_v45, 0.0  ;;  %v1884_v2 = vadd.f32 %v1883_v42, %v1882_v1  ;;  %v1905_v39 = vadd.f32 %v1904_v47, %v1903_v5 }
 0x3c7   : > { %3286 = vpow2.f32 %v3069_v4  ;;  %v1704_v61 = vmul.f32 %v3285_v36, %v4230_v18  ;;  %vm1709_vm13 = vweird.f32 %v3285_v36  ;;  %v1814_v60 = vmul.f32 %v3973_v10, %v4283_v63 }
 0x3c8   : > { %vm1710_vm9 = vmor %vm1708_vm6, %vm1709_vm13  ;;  %v1779_v18 = vsel %vm1747_vm8, %v1425_v25, %v1763_v53  ;;  %v1816_v32 = vmul.f32 %v3973_v10, %v4290_v57  ;;  %v1875_v35 = vsel %vm771_vm7, %v1811_v51, 0.0  ;;  %v1890_v58 = vrot.slane %v1889_v38, 4 }
 0x3c9   : > { %v1705_v52 = vsub.f32 1.0, %v1704_v61  ;;  %v1896_v49 = vsel %vm771_vm7, %v1814_v60, 0.0  ;;  %v1380_v4 = vadd.f32 %v4223_v24, %v1267_v16  ;;  %v1876_v21 = vrot.slane %v1875_v35, 4 }
 0x3ca   : > { %v1897_v31 = vrot.slane %v1896_v49, 4  ;;  %v1891_v61 = vadd.f32 %v1890_v58, %v1889_v38  ;;  %v1885_v15 = vrot.slane %v1884_v2, 2  ;;  %v1906_v60 = vrot.slane %v1905_v39, 2 }
 0x3cb   : > { %v1706_v48 = vmul.f32 %v3285_v36, %v1705_v52  ;;  %v1427_v27 = vadd.f32 %v3873_v23, %v1380_v4  ;;  %v1877_v30 = vadd.f32 %v1876_v21, %v1875_v35 }
 0x3cc   : > { %v1898_v24 = vadd.f32 %v1897_v31, %v1896_v49  ;;  %v1892_v19 = vrot.slane %v1891_v61, 2 }
 0x3cd   : > { %v3287_v3 = vpop.eup %3286  ;;  %v1707_v40 = vadd.f32 %v3285_v36, %v1706_v48  ;;  %v1764_v45 = vmul.f32 0.01, %v1427_v27  ;;  %vm1748_vm0 = vcmp.ge.f32.partialorder %v1427_v27, 0.0  ;;  %v1878_v23 = vrot.slane %v1877_v30, 2 }
 0x3ce   : > { %v1492_v33 = vadd.f32 1.0, %v3287_v3  ;;  %v1899_v51 = vrot.slane %v1898_v24, 2  ;;  %v1893_v38 = vadd.f32 %v1892_v19, %v1891_v61 }
 0x3cf   : > { %v1711_v56 = vsel %vm1710_vm9, %v3285_v36, %v1707_v40  ;;  %v1910_v36 = vsel %vm771_vm7, %v1816_v32, 0.0  ;;  %v1879_v35 = vadd.f32 %v1878_v23, %v1877_v30  ;;  %v3223_v23 = vld [vmem:[%s4774_s5 + $0x9] ss:$0 sm:$0xff] }
 0x3d0   : > { %3288 = vrcp.f32 %v1492_v33  ;;  %v1716_v44 = vsel %vm1713_vm15, %v1715_v41, %v1711_v56  ;;  %v1911_v25 = vrot.slane %v1910_v36, 4  ;;  %v1729_v29 = vand.u32 2147483648, %v1492_v33 }
 0x3d1   : > { %v4304_v26 = vmul.f32 %v1779_v18, %v1716_v44  ;;  %v1727_v48 = vand.u32 2147483647, %v1492_v33  ;;  %vm1723_vm1 = vweird.f32 %v1492_v33  ;;  %v1780_v44 = vsel %vm1748_vm0, %v1427_v27, %v1764_v45 }
 0x3d2   : > { %v1912_v53 = vadd.f32 %v1911_v25, %v1910_v36  ;;  %v1730_v41 = vor.u32 1.1754944e-38, %v1729_v29  ;;  %v1886_v18 = vadd.f32 %v1885_v15, %v1884_v2  ;;  %v1900_v49 = vadd.f32 %v1899_v51, %v1898_v24 }
 0x3d3   : > { %v1817_v59 = vmul.f32 %v3973_v10, %v4304_v26  ;;  %vm1728_vm8 = vcmp.eq.f32.partialorder %v1727_v48, 8.507059e+37  ;;  %v1894_v5 = vrot.slane %v1893_v38, 1  ;;  %v1880_v36 = vrot.slane %v1879_v35, 1 }
 0x3d4   : > { %v1913_v56 = vrot.slane %v1912_v53, 2  ;;  %v1887_v12 = vrot.slane %v1886_v18, 1 }
 0x3d5   : > { %v1917_v54 = vsel %vm771_vm7, %v1817_v59, 0.0  ;;  %v1907_v59 = vadd.f32 %v1906_v60, %v1905_v39  ;;  %v1895_v61 = vadd.f32 %v1894_v5, %v1893_v38  ;;  %v1881_v25 = vadd.f32 %v1880_v36, %v1879_v35 }
 0x3d6   : > { %v3289_v46 = vpop.eup %3288  ;;  %v1918_v50 = vrot.slane %v1917_v54, 4  ;;  %v1914_v58 = vadd.f32 %v1913_v56, %v1912_v53 }
 0x3d7   : > { %v1719_v28 = vmul.f32 %v3289_v46, %v1492_v33  ;;  %vm1724_vm10 = vweird.f32 %v3289_v46  ;;  %v1908_v31 = vrot.slane %v1907_v59, 1 }
 0x3d8   : > { %v1919_v3 = vadd.f32 %v1918_v50, %v1917_v54  ;;  %vm1725_vm13 = vmor %vm1723_vm1, %vm1724_vm10  ;;  %v1888_v54 = vadd.f32 %v1887_v12, %v1886_v18  ;;  %v1915_v47 = vrot.slane %v1914_v58, 1 }
 0x3d9   : > { %v1720_v52 = vsub.f32 1.0, %v1719_v28 }
 0x3da   : > { %v1920_v1 = vrot.slane %v1919_v3, 2  ;;  %v2120_v24 = vsel %vm2106_vm2, %v1888_v54, %v1881_v25  ;;  %vm2194_vm2 = vcmask 64512  }
 0x3db   : > { %v1721_v8 = vmul.f32 %v3289_v46, %v1720_v52  ;;  %v1909_v52 = vadd.f32 %v1908_v31, %v1907_v59  ;;  %v2121_v39 = vsel %vm2108_vm3, %v1895_v61, %v2120_v24 }
 0x3dc   : > { %v1921_v42 = vadd.f32 %v1920_v1, %v1919_v3 }
 0x3dd   : > { %v1722_v40 = vadd.f32 %v3289_v46, %v1721_v8 }
 0x3de   : > { %v1922_v27 = vrot.slane %v1921_v42, 1 }
 0x3df   : > { %v1726_v16 = vsel %vm1725_vm13, %v3289_v46, %v1722_v40  ;;  %v1901_v46 = vrot.slane %v1900_v49, 1  ;;  %v2161_v40 = vld [vmem:[%s4775_s6] sm:$0xff] }
 0x3e0   : > { %v1731_v37 = vsel %vm1728_vm8, %v1730_v41, %v1726_v16  ;;  %v1923_v29 = vadd.f32 %v1922_v27, %v1921_v42  ;;  %2184 = vmatpush.msrb.mxu3 %v2161_v40  ;;  %v1981_v41 = vpop.permute.xlu1 %1980  ;;  %v1985_v16 = vpop.permute.xlu0 %1984 }
 0x3e1   : > { %v4319_v32 = vmul.f32 %v1780_v44, %v1731_v37  ;;  %v1902_v2 = vadd.f32 %v1901_v46, %v1900_v49  ;;  %v2044_v1 = vmul.f32 %v1985_v16, %v3904_v34  ;;  %v2043_v35 = vmul.f32 %v1981_v41, %v3888_v55 }
 0x3e3   : > { %v1818_v33 = vmul.f32 %v3973_v10, %v4319_v32  ;;  %v1916_v10 = vadd.f32 %v1915_v47, %v1914_v58  ;;  %v2122_v48 = vsel %vm2110_vm4, %v1902_v2, %v2121_v39  ;;  %v2059_v5 = vsel %vm771_vm7, %v2043_v35, 0.0 }
 0x3e4   : > { %v2123_v19 = vsel %vm2112_vm5, %v1909_v52, %v2122_v48 }
 0x3e5   : > { %v1924_v4 = vsel %vm771_vm7, %v1818_v33, 0.0  ;;  %v2124_v53 = vsel %vm2114_vm11, %v1916_v10, %v2123_v19  ;;  %v2060_v33 = vsel %vm771_vm7, %v2044_v1, 0.0 }
 0x3e6   : > { %v1925_v21 = vrot.slane %v1924_v4, 4  ;;  %v2125_v15 = vsel %vm2116_vm12, %v1923_v29, %v2124_v53  ;;  %v2061_v36 = vadd.f32 %v2060_v33, %v2059_v5 }
 0x3e8   : > { %v1926_v28 = vadd.f32 %v1925_v21, %v1924_v4  ;;  %v1989_v56 = vpop.permute.xlu1 %1988  ;;  %v1993_v37 = vpop.permute.xlu0 %1992 }
 0x3e9   : > { %v2045_v49 = vmul.f32 %v1989_v56, %v3924_v11  ;;  %v2046_v12 = vmul.f32 %v1993_v37, %v4071_v14 }
 0x3ea   : > { %v1927_v50 = vrot.slane %v1926_v28, 2 }
 0x3eb   : > { %v2062_v4 = vsel %vm771_vm7, %v2045_v49, 0.0  ;;  %v2064_v46 = vsel %vm771_vm7, %v2046_v12, 0.0 }
 0x3ec   : > { %v1928_v30 = vadd.f32 %v1927_v50, %v1926_v28  ;;  %v2063_v31 = vadd.f32 %v2062_v4, %v2061_v36 }
 0x3ee   : > { %v1929_v8 = vrot.slane %v1928_v30, 1  ;;  %v2065_v28 = vadd.f32 %v2064_v46, %v2063_v31 }
 0x3f0   : > { %v1930_v45 = vadd.f32 %v1929_v8, %v1928_v30  ;;  %v1997_v44 = vpop.permute.xlu1 %1996  ;;  %v2001_v18 = vpop.permute.xlu0 %2000 }
 0x3f1   : > { %v2047_v42 = vmul.f32 %v1997_v44, %v4088_v62  ;;  %v2048_v21 = vmul.f32 %v2001_v18, %v4097_v0 }
 0x3f2   : > { %v2126_v3 = vsel %vm2118_vm14, %v1930_v45, %v2125_v15 }
 0x3f3   : > { %2130 = vxpose.xlu2.b32.end [2/2] (short) (narrow) %v2126_v3, 16  ;;  %v2066_v54 = vsel %vm771_vm7, %v2047_v42, 0.0  ;;  %v2068_v27 = vsel %vm771_vm7, %v2048_v21, 0.0  ;;  %v2192_v21 = vld [vmem:[%s4776_s7] sm:$0xff] }
 0x3f4   : > { %v2067_v2 = vadd.f32 %v2066_v54, %v2065_v28  ;;  %v2193_v28 = vld [vmem:[%s4776_s7 + $0x8] sm:$0xff] }
 0x3f6   : > { %v2069_v30 = vadd.f32 %v2068_v27, %v2067_v2 }
 0x3f8   : > { %v2005_v38 = vpop.permute.xlu1 %2004  ;;  %v2009_v59 = vpop.permute.xlu0 %2008 }
 0x3f9   : > { %v2049_v47 = vmul.f32 %v2005_v38, %v4110_v20  ;;  %v2050_v25 = vmul.f32 %v2009_v59, %v4141_v22 }
 0x3fb   : > { %v2070_v52 = vsel %vm771_vm7, %v2049_v47, 0.0  ;;  %v2072_v24 = vsel %vm771_vm7, %v2050_v25, 0.0 }
 0x3fc   : > { %v2071_v29 = vadd.f32 %v2070_v52, %v2069_v30 }
 0x3fe   : > { %v2073_v8 = vadd.f32 %v2072_v24, %v2071_v29 }
 0x400   : > { %v2013_v58 = vpop.permute.xlu1 %2012  ;;  %v2021_v61 = vpop.permute.xlu0 %2020 }
 0x401   : > { %v2051_v10 = vmul.f32 %v2013_v58, %v4167_v6  ;;  %v2053_v45 = vmul.f32 %v2021_v61, %v4190_v7 }
 0x403   : > { %v2074_v39 = vsel %vm771_vm7, %v2051_v10, 0.0  ;;  %v2078_v41 = vsel %vm771_vm7, %v2053_v45, 0.0 }
 0x404   : > { %v2075_v15 = vadd.f32 %v2074_v39, %v2073_v8 }
 0x408   : > { %v2025_v50 = vpop.permute.xlu1 %2024  ;;  %v2029_v48 = vpop.permute.xlu0 %2028 }
 0x409   : > { %v2054_v40 = vmul.f32 %v2025_v50, %v4283_v63 }
 0x40b   : > { %v2080_v56 = vsel %vm771_vm7, %v2054_v40, 0.0 }
 0x410   : > { %v2033_v3 = vpop.permute.xlu1 %2032  ;;  %v2037_v44 = vpop.permute.xlu0 %2036 }
 0x411   : > { %v2056_v37 = vmul.f32 %v2033_v3, %v4290_v57  ;;  %v2057_v1 = vmul.f32 %v2037_v44, %v4304_v26  ;;  %v2262_v44 = vld [vmem:[%s4777_s8] sm:$0xff] }
 0x413   : > { %v2084_v59 = vsel %vm771_vm7, %v2056_v37, 0.0  ;;  %v2086_v58 = vsel %vm771_vm7, %v2057_v1, 0.0  ;;  %v3224_v1 = vld [vmem:[%s4778_s9] ss:$0 sm:$0xff] }
 0x418   : > { %v2041_v35 = vpop.permute.xlu1 %2040 }
 0x419   : > { %v2058_v33 = vmul.f32 %v2041_v35, %v4319_v32  ;;  %v3225_v35 = vld [vmem:[%s4779_s10] ss:$0 sm:$0xff] }
 0x41b   : > { %v2088_v4 = vsel %vm771_vm7, %v2058_v33, 0.0  ;;  %v2305_v33 = vld [vmem:[%s4780_s11] sm:$0xff] }
 0x45c   : > { %2016 = vperm.xlu2 %3205, %v3223_v23  }
 0x464   : > { %634 = vrot.lane.b32.xlu2 %v3700_v13, %s3513_s26 }
 0x46c   : > { %646 = vrot.lane.b32.xlu2 %v3700_v13, %s3512_s23 }
 0x474   : > { %658 = vrot.lane.b32.xlu2 %v3700_v13, %s3518_s24 }
 0x47c   : > { %678 = vrot.lane.b32.xlu2 %v3711_v17, %s3513_s26 }
 0x484   : > { %690 = vrot.lane.b32.xlu2 %v3711_v17, %s3512_s23  ;;  %v2145_v51 = vpop.trf.xlu2 }
 0x485   : > { %3070 = vmatmul.msk.f32.vlgmr.msrb.gmra.mxu3 %vm771_vm7, %v2145_v51 }
 0x48c   : > { %702 = vrot.lane.b32.xlu2 %v3711_v17, %s3518_s24  ;;  %v2146_v60 = vpop.trf.xlu2 }
 0x48d   : > { %3071 = vmatmul.msk.f32.gmra.mxu3 %vm771_vm7, %v2146_v60  ;;  %v2055_v60 = vmul.f32 %v2029_v48, %v4288_v9 }
 0x48f   : > { %v2082_v38 = vsel %vm771_vm7, %v2055_v60, 0.0 }
 0x4b6   : > { %v2017_v19 = vpop.permute.xlu2 %2016 }
 0x4b7   : > { %v2052_v53 = vmul.f32 %v2017_v19, %v4177_v43 }
 0x4b9   : > { %v2076_v23 = vsel %vm771_vm7, %v2052_v53, 0.0 }
 0x4ba   : > { %v2077_v51 = vadd.f32 %v2076_v23, %v2075_v15 }
 0x4bc   : > { %v2079_v16 = vadd.f32 %v2078_v41, %v2077_v51 }
 0x4be   : > { %v2081_v18 = vadd.f32 %v2080_v56, %v2079_v16 }
 0x4c0   : > { %v2083_v49 = vadd.f32 %v2082_v38, %v2081_v18  ;;  %v2263_v38 = vld [vmem:[%s4777_s8 + $0x8] sm:$0xff] }
 0x4c2   : > { %v2085_v12 = vadd.f32 %v2084_v59, %v2083_v49 }
 0x4c4   : > { %v2087_v5 = vadd.f32 %v2086_v58, %v2085_v12 }
 0x4c6   : > { %v2089_v42 = vadd.f32 %v2088_v4, %v2087_v5 }
 0x4c8   : > { %2216 = vmatpush.msra.mxu3 %v2089_v42 }
 0x508   : > { %v2186_v36 = vpop.f32.mrf.mxu3 }
 0x509   : > { %3072 = vmatmul.msk.f32.vlgmr.msra.gmra.mxu3 %vm2194_vm2, %v2186_v36  ;;  %v2306_v36 = vld [vmem:[%s4780_s11 + $0x8] sm:$0xff] }
 0x510   : > { %v2189_v46 = vpop.f32.mrf.mxu3 }
 0x511   : > { %3073 = vmatmul.msk.f32.gmra.mxu3 %vm2194_vm2, %v2189_v46 }
 0x58c   : > { %v2218_v31 = vpop.f32.mrf.mxu3 }
 0x58d   : > { %v2219_v54 = vadd.f32 %v2218_v31, %v2192_v21 }
 0x58f   : > { %v3074_v47 = vmul.f32 -1.442695, %v2219_v54 }
 0x591   : > { %3290 = vpow2.f32 %v3074_v47 }
 0x594   : > { %v2221_v61 = vpop.f32.mrf.mxu3 }
 0x595   : > { %v2222_v27 = vadd.f32 %v2221_v61, %v2193_v28 }
 0x597   : > { %v3291_v25 = vpop.eup %3290  ;;  %v3075_v2 = vmul.f32 -1.442695, %v2222_v27 }
 0x598   : > { %v2230_v50 = vadd.f32 1.0, %v3291_v25 }
 0x599   : > { %3292 = vpow2.f32 %v3075_v2 }
 0x59a   : > { %3294 = vrcp.f32 %v2230_v50  ;;  %vm2237_vm5 = vweird.f32 %v2230_v50  ;;  %v2243_v40 = vand.u32 2147483648, %v2230_v50  ;;  %v2241_v51 = vand.u32 2147483647, %v2230_v50 }
 0x59c   : > { %v2244_v37 = vor.u32 1.1754944e-38, %v2243_v40  ;;  %vm2242_vm9 = vcmp.eq.f32.partialorder %v2241_v51, 8.507059e+37 }
 0x59f   : > { %v3293_v52 = vpop.eup %3292 }
 0x5a0   : > { %v3295_v10 = vpop.eup %3294  ;;  %v2231_v30 = vadd.f32 1.0, %v3293_v52 }
 0x5a1   : > { %v2233_v24 = vmul.f32 %v3295_v10, %v2230_v50  ;;  %vm2238_vm3 = vweird.f32 %v3295_v10 }
 0x5a2   : > { %3296 = vrcp.f32 %v2231_v30  ;;  %v2258_v45 = vand.u32 2147483648, %v2231_v30  ;;  %v2256_v15 = vand.u32 2147483647, %v2231_v30  ;;  %vm2252_vm11 = vweird.f32 %v2231_v30  ;;  %vm2239_vm12 = vmor %vm2237_vm5, %vm2238_vm3 }
 0x5a3   : > { %v2234_v29 = vsub.f32 1.0, %v2233_v24 }
 0x5a4   : > { %v2259_v41 = vor.u32 1.1754944e-38, %v2258_v45  ;;  %vm2257_vm6 = vcmp.eq.f32.partialorder %v2256_v15, 8.507059e+37 }
 0x5a5   : > { %v2235_v48 = vmul.f32 %v3295_v10, %v2234_v29 }
 0x5a7   : > { %v2236_v3 = vadd.f32 %v3295_v10, %v2235_v48 }
 0x5a8   : > { %v3297_v39 = vpop.eup %3296 }
 0x5a9   : > { %v2248_v8 = vmul.f32 %v3297_v39, %v2231_v30  ;;  %vm2253_vm4 = vweird.f32 %v3297_v39  ;;  %v2240_v16 = vsel %vm2239_vm12, %v3295_v10, %v2236_v3 }
 0x5aa   : > { %vm2254_vm14 = vmor %vm2252_vm11, %vm2253_vm4  ;;  %v2245_v18 = vsel %vm2242_vm9, %v2244_v37, %v2240_v16 }
 0x5ab   : > { %v2249_v19 = vsub.f32 1.0, %v2248_v8 }
 0x5ad   : > { %v2250_v53 = vmul.f32 %v3297_v39, %v2249_v19 }
 0x5af   : > { %v2251_v23 = vadd.f32 %v3297_v39, %v2250_v53 }
 0x5b1   : > { %v2255_v60 = vsel %vm2254_vm14, %v3297_v39, %v2251_v23 }
 0x5b2   : > { %v2260_v56 = vsel %vm2257_vm6, %v2259_v41, %v2255_v60 }
 0x5b3   : > { %2284 = vmatpush.msrb.mxu3 %v2260_v56 }
 0x5b5   : > { %2285 = vmatpush.msrb.mxu3 %v2245_v18 }
 0x5b6   : > { %3076 = vmatmul.msk.f32.vlgmr.msrb.gmra.mxu3 %vm771_vm7, %v2262_v44 }
 0x5be   : > { %3077 = vmatmul.msk.f32.gmra.mxu3 %vm771_vm7, %v2263_v38 }
 0x639   : > { %v2287_v49 = vpop.f32.mrf.mxu3 }
 0x63a   : > { %v2297_v59 = vmul.f32 %v3224_v1, %v2287_v49 }
 0x63c   : > { %v2303_v12 = vadd.f32 %v3225_v35, %v2297_v59 }
 0x63e   : > { %v2307_v58 = vadd.f32 %v2305_v33, %v2303_v12 }
 0x640   : > { %v2309_v5 = vsel %vm771_vm7, %v2307_v58, -inf }
 0x641   : > { %2310 = vmax.xlane.f32.xlu0 %v2309_v5  ;;  %v2290_v4 = vpop.f32.mrf.mxu3 }
 0x642   : > { %v2298_v42 = vmul.f32 %v3224_v1, %v2290_v4 }
 0x644   : > { %v2304_v46 = vadd.f32 %v3225_v35, %v2298_v42 }
 0x646   : > { %v2308_v21 = vadd.f32 %v2306_v36, %v2304_v46 }
 0x648   : > { %v2312_v31 = vsel %vm771_vm7, %v2308_v21, -inf }
 0x649   : > { %2313 = vmax.xlane.f32.xlu1 %v2312_v31 }
 0x6b4   : > { %v2311_v54 = vpop.xlane.xlu0 %2310 }
 0x6b5   : > { %v2315_v47 = vsub.f32 %v2307_v58, %v2311_v54 }
 0x6b7   : > { %v2317_v28 = vmul.f32 1.442695, %v2315_v47 }
 0x6b9   : > { %3298 = vpow2.f32 %v2317_v28 }
 0x6bc   : > { %v2314_v61 = vpop.xlane.xlu1 %2313 }
 0x6bd   : > { %v2316_v27 = vsub.f32 %v2308_v21, %v2314_v61 }
 0x6bf   : > { %v3299_v25 = vpop.eup %3298  ;;  %v2319_v2 = vmul.f32 1.442695, %v2316_v27 }
 0x6c0   : > { %v2321_v50 = vsel %vm771_vm7, %v3299_v25, 0.0 }
 0x6c1   : > { %3300 = vpow2.f32 %v2319_v2  ;;  %2322 = vadd.xlane.f32.xlu0 %v2321_v50 }
 0x6c7   : > { %v3301_v52 = vpop.eup %3300 }
 0x6c8   : > { %v2324_v10 = vsel %vm771_vm7, %v3301_v52, 0.0 }
 0x6c9   : > { %2325 = vadd.xlane.f32.xlu1 %v2324_v10 }
 0x6e2   : > { %622 = vrot.lane.b32.xlu1 %v3700_v13, %s4793_s16 }
 0x6ea   : > { %628 = vrot.lane.b32.xlu1 %v3700_v13, %s3517_s20 }
 0x6f2   : > { %640 = vrot.lane.b32.xlu1 %v3700_v13, %s3516_s25 }
 0x6fa   : > { %652 = vrot.lane.b32.xlu1 %v3700_v13, %s3515_s17 }
 0x702   : > { %672 = vrot.lane.b32.xlu1 %v3711_v17, %s3517_s20 }
 0x70a   : > { %684 = vrot.lane.b32.xlu1 %v3711_v17, %s3516_s25 }
 0x712   : > { %696 = vrot.lane.b32.xlu1 %v3711_v17, %s3515_s17 }
 0x734   : > { %v2323_v30 = vpop.xlane.xlu0 %2322 }
 0x735   : > { %3302 = vrcp.f32 %v2323_v30 }
 0x73b   : > { %v3303_v24 = vpop.eup %3302 }
 0x73c   : > { %v2326_v29 = vpop.xlane.xlu1 %2325  ;;  %v2329_v39 = vmul.f32 %v3303_v24, %v3299_v25 }
 0x73d   : > { %3304 = vrcp.f32 %v2326_v29 }
 0x73e   : > { %2331 = vxpose.xlu0.b32.start [1/2] (short) (narrow) %v2329_v39, 16 }
 0x743   : > { %v3305_v8 = vpop.eup %3304 }
 0x744   : > { %v2330_v48 = vmul.f32 %v3305_v8, %v3301_v52 }
 0x746   : > { %2332 = vxpose.xlu0.b32.end [2/2] (short) (narrow) %v2330_v48, 16 }
 0x7b4   : > { %666 = vrot.lane.b32.xlu0 %v3711_v17, %s4793_s16 }
 0x7e2   : > { %v2347_v19 = vpop.trf.xlu0 }
 0x7e3   : > { %2363 = vst.msk [vmem:[%s4435_s27] sm:$0xff] %vm771_vm7, %v2347_v19 }
 0x7ea   : > { %v2348_v45 = vpop.trf.xlu0 }
 0x7eb   : > { %2364 = vst.msk [vmem:[%s4435_s27 + $0x8] sm:$0xff] %vm771_vm7, %v2348_v45  ;;  %2427 = vmatpush.msra.mxu3 %v2348_v45 }
 0x7ed   : > { %2428 = vmatpush.msra.mxu3 %v2347_v19 }
 0x7ee   : > { %3078 = vmatmul.msk.f32.vlgmr.msra.gmra.mxu3 %vm771_vm7, %v3888_v55 }
 0x7f6   : > { %3079 = vmatmul.msk.f32.gmra.mxu3 %vm771_vm7, %v3904_v34 }
 0x7fe   : > { %3080 = vmatmul.msk.f32.gmra.mxu3 %vm771_vm7, %v3924_v11 }
 0x806   : > { %3081 = vmatmul.msk.f32.gmra.mxu3 %vm771_vm7, %v4071_v14 }
 0x80e   : > { %3082 = vmatmul.msk.f32.gmra.mxu3 %vm771_vm7, %v4088_v62 }
 0x816   : > { %3083 = vmatmul.msk.f32.gmra.mxu3 %vm771_vm7, %v4097_v0 }
 0x81e   : > { %3084 = vmatmul.msk.f32.gmra.mxu3 %vm771_vm7, %v4110_v20 }
 0x826   : > { %3085 = vmatmul.msk.f32.gmra.mxu3 %vm771_vm7, %v4141_v22 }
 0x82e   : > { %3086 = vmatmul.msk.f32.gmra.mxu3 %vm771_vm7, %v4167_v6  ;;  %v623_v6 = vpop.permute.xlu1 %622 }
 0x836   : > { %3087 = vmatmul.msk.f32.gmra.mxu3 %vm771_vm7, %v4177_v43 }
 0x83e   : > { %3088 = vmatmul.msk.f32.gmra.mxu3 %vm771_vm7, %v4190_v7  ;;  %v629_v7 = vpop.permute.xlu1 %628 }
 0x846   : > { %3089 = vmatmul.msk.f32.gmra.mxu3 %vm771_vm7, %v4283_v63 }
 0x84e   : > { %3090 = vmatmul.msk.f32.gmra.mxu3 %vm771_vm7, %v4288_v9  ;;  %v635_v9 = vpop.permute.xlu2 %634 }
 0x856   : > { %3091 = vmatmul.msk.f32.gmra.mxu3 %vm771_vm7, %v4290_v57  ;;  %v641_v57 = vpop.permute.xlu1 %640 }
 0x85e   : > { %3092 = vmatmul.msk.f32.gmra.mxu3 %vm771_vm7, %v4304_v26  ;;  %v647_v26 = vpop.permute.xlu2 %646 }
 0x866   : > { %3093 = vmatmul.msk.f32.gmra.mxu3 %vm771_vm7, %v4319_v32  ;;  %v653_v32 = vpop.permute.xlu1 %652  ;;  %v659_v44 = vpop.permute.xlu2 %658 }
 0x86e   : > { %v673_v5 = vpop.permute.xlu1 %672  ;;  %v679_v52 = vpop.permute.xlu2 %678 }
 0x871   : > { %v2430_v55 = vpop.f32.mrf.mxu3 }
 0x872   : > { %v2494_v3 = vmul.f32 0.01, %v2430_v55  ;;  %vm2478_vm10 = vcmp.ge.f32.partialorder %v2430_v55, 0.0 }
 0x874   : > { %v2510_v60 = vsel %vm2478_vm10, %v2430_v55, %v2494_v3 }
 0x875   : > { %v4480_v1 = vadd.f32 %v2510_v60, %v3700_v13 }
 0x876   : > { %v691_v3 = vpop.permute.xlu2 %690 }
 0x877   : > { %v2542_v36 = vsel %vm771_vm7, %v4480_v1, 0.0 }
 0x879   : > { %v2433_v34 = vpop.f32.mrf.mxu3 }
 0x87a   : > { %v2495_v15 = vmul.f32 0.01, %v2433_v34  ;;  %vm2479_vm15 = vcmp.ge.f32.partialorder %v2433_v34, 0.0 }
 0x87c   : > { %v2511_v51 = vsel %vm2479_vm15, %v2433_v34, %v2495_v15 }
 0x87d   : > { %v4477_v37 = vadd.f32 %v2511_v51, %v623_v6 }
 0x87f   : > { %v2543_v33 = vsel %vm771_vm7, %v4477_v37, 0.0 }
 0x880   : > { %v2544_v21 = vadd.f32 %v2543_v33, %v2542_v36 }
 0x881   : > { %v2436_v11 = vpop.f32.mrf.mxu3 }
 0x882   : > { %v2496_v40 = vmul.f32 0.01, %v2436_v11  ;;  %vm2480_vm0 = vcmp.ge.f32.partialorder %v2436_v11, 0.0 }
 0x884   : > { %v2512_v16 = vsel %vm2480_vm0, %v2436_v11, %v2496_v40  ;;  %v685_v11 = vpop.permute.xlu1 %684 }
 0x885   : > { %v4482_v35 = vadd.f32 %v2512_v16, %v629_v7 }
 0x887   : > { %v2545_v13 = vsel %vm771_vm7, %v4482_v35, 0.0 }
 0x888   : > { %v2546_v61 = vadd.f32 %v2545_v13, %v2544_v21  ;;  %v703_v21 = vpop.permute.xlu2 %702 }
 0x889   : > { %v2439_v14 = vpop.f32.mrf.mxu3 }
 0x88a   : > { %v2497_v41 = vmul.f32 0.01, %v2439_v14  ;;  %vm2481_vm1 = vcmp.ge.f32.partialorder %v2439_v14, 0.0 }
 0x88c   : > { %v2513_v18 = vsel %vm2481_vm1, %v2439_v14, %v2497_v41  ;;  %v667_v14 = vpop.permute.xlu0 %666 }
 0x88d   : > { %v4486_v12 = vadd.f32 %v2513_v18, %v635_v9 }
 0x88f   : > { %v2547_v47 = vsel %vm771_vm7, %v4486_v12, 0.0 }
 0x890   : > { %v2548_v10 = vadd.f32 %v2547_v47, %v2546_v61 }
 0x891   : > { %v2442_v62 = vpop.f32.mrf.mxu3 }
 0x892   : > { %v2498_v56 = vmul.f32 0.01, %v2442_v62  ;;  %vm2482_vm13 = vcmp.ge.f32.partialorder %v2442_v62, 0.0 }
 0x894   : > { %v2514_v49 = vsel %vm2482_vm13, %v2442_v62, %v2498_v56 }
 0x895   : > { %v4492_v46 = vadd.f32 %v2514_v49, %v641_v57 }
 0x897   : > { %v2549_v2 = vsel %vm771_vm7, %v4492_v46, 0.0 }
 0x898   : > { %v2550_v48 = vadd.f32 %v2549_v2, %v2548_v10 }
 0x899   : > { %v2445_v0 = vpop.f32.mrf.mxu3 }
 0x89a   : > { %v2499_v38 = vmul.f32 0.01, %v2445_v0  ;;  %vm2483_vm8 = vcmp.ge.f32.partialorder %v2445_v0, 0.0 }
 0x89c   : > { %v2515_v4 = vsel %vm2483_vm8, %v2445_v0, %v2499_v38  ;;  %v697_v38 = vpop.permute.xlu1 %696 }
 0x89d   : > { %v4496_v28 = vadd.f32 %v2515_v4, %v647_v26 }
 0x89f   : > { %v2551_v29 = vsel %vm771_vm7, %v4496_v28, 0.0 }
 0x8a0   : > { %v2552_v62 = vadd.f32 %v2551_v29, %v2550_v48  ;;  %v3520_v48 = vmov 2048.0  }
 0x8a1   : > { %v2448_v20 = vpop.f32.mrf.mxu3  ;;  %3306 = vrcp.f32 %v3520_v48 }
 0x8a2   : > { %v2500_v59 = vmul.f32 0.01, %v2448_v20  ;;  %vm2484_vm2 = vcmp.ge.f32.partialorder %v2448_v20, 0.0 }
 0x8a4   : > { %v2516_v31 = vsel %vm2484_vm2, %v2448_v20, %v2500_v59 }
 0x8a5   : > { %v4500_v50 = vadd.f32 %v2516_v31, %v653_v32 }
 0x8a7   : > { %v2553_v55 = vsel %vm771_vm7, %v4500_v50, 0.0 }
 0x8a9   : > { %v2451_v22 = vpop.f32.mrf.mxu3 }
 0x8aa   : > { %v2501_v42 = vmul.f32 0.01, %v2451_v22  ;;  %vm2485_vm3 = vcmp.ge.f32.partialorder %v2451_v22, 0.0 }
 0x8ac   : > { %v2517_v27 = vsel %vm2485_vm3, %v2451_v22, %v2501_v42 }
 0x8ad   : > { %v4505_v39 = vadd.f32 %v2517_v27, %v659_v44 }
 0x8af   : > { %v2555_v22 = vsel %vm771_vm7, %v4505_v39, 0.0 }
 0x8b1   : > { %v2454_v43 = vpop.f32.mrf.mxu3 }
 0x8b2   : > { %v2502_v54 = vmul.f32 0.01, %v2454_v43  ;;  %vm2486_vm4 = vcmp.ge.f32.partialorder %v2454_v43, 0.0 }
 0x8b4   : > { %v2518_v30 = vsel %vm2486_vm4, %v2454_v43, %v2502_v54  ;;  %v2554_v43 = vadd.f32 %v2553_v55, %v2552_v62 }
 0x8b5   : > { %v4512_v34 = vadd.f32 %v2518_v30, %v3711_v17 }
 0x8b6   : > { %v2556_v57 = vadd.f32 %v2555_v22, %v2554_v43 }
 0x8b7   : > { %v2557_v17 = vsel %vm771_vm7, %v4512_v34, 0.0 }
 0x8b8   : > { %v2558_v40 = vadd.f32 %v2557_v17, %v2556_v57 }
 0x8b9   : > { %v2457_v63 = vpop.f32.mrf.mxu3 }
 0x8ba   : > { %v2503_v25 = vmul.f32 0.01, %v2457_v63  ;;  %vm2487_vm5 = vcmp.ge.f32.partialorder %v2457_v63, 0.0 }
 0x8bc   : > { %v2519_v19 = vsel %vm2487_vm5, %v2457_v63, %v2503_v25 }
 0x8bd   : > { %v4518_v6 = vadd.f32 %v2519_v19, %v667_v14  ;;  %v3307_v19 = vpop.eup %3306 }
 0x8be   : > { %vm2588_vm10 = vweird.f32 %v3307_v19 }
 0x8c1   : > { %v4473_v53 = vpop.f32.mrf.mxu3 }
 0x8c2   : > { %v2504_v24 = vmul.f32 0.01, %v4473_v53  ;;  %vm2488_vm11 = vcmp.ge.f32.partialorder %v4473_v53, 0.0 }
 0x8c4   : > { %v2520_v0 = vsel %vm2488_vm11, %v4473_v53, %v2504_v24  ;;  %v2559_v53 = vsel %vm771_vm7, %v4518_v6, 0.0 }
 0x8c5   : > { %v4523_v9 = vadd.f32 %v2520_v0, %v673_v5  ;;  %v2560_v16 = vadd.f32 %v2559_v53, %v2558_v40 }
 0x8c7   : > { %v2561_v41 = vsel %vm771_vm7, %v4523_v9, 0.0 }
 0x8c8   : > { %v2562_v49 = vadd.f32 %v2561_v41, %v2560_v16 }
 0x8c9   : > { %v4475_v23 = vpop.f32.mrf.mxu3 }
 0x8ca   : > { %v2505_v45 = vmul.f32 0.01, %v4475_v23  ;;  %vm2489_vm12 = vcmp.ge.f32.partialorder %v4475_v23, 0.0 }
 0x8cc   : > { %v2521_v7 = vsel %vm2489_vm12, %v4475_v23, %v2505_v45  ;;  %v2584_v45 = vmul.f32 2048.0, %v3307_v19 }
 0x8cd   : > { %v4527_v15 = vadd.f32 %v2521_v7, %v679_v52 }
 0x8ce   : > { %v2585_v55 = vsub.f32 1.0, %v2584_v45 }
 0x8cf   : > { %v2563_v44 = vsel %vm771_vm7, %v4527_v15, 0.0 }
 0x8d1   : > { %v2466_v58 = vpop.f32.mrf.mxu3 }
 0x8d2   : > { %v2506_v20 = vmul.f32 0.01, %v2466_v58  ;;  %vm2490_vm14 = vcmp.ge.f32.partialorder %v2466_v58, 0.0 }
 0x8d4   : > { %v2522_v26 = vsel %vm2490_vm14, %v2466_v58, %v2506_v20  ;;  %v2564_v58 = vadd.f32 %v2563_v44, %v2562_v49 }
 0x8d5   : > { %v4531_v60 = vadd.f32 %v2522_v26, %v685_v11  ;;  %v2586_v11 = vmul.f32 %v3307_v19, %v2585_v55 }
 0x8d7   : > { %v2565_v59 = vsel %vm771_vm7, %v4531_v60, 0.0  ;;  %v2587_v14 = vadd.f32 %v3307_v19, %v2586_v11 }
 0x8d8   : > { %v2566_v36 = vadd.f32 %v2565_v59, %v2564_v58 }
 0x8d9   : > { %v2469_v8 = vpop.f32.mrf.mxu3  ;;  %v4549_v62 = vsel %vm2588_vm10, %v3307_v19, %v2587_v14 }
 0x8da   : > { %v2507_v63 = vmul.f32 0.01, %v2469_v8  ;;  %vm2491_vm6 = vcmp.ge.f32.partialorder %v2469_v8, 0.0 }
 0x8dc   : > { %v2523_v51 = vsel %vm2491_vm6, %v2469_v8, %v2507_v63 }
 0x8dd   : > { %v4535_v18 = vadd.f32 %v2523_v51, %v691_v3 }
 0x8df   : > { %v2567_v4 = vsel %vm771_vm7, %v4535_v18, 0.0 }
 0x8e0   : > { %v2568_v54 = vadd.f32 %v2567_v4, %v2566_v36 }
 0x8e1   : > { %v2472_v32 = vpop.f32.mrf.mxu3 }
 0x8e2   : > { %vm2492_vm9 = vcmp.ge.f32.partialorder %v2472_v32, 0.0  ;;  %v2508_v23 = vmul.f32 0.01, %v2472_v32 }
 0x8e4   : > { %v2524_v56 = vsel %vm2492_vm9, %v2472_v32, %v2508_v23 }
 0x8e5   : > { %v4539_v33 = vadd.f32 %v2524_v56, %v697_v38 }
 0x8e7   : > { %v2569_v13 = vsel %vm771_vm7, %v4539_v33, 0.0 }
 0x8e8   : > { %v2570_v61 = vadd.f32 %v2569_v13, %v2568_v54 }
 0x8e9   : > { %v2475_v5 = vpop.f32.mrf.mxu3 }
 0x8ea   : > { %vm2493_vm15 = vcmp.ge.f32.partialorder %v2475_v5, 0.0  ;;  %v2509_v42 = vmul.f32 0.01, %v2475_v5 }
 0x8ec   : > { %v2525_v31 = vsel %vm2493_vm15, %v2475_v5, %v2509_v42 }
 0x8ed   : > { %v4545_v47 = vadd.f32 %v2525_v31, %v703_v21 }
 0x8ef   : > { %v2571_v27 = vsel %vm771_vm7, %v4545_v47, 0.0 }
 0x8f0   : > { %v2572_v25 = vadd.f32 %v2571_v27, %v2570_v61 }
 0x8f2   : > { %2573 = vadd.xlane.f32.xlu1 %v2572_v25 }
 0x965   : > { %v2574_v2 = vpop.xlane.xlu1 %2573 }
 0x966   : > { %v2575_v52 = vrot.slane %v2574_v2, 4 }
 0x968   : > { %v2576_v10 = vadd.f32 %v2575_v52, %v2574_v2 }
 0x96a   : > { %v2577_v30 = vrot.slane %v2576_v10, 2 }
 0x96c   : > { %v2578_v24 = vadd.f32 %v2577_v30, %v2576_v10 }
 0x96e   : > { %v2579_v29 = vrot.slane %v2578_v24, 1 }
 0x970   : > { %v2580_v8 = vadd.f32 %v2579_v29, %v2578_v24 }
 0x972   : > { %3109 = vpush %v2580_v8 }
 0x9a3   : > { %s3110_s29 = spop %3109 }
 0x9a4   : > { %v2582_v0 = vstv %s3110_s29 }
 0x9a5   : > { %v2590_v20 = vmul.f32 %v4549_v62, %v2582_v0 }
 0x9a7   : > { %v4553_v22 = vsub.f32 %v4480_v1, %v2590_v20  ;;  %v4556_v43 = vsub.f32 %v4477_v37, %v2590_v20  ;;  %v4559_v7 = vsub.f32 %v4482_v35, %v2590_v20  ;;  %v4562_v63 = vsub.f32 %v4486_v12, %v2590_v20 }
 0x9a8   : > { %v4569_v26 = vsub.f32 %v4492_v46, %v2590_v20  ;;  %v4574_v37 = vsub.f32 %v4496_v28, %v2590_v20  ;;  %v4581_v3 = vsub.f32 %v4500_v50, %v2590_v20  ;;  %v4587_v28 = vsub.f32 %v4505_v39, %v2590_v20 }
 0x9a9   : > { %v2607_v17 = vmul.f32 %v4553_v22, %v4553_v22  ;;  %v2608_v57 = vmul.f32 %v4556_v43, %v4556_v43  ;;  %v2609_v1 = vmul.f32 %v4559_v7, %v4559_v7  ;;  %v2610_v35 = vmul.f32 %v4562_v63, %v4562_v63 }
 0x9aa   : > { %v2611_v46 = vmul.f32 %v4569_v26, %v4569_v26  ;;  %v2612_v23 = vmul.f32 %v4574_v37, %v4574_v37  ;;  %v4593_v56 = vsub.f32 %v4512_v34, %v2590_v20  ;;  %v2613_v50 = vmul.f32 %v4581_v3, %v4581_v3 }
 0x9ab   : > { %v2623_v12 = vsel %vm771_vm7, %v2607_v17, 0.0  ;;  %v2624_v53 = vsel %vm771_vm7, %v2608_v57, 0.0  ;;  %v2626_v40 = vsel %vm771_vm7, %v2609_v1, 0.0  ;;  %v2628_v41 = vsel %vm771_vm7, %v2610_v35, 0.0 }
 0x9ac   : > { %v2625_v32 = vadd.f32 %v2624_v53, %v2623_v12  ;;  %v2630_v44 = vsel %vm771_vm7, %v2611_v46, 0.0  ;;  %v4599_v49 = vsub.f32 %v4518_v6, %v2590_v20  ;;  %v2614_v39 = vmul.f32 %v4587_v28, %v4587_v28 }
 0x9ad   : > { %v2632_v59 = vsel %vm771_vm7, %v2612_v23, 0.0  ;;  %v4605_v5 = vsub.f32 %v4523_v9, %v2590_v20  ;;  %v2615_v34 = vmul.f32 %v4593_v56, %v4593_v56  ;;  %v2634_v4 = vsel %vm771_vm7, %v2613_v50, 0.0 }
 0x9ae   : > { %v2627_v51 = vadd.f32 %v2626_v40, %v2625_v32  ;;  %v4611_v36 = vsub.f32 %v4527_v15, %v2590_v20  ;;  %v2616_v6 = vmul.f32 %v4599_v49, %v4599_v49  ;;  %v2636_v13 = vsel %vm771_vm7, %v2614_v39, 0.0 }
 0x9af   : > { %v4617_v31 = vsub.f32 %v4531_v60, %v2590_v20  ;;  %v2617_v9 = vmul.f32 %v4605_v5, %v4605_v5  ;;  %v2638_v54 = vsel %vm771_vm7, %v2615_v34, 0.0  ;;  %v4623_v27 = vsub.f32 %v4535_v18, %v2590_v20  ;;  %v2693_v34 = vld [vmem:[#allocation5 + $0x8] sm:$0xff] }
 0x9b0   : > { %v2629_v16 = vadd.f32 %v2628_v41, %v2627_v51  ;;  %v2618_v15 = vmul.f32 %v4611_v36, %v4611_v36  ;;  %v2640_v25 = vsel %vm771_vm7, %v2616_v6, 0.0  ;;  %v2605_v52 = vsub.f32 %v4539_v33, %v2590_v20  ;;  %v2733_v6 = vld [vmem:[#allocation7 + $0x48] sm:$0xff] }
 0x9b1   : > { %v2619_v60 = vmul.f32 %v4617_v31, %v4617_v31  ;;  %v2642_v10 = vsel %vm771_vm7, %v2617_v9, 0.0  ;;  %v4633_v24 = vsub.f32 %v4545_v47, %v2590_v20  ;;  %v2620_v18 = vmul.f32 %v4623_v27, %v4623_v27 }
 0x9b2   : > { %v2631_v38 = vadd.f32 %v2630_v44, %v2629_v16  ;;  %v2644_v29 = vsel %vm771_vm7, %v2618_v15, 0.0  ;;  %v2621_v48 = vmul.f32 %v2605_v52, %v2605_v52 }
 0x9b3   : > { %v2646_v19 = vsel %vm771_vm7, %v2619_v60, 0.0  ;;  %v2622_v33 = vmul.f32 %v4633_v24, %v4633_v24  ;;  %v2648_v55 = vsel %vm771_vm7, %v2620_v18, 0.0  ;;  %v2700_v18 = vld [vmem:[#allocation5 + $0x40] sm:$0xff] }
 0x9b4   : > { %v2633_v58 = vadd.f32 %v2632_v59, %v2631_v38  ;;  %v2650_v14 = vsel %vm771_vm7, %v2621_v48, 0.0  ;;  %v2701_v59 = vld [vmem:[#allocation5 + $0x48] sm:$0xff] }
 0x9b5   : > { %v2652_v0 = vsel %vm771_vm7, %v2622_v33, 0.0 }
 0x9b6   : > { %v2635_v42 = vadd.f32 %v2634_v4, %v2633_v58  ;;  %v2697_v58 = vld [vmem:[#allocation5 + $0x28] sm:$0xff] }
 0x9b8   : > { %v2637_v21 = vadd.f32 %v2636_v13, %v2635_v42  ;;  %v2729_v13 = vld [vmem:[#allocation7 + $0x28] sm:$0xff] }
 0x9ba   : > { %v2639_v61 = vadd.f32 %v2638_v54, %v2637_v21  ;;  %v2725_v21 = vld [vmem:[#allocation7 + $0x8] sm:$0xff] }
 0x9bc   : > { %v2641_v2 = vadd.f32 %v2640_v25, %v2639_v61 }
 0x9be   : > { %v2643_v30 = vadd.f32 %v2642_v10, %v2641_v2  ;;  %v2702_v10 = vld [vmem:[#allocation5 + $0x50] sm:$0xff] }
 0x9c0   : > { %v2645_v8 = vadd.f32 %v2644_v29, %v2643_v30  ;;  %v2706_v30 = vld [vmem:[#allocation5 + $0x70] sm:$0xff]  ;;  %v2692_v29 = vld [vmem:[#allocation5] sm:$0xff] }
 0x9c2   : > { %v2647_v45 = vadd.f32 %v2646_v19, %v2645_v8 }
 0x9c4   : > { %v2649_v11 = vadd.f32 %v2648_v55, %v2647_v45  ;;  %v2738_v45 = vld [vmem:[#allocation7 + $0x70] sm:$0xff] }
 0x9c6   : > { %v2651_v47 = vadd.f32 %v2650_v14, %v2649_v11  ;;  %v2724_v11 = vld [vmem:[#allocation7] sm:$0xff]  ;;  %v2726_v14 = vld [vmem:[#allocation7 + $0x10] sm:$0xff] }
 0x9c8   : > { %v2653_v20 = vadd.f32 %v2652_v0, %v2651_v47 }
 0x9ca   : > { %2654 = vadd.xlane.f32.xlu2 %v2653_v20 }
 0xa3d   : > { %v2655_v17 = vpop.xlane.xlu2 %2654 }
 0xa3e   : > { %v2656_v57 = vrot.slane %v2655_v17, 4 }
 0xa40   : > { %v2657_v1 = vadd.f32 %v2656_v57, %v2655_v17 }
 0xa42   : > { %v2658_v35 = vrot.slane %v2657_v1, 2 }
 0xa44   : > { %v2659_v12 = vadd.f32 %v2658_v35, %v2657_v1  ;;  %v2703_v35 = vld [vmem:[#allocation5 + $0x58] sm:$0xff] }
 0xa46   : > { %v2660_v53 = vrot.slane %v2659_v12, 1 }
 0xa48   : > { %v2661_v32 = vadd.f32 %v2660_v53, %v2659_v12  ;;  %v2695_v12 = vld [vmem:[#allocation5 + $0x18] sm:$0xff] }
 0xa49   : > { %v2735_v53 = vld [vmem:[#allocation7 + $0x58] sm:$0xff] }
 0xa4a   : > { %3111 = vpush %v2661_v32 }
 0xa7b   : > { %s3112_s30 = spop %3111 }
 0xa7c   : > { %v2663_v46 = vstv %s3112_s30 }
 0xa7d   : > { %v2664_v40 = vmul.f32 %v2663_v46, %v4549_v62 }
 0xa7f   : > { %v2665_v51 = vadd.f32 1e-05, %v2664_v40 }
 0xa81   : > { %3308 = vrsqrt.f32 %v2665_v51  ;;  %vm2672_vm1 = vweird.f32 %v2665_v51 }
 0xa87   : > { %v3309_v23 = vpop.eup %3308 }
 0xa88   : > { %v2667_v41 = vmul.f32 %v3309_v23, %v2665_v51  ;;  %vm2673_vm0 = vweird.f32 %v3309_v23 }
 0xa89   : > { %vm2674_vm13 = vmor %vm2672_vm1, %vm2673_vm0 }
 0xa8a   : > { %v2668_v16 = vmul.f32 %v3309_v23, %v2667_v41 }
 0xa8c   : > { %v2669_v50 = vmul.f32 0.5, %v2668_v16  ;;  %v2696_v16 = vld [vmem:[#allocation5 + $0x20] sm:$0xff] }
 0xa8e   : > { %v2670_v44 = vsub.f32 1.5, %v2669_v50 }
 0xa90   : > { %v2671_v38 = vmul.f32 %v3309_v23, %v2670_v44  ;;  %v2736_v44 = vld [vmem:[#allocation7 + $0x60] sm:$0xff] }
 0xa92   : > { %v4645_v39 = vsel %vm2674_vm13, %v3309_v23, %v2671_v38  ;;  %v2704_v23 = vld [vmem:[#allocation5 + $0x60] sm:$0xff] }
 0xa93   : > { %v2685_v4 = vmul.f32 %v4645_v39, %v4599_v49  ;;  %v2681_v62 = vmul.f32 %v4645_v39, %v4574_v37  ;;  %v2677_v42 = vmul.f32 %v4645_v39, %v4556_v43  ;;  %v2686_v15 = vmul.f32 %v4645_v39, %v4605_v5  ;;  %v2694_v43 = vld [vmem:[#allocation5 + $0x10] sm:$0xff] }
 0xa94   : > { %v2690_v49 = vmul.f32 %v4645_v39, %v2605_v52  ;;  %v2678_v37 = vmul.f32 %v4645_v39, %v4559_v7  ;;  %v2684_v5 = vmul.f32 %v4645_v39, %v4593_v56  ;;  %v2732_v52 = vld [vmem:[#allocation7 + $0x40] sm:$0xff]  ;;  %v2676_v19 = vmul.f32 %v4645_v39, %v4553_v22  ;;  %v2734_v7 = vld [vmem:[#allocation7 + $0x50] sm:$0xff] }
 0xa95   : > { %v2717_v9 = vmul.f32 %v2701_v59, %v2685_v4  ;;  %v2713_v54 = vmul.f32 %v2697_v58, %v2681_v62  ;;  %v2709_v61 = vmul.f32 %v2693_v34, %v2677_v42  ;;  %v2718_v8 = vmul.f32 %v2702_v10, %v2686_v15  ;;  %v2728_v59 = vld [vmem:[#allocation7 + $0x20] sm:$0xff]  ;;  %v2698_v4 = vld [vmem:[#allocation5 + $0x30] sm:$0xff]  ;;  %v2705_v62 = vld [vmem:[#allocation5 + $0x68] sm:$0xff] }
 0xa96   : > { %v2722_v48 = vmul.f32 %v2706_v30, %v2690_v49  ;;  %v2710_v33 = vmul.f32 %v2694_v43, %v2678_v37  ;;  %v2716_v55 = vmul.f32 %v2700_v18, %v2684_v5  ;;  %v2708_v47 = vmul.f32 %v2692_v29, %v2676_v19  ;;  %v2699_v15 = vld [vmem:[#allocation5 + $0x38] sm:$0xff] }
 0xa97   : > { %v2749_v25 = vadd.f32 %v2733_v6, %v2717_v9  ;;  %v2745_v2 = vadd.f32 %v2729_v13, %v2713_v54  ;;  %v2741_v60 = vadd.f32 %v2725_v21, %v2709_v61  ;;  %v2750_v20 = vadd.f32 %v2734_v7, %v2718_v8  ;;  %v2730_v6 = vld [vmem:[#allocation7 + $0x30] sm:$0xff]  ;;  %v2737_v21 = vld [vmem:[#allocation7 + $0x68] sm:$0xff]  ;;  %v2707_v54 = vld [vmem:[#allocation5 + $0x78] sm:$0xff] }
 0xa98   : > { %v2748_v0 = vadd.f32 %v2732_v52, %v2716_v55  ;;  %v2754_v17 = vadd.f32 %v2738_v45, %v2722_v48  ;;  %v2687_v56 = vmul.f32 %v4645_v39, %v4611_v36  ;;  %v2740_v57 = vadd.f32 %v2724_v11, %v2708_v47 }
 0xa99   : > { %2801 = vrot.lane.b32.xlu2 %v2749_v25, %s3518_s24  ;;  %2782 = vrot.lane.b32.xlu0 %v2745_v2, %s3513_s26  ;;  %v2742_v1 = vadd.f32 %v2726_v14, %v2710_v33  ;;  %v2679_v22 = vmul.f32 %v4645_v39, %v4562_v63  ;;  %v2727_v63 = vld [vmem:[#allocation7 + $0x18] sm:$0xff]  ;;  %v2688_v40 = vmul.f32 %v4645_v39, %v4617_v31 }
 0xa9a   : > { %2758 = vrot.lane.b32.xlu1 %v2741_v60, %s3518_s24  ;;  %s4671_s24 = scalar_lea.vmem [#allocation8], %s3007_s21  ;;  %v2719_v36 = vmul.f32 %v2703_v35, %v2687_v56  ;;  %v2680_v41 = vmul.f32 %v4645_v39, %v4569_v26  ;;  %v2682_v31 = vmul.f32 %v4645_v39, %v4581_v3  ;;  %v2689_v26 = vmul.f32 %v4645_v39, %v4623_v27  ;;  %s2841_s21 = scalar_lea.sflag [#allocation10], %s4430_s18 }
 0xa9b   : > { %2799 = vst.msk [vmem:[%s4671_s24 + $0x8] sm:$0xff] %vm771_vm7, %v2748_v0  ;;  %v2711_v32 = vmul.f32 %v2695_v12, %v2679_v22  ;;  %v2720_v50 = vmul.f32 %v2704_v23, %v2688_v40  ;;  %v2691_v3 = vmul.f32 %v4645_v39, %v4633_v24  ;;  %v2683_v61 = vmul.f32 %v4645_v39, %v4587_v28 }
 0xa9c   : > { %2756 = vst.msk [vmem:[%s4671_s24] sm:$0xff] %vm771_vm7, %v2740_v57  ;;  %v2751_v46 = vadd.f32 %v2735_v53, %v2719_v36  ;;  %v2712_v38 = vmul.f32 %v2696_v16, %v2680_v41  ;;  %v2714_v42 = vmul.f32 %v2698_v4, %v2682_v31  ;;  %v2721_v13 = vmul.f32 %v2705_v62, %v2689_v26 }
 0xa9d   : > { %v2743_v51 = vadd.f32 %v2727_v63, %v2711_v32  ;;  %v2752_v58 = vadd.f32 %v2736_v44, %v2720_v50  ;;  %v2723_v24 = vmul.f32 %v2707_v54, %v2691_v3 }
 0xa9e   : > { %v2744_v34 = vadd.f32 %v2728_v59, %v2712_v38  ;;  %v2746_v9 = vadd.f32 %v2730_v6, %v2714_v42  ;;  %v2753_v27 = vadd.f32 %v2737_v21, %v2721_v13 }
 0xaa1   : > { %2806 = vrot.lane.b32.xlu2 %v2750_v20, %s3515_s17  ;;  %2826 = vrot.lane.b32.xlu0 %v2754_v17, %s3517_s20 }
 0xaa2   : > { %2764 = vrot.lane.b32.xlu1 %v2742_v1, %s3515_s17  ;;  %s3103_s17 = sshll.u32 %s3624_s22, 4 }
 0xaa3   : > { %s2867_s14 = scalar_lea.hbm %s4825_s2, %s3103_s17 }
 0xaa4   : > { %s2870_s15 = sshll.u32 %s2867_s14, 4  ;;  %s2871_s15 = int_to_ptr.hbm [resolvable:$true] %s2870_s15 }
 0xaa9   : > { %2811 = vrot.lane.b32.xlu2 %v2751_v46, %s3512_s23 }
 0xaaa   : > { %2770 = vrot.lane.b32.xlu1 %v2743_v51, %s3512_s23  ;;  %s2868_s23 = sshll.u32 %s4435_s27, 4  ;;  %s3414_s27 = sshra.s32 %s2871_s15, 4  ;;  %s4696_s23 = int_to_ptr.vmem [resolvable:$true] %s2868_s23  ;;  %s3415_s27 = int_to_ptr.hbm [resolvable:$true] %s3414_s27 }
 0xaab   : > { %s3416_s29 = scalar_lea.hbm %s3415_s27, 16  ;;  %p3421_p3 = scmp.lt.s32.totalorder %s3415_s27, %s4825_s2 }
 0xaac   : > { %p3417_p0 = scmp.ne.s32.totalorder %s3415_s27, %s3416_s29 }
 0xaae   : > { %p3418_p1 = pnand %p3417_p0, %p3641_p5 }
 0xab0   : > { %p3419_p2 = pneg %p3418_p1 }
 0xab1   : > { %2816 = vrot.lane.b32.xlu2 %v2752_v58, %s3516_s25 }
 0xab2   : > { %2776 = vrot.lane.b32.xlu1 %v2744_v34, %s3516_s25  ;;  %s3420_s25 = scalar_lea.hbm %s4825_s2, 32 }
 0xab3   : > { %p3422_p4 = scmp.lt.s32.totalorder %s3420_s25, %s3416_s29 }
 0xab5   : > { %p3423_p7 = por %p3422_p4, %p3421_p3 }
 0xab7   : > { %p3424_p8 = pnand %p3423_p7, %p3419_p2 }
 0xab9   : > { %2788 = vrot.lane.b32.xlu2 %v2746_v9, %s3517_s20 }
 0xaba   : > { %2821 = vrot.lane.b32.xlu1 %v2753_v27, %s3513_s26 }
 0xabb   : > { %3427 = shalt.err (!%p3424_p8)
}
 0xabc   : > { %s3521_s26 = smov 128   ;;  %s3522_s14 = smov 8   ;;  %v2739_v28 = vld [vmem:[#allocation7 + $0x78] sm:$0xff]  ;;  %v2715_v39 = vmul.f32 %v2699_v15, %v2683_v61  ;;  %vm2761_vm7 = vcmask 261248   ;;  %vm2767_vm8 = vcmask 392448   ;;  %vm2773_vm2 = vcmask 523648  }
 0xabd   : > { %3126 = dma.vmem_to_hbm [thread:$0]  (%p3641_p5), %s4696_s23, 256, %s2871_s15, %s2841_s21, %s3521_s26, %s3521_s26, %s3522_s14   ;;  %v2731_v25 = vld [vmem:[#allocation7 + $0x38] sm:$0xff]  ;;  %v2755_v2 = vadd.f32 %v2739_v28, %v2723_v24  ;;  %vm2779_vm3 = vcmask 654848   ;;  %vm2785_vm4 = vcmask 786048   ;;  %vm2791_vm5 = vcmask 917248  }
 0xabe   : > { %v2747_v60 = vadd.f32 %v2731_v25, %v2715_v39  ;;  %s4826_s16 = smov 112   ;;  %vm2797_vm11 = vcmask 1048448   ;;  %s4827_s21 = sld [smem:[#allocation23_spill]] }
 0xabf   : > { %s2854_s30 = sshll.u32 %s4671_s24, 4  ;;  %s2836_s12 = scalar_lea.sflag [#allocation4], %s4430_s18  ;;  %s2855_s30 = int_to_ptr.vmem [resolvable:$true] %s2854_s30 }
 0xac1   : > { %2831 = vrot.lane.b32.xlu2 %v2755_v2, %s4826_s16 }
 0xac2   : > { %2794 = vrot.lane.b32.xlu1 %v2747_v60, %s4826_s16 }
 0xac4   : > { %s4828_s27 = smov %s4827_s21  ;;  %s2852_s29 = scalar_lea.hbm %s4827_s21, %s3103_s17 }
 0xac5   : > { %s2856_s25 = sshll.u32 %s2852_s29, 4  ;;  %s3448_s17 = scalar_lea.hbm %s4828_s27, 32  ;;  %s2857_s25 = int_to_ptr.hbm [resolvable:$true] %s2856_s25 }
 0xac6   : > { %s3442_s20 = sshra.s32 %s2857_s25, 4  ;;  %s3443_s20 = int_to_ptr.hbm [resolvable:$true] %s3442_s20 }
 0xac7   : > { %s3444_s26 = scalar_lea.hbm %s3443_s20, 16  ;;  %p3449_p12 = scmp.lt.s32.totalorder %s3443_s20, %s4828_s27 }
 0xac8   : > { %p3445_p9 = scmp.ne.s32.totalorder %s3443_s20, %s3444_s26  ;;  %p3450_p13 = scmp.lt.s32.totalorder %s3448_s17, %s3444_s26 }
 0xaca   : > { %p3446_p10 = pnand %p3445_p9, %p3641_p5  ;;  %p3451_p0 = por %p3450_p13, %p3449_p12 }
 0xacc   : > { %p3447_p11 = pneg %p3446_p10 }
 0xace   : > { %p3452_p1 = pnand %p3451_p0, %p3447_p11 }
 0xaf3   : > { %v2802_v49 = vpop.permute.xlu2 %2801 }
 0xaf4   : > { %2804 = vst.msk [vmem:[%s4671_s24 + $0x8] sm:$0xff] %vm2761_vm7, %v2802_v49 }
 0xafb   : > { %v2807_v10 = vpop.permute.xlu2 %2806 }
 0xafc   : > { %2809 = vst.msk [vmem:[%s4671_s24 + $0x8] sm:$0xff] %vm2767_vm8, %v2807_v10 }
 0xb03   : > { %v2812_v30 = vpop.permute.xlu2 %2811 }
 0xb04   : > { %2814 = vst.msk [vmem:[%s4671_s24 + $0x8] sm:$0xff] %vm2773_vm2, %v2812_v30 }
 0xb0b   : > { %v2817_v37 = vpop.permute.xlu2 %2816  ;;  %v2783_v29 = vpop.permute.xlu0 %2782 }
 0xb0c   : > { %2819 = vst.msk [vmem:[%s4671_s24 + $0x8] sm:$0xff] %vm2779_vm3, %v2817_v37  ;;  %v2759_v43 = vpop.permute.xlu1 %2758 }
 0xb0d   : > { %2762 = vst.msk [vmem:[%s4671_s24] sm:$0xff] %vm2761_vm7, %v2759_v43 }
 0xb13   : > { %v2789_v8 = vpop.permute.xlu2 %2788  ;;  %v2827_v19 = vpop.permute.xlu0 %2826 }
 0xb14   : > { %v2765_v18 = vpop.permute.xlu1 %2764 }
 0xb15   : > { %2768 = vst.msk [vmem:[%s4671_s24] sm:$0xff] %vm2767_vm8, %v2765_v18 }
 0xb1b   : > { %v2832_v7 = vpop.permute.xlu2 %2831 }
 0xb1c   : > { %v2771_v5 = vpop.permute.xlu1 %2770 }
 0xb1d   : > { %2774 = vst.msk [vmem:[%s4671_s24] sm:$0xff] %vm2773_vm2, %v2771_v5 }
 0xb24   : > { %v2777_v48 = vpop.permute.xlu1 %2776 }
 0xb25   : > { %2780 = vst.msk [vmem:[%s4671_s24] sm:$0xff] %vm2779_vm3, %v2777_v48 }
 0xb26   : > { %2786 = vst.msk [vmem:[%s4671_s24] sm:$0xff] %vm2785_vm4, %v2783_v29 }
 0xb27   : > { %2792 = vst.msk [vmem:[%s4671_s24] sm:$0xff] %vm2791_vm5, %v2789_v8 }
 0xb2c   : > { %v2822_v52 = vpop.permute.xlu1 %2821 }
 0xb2d   : > { %2824 = vst.msk [vmem:[%s4671_s24 + $0x8] sm:$0xff] %vm2785_vm4, %v2822_v52 }
 0xb2e   : > { %2829 = vst.msk [vmem:[%s4671_s24 + $0x8] sm:$0xff] %vm2791_vm5, %v2827_v19 }
 0xb2f   : > { %2834 = vst.msk [vmem:[%s4671_s24 + $0x8] sm:$0xff] %vm2797_vm11, %v2832_v7 }
 0xb34   : > { %v2795_v45 = vpop.permute.xlu1 %2794 }
 0xb35   : > { %2798 = vst.msk [vmem:[%s4671_s24] sm:$0xff] %vm2797_vm11, %v2795_v45 }
 0xb36   : > { %3455 = shalt.err (!%p3452_p1)
}
 0xb37   : > { %3125 = dma.vmem_to_hbm [thread:$0]  (%p3641_p5), %s2855_s30, 256, %s2857_s25, %s2836_s12  }
 0xb38 PF: > { %s4829_s18 = sld [smem:[#allocation17_spill]] }
 0xb39   : > { %s4830_s24 = sld [smem:[#allocation15_spill]] }
 0xb3e   : > { %p3152_p2 = scmp.ge.s32.totalorder %s4829_s18, 2 }
 0xb3f   : > { %s2885_s21 = sand.u32 1, %s4830_s24  }
 0xb40   : > { %p3140_p3 = pnand %p3152_p2, %p3645_p6  ;;  %s2886_s29 = scalar_lea.sflag [#allocation4], %s2885_s21 }
 0xb42   : > { %p3141_p4 = pneg %p3140_p3 }
 0xb44   : > { %3481 = dma.done.wait (%p3141_p4), %s2886_s29, 256  }
 0xb45   : > { %3483 = vsyncadd (%p3141_p4), %s2886_s29, 4294967040  ;;  %s2896_s20 = scalar_lea.sflag [#allocation10], %s2885_s21 }
 0xb46   : > { %3485 = dma.done.wait (%p3141_p4), %s2896_s20, 256  }
 0xb47   : > { %3487 = vsyncadd (%p3141_p4), %s2896_s20, 4294967040  ;;  %s4832_s21 = sld [smem:[#allocation18_spill]]  ;;  %s4835_s18 = smov %s3494_s19 }
 0xb48   : > { %s4833_s26 = sld [smem:[#allocation16_spill]] }
 0xb49   : > { %s4834_s20 = sld [smem:[#allocation19_spill]] }
 0xb4d   : > { %p31_p5 = scmp.ge.s32.totalorder %s4832_s21, 4  }
 0xb4e   : > { %s4836_s19 = smov %s4833_s26 }
 0xb4f   :  { %33 = sbr.rel (!%p31_p5) target bundleno = 12 (0xc), region = 141 }
 0xb54   :  { %2902 = vsyncpa [#allocation3], 1 }
 0xb55   :  { %2904 = vsyncpa [#allocation3 + $0x1], 1 }
 0xb56   :  { %2905 = vsyncpa [#allocation6], 1 }
 0xb57   :  { %2906 = vsyncpa [#allocation4], 1 }
 0xb58   :  { %2908 = vsyncpa [#allocation4 + $0x1], 1 }
 0xb59   :  { %2909 = vsyncpa [#allocation10], 1 }
 0xb5a   :  { %2911 = vsyncpa [#allocation10 + $0x1], 1 }

</bundles_post_ra>
